<compile_context>
chip_gen: v5e
topology: v5e:2x2
jax: 0.10.0
libtpu: 0.0.40
codegen_flags: <defaults>
</compile_context>

<pallas_src>
import functools

import numpy as np
import jax
import jax.numpy as jnp
from jax import lax
from jax.experimental import pallas as pl
from jax.experimental.pallas import tpu as pltpu


PRIMITIVES_cnn = [
    "none",
    "max_pool_3x3",
    "avg_pool_3x3",
    "skip_connect",
    "sep_conv_3x3",
    "sep_conv_5x5",
    "dil_conv_3x3",
    "dil_conv_5x5",
]

PAD = 4          # max one-sided spatial padding any primitive needs (dil_conv_5x5)
BN_EPS = 1e-5

# 32 MiB is a quarter of v5e/v6e physical VMEM and half of v7x's 64 MiB; plenty here.
_COMPILER_PARAMS = pltpu.CompilerParams(vmem_limit_bytes=32 * 1024 * 1024)


def _vmem():
    return pl.BlockSpec(memory_space=pltpu.MemorySpace.VMEM)


# ----------------------------------------------------------------------------
# Static program build: turn (numpy architecture mask, params) into a static
# per-step primitive list plus two packed weight slabs.
# ----------------------------------------------------------------------------
def _build_program(params, mask_cnn, *, steps, C):
    mask_cnn = np.asarray(mask_cnn)
    num_edges = sum(2 + i for i in range(steps))
    assert mask_cnn.shape[0] == num_edges, mask_cnn.shape

    pw_list, dw_list = [], []
    pw_rows, dw_cols = [0], [0]

    def add_pw(w):                      # w: (Cout, Cin) bf16
        co, ci = w.shape
        spec = (pw_rows[0], co, ci)
        pw_list.append(w)
        pw_rows[0] += co
        return spec

    def add_dw(w):                      # w: (C, K) f32, tap kk in column kk
        _, k = w.shape
        spec = (dw_cols[0], k)
        dw_list.append(w)
        dw_cols[0] += k
        return spec

    program = {
        "pre0": add_pw(params["pre0"]["w"]),
        "pre1": add_pw(params["pre1"]["w"]),
    }

    step_items = []
    offset = 0
    n_states = 2
    for _ in range(steps):
        items = []
        for j in range(n_states):
            row = mask_cnn[offset + j]
            for sel in np.nonzero(row)[0]:
                prim = PRIMITIVES_cnn[int(sel)]
                if prim == "none":
                    continue            # Zero op: contributes zeros to the edge sum
                if prim.startswith("sep_conv"):
                    p = params["ops"][offset + j][prim]
                    specs = {"dw1": add_dw(p["dw1"]), "pw1": add_pw(p["pw1"]),
                             "dw2": add_dw(p["dw2"]), "pw2": add_pw(p["pw2"])}
                elif prim.startswith("dil_conv"):
                    p = params["ops"][offset + j][prim]
                    specs = {"dw": add_dw(p["dw"]), "pw": add_pw(p["pw"])}
                else:                   # max_pool / avg_pool / skip_connect (stride 1)
                    specs = {}
                items.append((j, prim, specs))
        step_items.append(items)
        offset += n_states
        n_states += 1
    program["steps"] = step_items

    # pack weight slabs (done once per traced call; tiny XLA-side concats)
    max_cin = max(w.shape[1] for w in pw_list)
    pw_slab = jnp.concatenate(
        [jnp.pad(w, ((0, 0), (0, max_cin - w.shape[1]))) for w in pw_list],
        axis=0).astype(jnp.bfloat16)
    if dw_list:
        dw_slab = jnp.concatenate(dw_list, axis=1).astype(jnp.float32)
    else:
        dw_slab = jnp.zeros((C, 1), jnp.float32)   # dummy (kernel ignores it)
    return program, pw_slab, dw_slab


# ----------------------------------------------------------------------------
# The single fused cell kernel
# ----------------------------------------------------------------------------
def _make_cell_kernel(program, *, N, C, L, multiplier):
    Lpad = L + 2 * PAD
    W = N * Lpad

    def kernel(s0_ref, s1_ref, pw_ref, dw_ref, o_ref):
        # ---- validity mask over the packed lane axis (no extra HBM input) ----
        pos = lax.broadcasted_iota(jnp.int32, (C, W), 1)
        valid_b = (pos >= PAD) & (pos < PAD + L)
        for n in range(1, N):
            lo = n * Lpad + PAD
            valid_b = valid_b | ((pos >= lo) & (pos < lo + L))
        mask_f = jnp.where(valid_b, 1.0, 0.0)
        inv_cnt = 1.0 / float(N * L)

        pw_all = pw_ref[...]            # (rows, max_cin) bf16
        dw_all = dw_ref[...]            # (C, taps)       f32
        memo = {}

        def lane_shift(x, off):
            """y[:, j] = x[:, j + off], zeros shifted in at the global boundary."""
            if off == 0:
                return x
            c = x.shape[0]
            if off > 0:
                return jnp.concatenate(
                    [x[:, off:], jnp.zeros((c, off), x.dtype)], axis=1)
            return jnp.concatenate(
                [jnp.zeros((c, -off), x.dtype), x[:, :W + off]], axis=1)

        def bn(x):
            """BatchNorm1d(affine=False), training-mode stats over (N, L) valid lanes.
            Pads are zero so plain lane sums give the valid-lane sums; pads re-zeroed."""
            s = jnp.sum(x, axis=1, keepdims=True)
            ss = jnp.sum(x * x, axis=1, keepdims=True)
            mean = s * inv_cnt
            var = ss * inv_cnt - mean * mean
            inv_std = lax.rsqrt(var + BN_EPS)
            return jnp.where(valid_b, (x - mean) * inv_std, 0.0)

        def pw_conv(x, spec):
            """1x1 conv as one MXU matmul: (Cout,Cin)@(Cin, N*Lpad), f32 accumulate."""
            off, cout, cin = spec
            w = pw_all[off:off + cout, 0:cin]
            return jnp.dot(w, x.astype(jnp.bfloat16),
                           preferred_element_type=jnp.float32)

        def dw_conv(xr, spec, dilation):
            """Depthwise 1-D conv via static lane shifts of the zero-padded slab."""
            off, k = spec
            p = (k - 1) * dilation // 2
            w = dw_all[:, off:off + k]
            acc = lane_shift(xr, -p) * w[:, 0:1]
            for kk in range(1, k):
                acc = acc + lane_shift(xr, kk * dilation - p) * w[:, kk:kk + 1]
            return acc * mask_f          # re-zero pad lanes (cross-sample leakage)

        def inv_avg_counts():            # count_include_pad=False divisor, hoisted
            if "icw" not in memo:
                cw = lane_shift(mask_f, -1) + mask_f + lane_shift(mask_f, 1)
                memo["icw"] = 1.0 / jnp.maximum(cw, 1.0)
            return memo["icw"]

        # ---- preprocess: ReLU -> 1x1 conv -> BN for both cell inputs ----
        s0 = bn(pw_conv(jnp.maximum(s0_ref[...], 0.0), program["pre0"]))
        s1 = bn(pw_conv(jnp.maximum(s1_ref[...], 0.0), program["pre1"]))
        states = [s0, s1]

        relu_cache = {}                  # relu(state) shared across primitives/steps

        def relu_of(idx):
            if idx not in relu_cache:
                relu_cache[idx] = jnp.maximum(states[idx], 0.0)
            return relu_cache[idx]

        # ---- DAG steps: every selected primitive of every incoming edge, fused ----
        for items in program["steps"]:
            acc = jnp.zeros((C, W), jnp.float32)
            for (sidx, prim, specs) in items:
                x = states[sidx]
                if prim == "skip_connect":                     # Identity (stride 1)
                    acc = acc + x
                elif prim == "max_pool_3x3":                   # -inf padding via mask
                    xm = jnp.where(valid_b, x, -1e30)
                    r = jnp.maximum(jnp.maximum(lane_shift(xm, -1), xm),
                                    lane_shift(xm, 1))
                    acc = acc + bn(jnp.where(valid_b, r, 0.0))  # MixedOp pool BN
                elif prim == "avg_pool_3x3":                   # count_include_pad=False
                    ssum = lane_shift(x, -1) + x + lane_shift(x, 1)
                    acc = acc + bn(ssum * inv_avg_counts() * mask_f)
                elif prim.startswith("sep_conv"):
                    h = dw_conv(relu_of(sidx), specs["dw1"], 1)
                    h = bn(pw_conv(h, specs["pw1"]))
                    h = dw_conv(jnp.maximum(h, 0.0), specs["dw2"], 1)
                    acc = acc + bn(pw_conv(h, specs["pw2"]))
                elif prim.startswith("dil_conv"):
                    h = dw_conv(relu_of(sidx), specs["dw"], 2)
                    acc = acc + bn(pw_conv(h, specs["pw"]))
            states.append(acc)

        # ---- single dense store of the channel-concatenated cell output ----
        o_ref[...] = jnp.concatenate(states[-multiplier:], axis=0)

    return kernel


# ----------------------------------------------------------------------------
# Wrapper (layout plumbing only — no per-step HBM round trips)
# ----------------------------------------------------------------------------
def _pack_state(x):
    """(N, Cin, L) -> lane-dense (Cin, N*(L+2*PAD)) with zero pads between samples."""
    n, c, l = x.shape
    xp = jnp.pad(x, ((0, 0), (0, 0), (PAD, PAD)))
    return jnp.transpose(xp, (1, 0, 2)).reshape(c, n * (l + 2 * PAD))


def cnn_cell_forward(params, s0, s1, mask_cnn, *, steps, multiplier,
                     reduction, reduction_prev, reduction_high):
    if reduction or reduction_prev or reduction_high:
        # TODO(synk): strided (reduction / reduction_high / FactorizedReduce) cells need a
        #             per-sample strided-subsample path in the packed lane layout.
        raise NotImplementedError("fused CNN_Cell_search kernel: normal (stride-1) cells only")

    N, _, L = s0.shape
    C = params["pre1"]["w"].shape[0]
    Lpad = L + 2 * PAD
    W = N * Lpad

    program, pw_slab, dw_slab = _build_program(params, mask_cnn, steps=steps, C=C)
    kernel = _make_cell_kernel(program, N=N, C=C, L=L, multiplier=multiplier)

    out2d = pl.pallas_call(
        kernel,
        out_shape=jax.ShapeDtypeStruct((multiplier * C, W), jnp.float32),
        in_specs=[_vmem(), _vmem(), _vmem(), _vmem()],
        out_specs=_vmem(),
        compiler_params=_COMPILER_PARAMS,
    )(_pack_state(s0), _pack_state(s1), pw_slab, dw_slab)

    out3 = out2d.reshape(multiplier * C, N, Lpad)[:, :, PAD:PAD + L]
    return jnp.transpose(out3, (1, 0, 2))            # (N, multiplier*C, L)


# ----------------------------------------------------------------------------
# Deterministic parameter init (stored directly in kernel layouts:
#   pointwise weights: bf16 (Cout, Cin);  depthwise weights: f32 (C, K))
# ----------------------------------------------------------------------------
def init_params(key, *, C_pp, C_p, C, steps):
    num_edges = sum(2 + i for i in range(steps))
    keys = iter(jax.random.split(key, 16 * num_edges + 16))

    def pw(co, ci):
        w = 0.1 * jax.random.normal(next(keys), (co, ci), jnp.float32)
        return w.astype(jnp.bfloat16)               # bf16 MXU operand; f32 accumulation

    def dw(c, k):
        return 0.1 * jax.random.normal(next(keys), (c, k), jnp.float32)

    params = {"pre0": {"w": pw(C, C_pp)}, "pre1": {"w": pw(C, C_p)}, "ops": []}
    for _ in range(num_edges):
        params["ops"].append({
            "sep_conv_3x3": {"dw1": dw(C, 3), "pw1": pw(C, C),
                             "dw2": dw(C, 3), "pw2": pw(C, C)},
            "sep_conv_5x5": {"dw1": dw(C, 5), "pw1": pw(C, C),
                             "dw2": dw(C, 5), "pw2": pw(C, C)},
            "dil_conv_3x3": {"dw": dw(C, 3), "pw": pw(C, C)},
            "dil_conv_5x5": {"dw": dw(C, 5), "pw": pw(C, C)},
        })
    return params


# ----------------------------------------------------------------------------
if __name__ == "__main__":
    steps, multiplier = 4, 4
    C_pp = C_p = C = 8
    N, L = 2, 16

    num_edges = sum(2 + i for i in range(steps))      # 14
    num_prims = len(PRIMITIVES_cnn)                   # 8

    # deterministic sparse architecture mask (14 x 8); last edge all-zero
    mask = np.zeros((num_edges, num_prims), dtype=np.float32)
    for e in range(num_edges):
        mask[e, e % num_prims] = 1.0
        if e % 3 == 0:
            mask[e, (e + 4) % num_prims] = 1.0
    mask[num_edges - 1, :] = 0.0

    key = jax.random.PRNGKey(0)
    k_in0, k_in1, k_par = jax.random.split(key, 3)
    s0 = jax.random.normal(k_in0, (N, C_pp, L), jnp.float32)
    s1 = jax.random.normal(k_in1, (N, C_p, L), jnp.float32)
    params = init_params(k_par, C_pp=C_pp, C_p=C_p, C=C, steps=steps)

    def fwd_fn(p, a, b):
        return cnn_cell_forward(p, a, b, mask, steps=steps, multiplier=multiplier,
                                reduction=False, reduction_prev=False,
                                reduction_high=False)

    fwd = jax.jit(fwd_fn)
    out = jax.block_until_ready(fwd(params, s0, s1))

    assert out.shape == (N, multiplier * C, L), out.shape
    assert bool(jnp.all(jnp.isfinite(out)))
    print("KERNEL_OK")
</pallas_src>

<mosaic_0001>
module attributes {stable_mosaic.version = 11 : i64} {
  func.func @kernel(%arg0: memref<8x48xf32, #tpu.memory_space<vmem>>, %arg1: memref<8x48xf32, #tpu.memory_space<vmem>>, %arg2: memref<120x8xbf16, #tpu.memory_space<vmem>>, %arg3: memref<8x51xf32, #tpu.memory_space<vmem>>, %arg4: memref<32x48xf32, #tpu.memory_space<vmem>>) attributes {dimension_semantics = [], scalar_prefetch = 0 : i64, scratch_operands = 0 : i64, tpu.core_type = #tpu.core_type<tc>} {
    %0 = tpu.iota {dimensions = array<i32: 1>} : vector<8x48xi32>
    %c4_i32 = arith.constant 4 : i32
    %1 = vector.broadcast %c4_i32 : i32 to vector<8x48xi32>
    %2 = arith.cmpi sge, %0, %1 : vector<8x48xi32>
    %c20_i32 = arith.constant 20 : i32
    %3 = vector.broadcast %c20_i32 : i32 to vector<8x48xi32>
    %4 = arith.cmpi slt, %0, %3 : vector<8x48xi32>
    %5 = arith.andi %2, %4 : vector<8x48xi1>
    %c28_i32 = arith.constant 28 : i32
    %6 = vector.broadcast %c28_i32 : i32 to vector<8x48xi32>
    %7 = arith.cmpi sge, %0, %6 : vector<8x48xi32>
    %c44_i32 = arith.constant 44 : i32
    %8 = vector.broadcast %c44_i32 : i32 to vector<8x48xi32>
    %9 = arith.cmpi slt, %0, %8 : vector<8x48xi32>
    %10 = arith.andi %7, %9 : vector<8x48xi1>
    %11 = arith.ori %5, %10 : vector<8x48xi1>
    %cst = arith.constant 1.000000e+00 : f32
    %cst_0 = arith.constant 0.000000e+00 : f32
    %12 = vector.broadcast %cst : f32 to vector<8x48xf32>
    %13 = vector.broadcast %cst_0 : f32 to vector<8x48xf32>
    %14 = arith.select %11, %12, %13 : vector<8x48xi1>, vector<8x48xf32>
    %c0 = arith.constant 0 : index
    %c0_1 = arith.constant 0 : index
    %15 = vector.load %arg2[%c0, %c0_1] : memref<120x8xbf16, #tpu.memory_space<vmem>>, vector<120x8xbf16>
    %c0_2 = arith.constant 0 : index
    %c0_3 = arith.constant 0 : index
    %16 = vector.load %arg3[%c0_2, %c0_3] : memref<8x51xf32, #tpu.memory_space<vmem>>, vector<8x51xf32>
    %c0_4 = arith.constant 0 : index
    %c0_5 = arith.constant 0 : index
    %17 = vector.load %arg0[%c0_4, %c0_5] : memref<8x48xf32, #tpu.memory_space<vmem>>, vector<8x48xf32>
    %cst_6 = arith.constant 0.000000e+00 : f32
    %18 = vector.broadcast %cst_6 : f32 to vector<8x48xf32>
    %19 = arith.maximumf %17, %18 : vector<8x48xf32>
    %20 = vector.extract_strided_slice %15 {offsets = [0, 0], sizes = [8, 8], strides = [1, 1]} : vector<120x8xbf16> to vector<8x8xbf16>
    %21 = arith.truncf %19 : vector<8x48xf32> to vector<8x48xbf16>
    %cst_7 = arith.constant dense<0.000000e+00> : vector<8x48xf32>
    %22 = tpu.matmul %20, %21, %cst_7 {dimension_numbers = #tpu.dot_dimension_numbers<[1], [0], [0], [1], [0, 0, 1, 1], [], []>} : vector<8x8xbf16>, vector<8x48xbf16>, vector<8x48xf32> -> vector<8x48xf32>
    %cst_8 = arith.constant dense<0.000000e+00> : vector<8xf32>
    %23 = vector.multi_reduction <add>, %22, %cst_8 [1] : vector<8x48xf32> to vector<8xf32>
    %24 = vector.shape_cast %23 : vector<8xf32> to vector<8x1xf32>
    %25 = arith.mulf %22, %22 : vector<8x48xf32>
    %cst_9 = arith.constant dense<0.000000e+00> : vector<8xf32>
    %26 = vector.multi_reduction <add>, %25, %cst_9 [1] : vector<8x48xf32> to vector<8xf32>
    %27 = vector.shape_cast %26 : vector<8xf32> to vector<8x1xf32>
    %cst_10 = arith.constant 3.125000e-02 : f32
    %28 = vector.broadcast %cst_10 : f32 to vector<8x1xf32>
    %29 = arith.mulf %24, %28 : vector<8x1xf32>
    %cst_11 = arith.constant 3.125000e-02 : f32
    %30 = vector.broadcast %cst_11 : f32 to vector<8x1xf32>
    %31 = arith.mulf %27, %30 : vector<8x1xf32>
    %32 = arith.mulf %29, %29 : vector<8x1xf32>
    %33 = arith.subf %31, %32 : vector<8x1xf32>
    %cst_12 = arith.constant 9.99999974E-6 : f32
    %34 = vector.broadcast %cst_12 : f32 to vector<8x1xf32>
    %35 = arith.addf %33, %34 : vector<8x1xf32>
    %36 = math.rsqrt %35 : vector<8x1xf32>
    %37 = vector.broadcast %29 : vector<8x1xf32> to vector<8x48xf32>
    %38 = arith.subf %22, %37 : vector<8x48xf32>
    %39 = vector.broadcast %36 : vector<8x1xf32> to vector<8x48xf32>
    %40 = arith.mulf %38, %39 : vector<8x48xf32>
    %cst_13 = arith.constant 0.000000e+00 : f32
    %41 = vector.broadcast %cst_13 : f32 to vector<8x48xf32>
    %42 = arith.select %11, %40, %41 : vector<8x48xi1>, vector<8x48xf32>
    %c0_14 = arith.constant 0 : index
    %c0_15 = arith.constant 0 : index
    %43 = vector.load %arg1[%c0_14, %c0_15] : memref<8x48xf32, #tpu.memory_space<vmem>>, vector<8x48xf32>
    %cst_16 = arith.constant 0.000000e+00 : f32
    %44 = vector.broadcast %cst_16 : f32 to vector<8x48xf32>
    %45 = arith.maximumf %43, %44 : vector<8x48xf32>
    %46 = vector.extract_strided_slice %15 {offsets = [8, 0], sizes = [8, 8], strides = [1, 1]} : vector<120x8xbf16> to vector<8x8xbf16>
    %47 = arith.truncf %45 : vector<8x48xf32> to vector<8x48xbf16>
    %cst_17 = arith.constant dense<0.000000e+00> : vector<8x48xf32>
    %48 = tpu.matmul %46, %47, %cst_17 {dimension_numbers = #tpu.dot_dimension_numbers<[1], [0], [0], [1], [0, 0, 1, 1], [], []>} : vector<8x8xbf16>, vector<8x48xbf16>, vector<8x48xf32> -> vector<8x48xf32>
    %cst_18 = arith.constant dense<0.000000e+00> : vector<8xf32>
    %49 = vector.multi_reduction <add>, %48, %cst_18 [1] : vector<8x48xf32> to vector<8xf32>
    %50 = vector.shape_cast %49 : vector<8xf32> to vector<8x1xf32>
    %51 = arith.mulf %48, %48 : vector<8x48xf32>
    %cst_19 = arith.constant dense<0.000000e+00> : vector<8xf32>
    %52 = vector.multi_reduction <add>, %51, %cst_19 [1] : vector<8x48xf32> to vector<8xf32>
    %53 = vector.shape_cast %52 : vector<8xf32> to vector<8x1xf32>
    %cst_20 = arith.constant 3.125000e-02 : f32
    %54 = vector.broadcast %cst_20 : f32 to vector<8x1xf32>
    %55 = arith.mulf %50, %54 : vector<8x1xf32>
    %cst_21 = arith.constant 3.125000e-02 : f32
    %56 = vector.broadcast %cst_21 : f32 to vector<8x1xf32>
    %57 = arith.mulf %53, %56 : vector<8x1xf32>
    %58 = arith.mulf %55, %55 : vector<8x1xf32>
    %59 = arith.subf %57, %58 : vector<8x1xf32>
    %cst_22 = arith.constant 9.99999974E-6 : f32
    %60 = vector.broadcast %cst_22 : f32 to vector<8x1xf32>
    %61 = arith.addf %59, %60 : vector<8x1xf32>
    %62 = math.rsqrt %61 : vector<8x1xf32>
    %63 = vector.broadcast %55 : vector<8x1xf32> to vector<8x48xf32>
    %64 = arith.subf %48, %63 : vector<8x48xf32>
    %65 = vector.broadcast %62 : vector<8x1xf32> to vector<8x48xf32>
    %66 = arith.mulf %64, %65 : vector<8x48xf32>
    %cst_23 = arith.constant 0.000000e+00 : f32
    %67 = vector.broadcast %cst_23 : f32 to vector<8x48xf32>
    %68 = arith.select %11, %66, %67 : vector<8x48xi1>, vector<8x48xf32>
    %cst_24 = arith.constant 0.000000e+00 : f32
    %69 = vector.broadcast %cst_24 : f32 to vector<8x48xf32>
    %cst_25 = arith.constant 0.000000e+00 : f32
    %70 = vector.broadcast %cst_25 : f32 to vector<8x48xf32>
    %71 = arith.maximumf %42, %70 : vector<8x48xf32>
    %72 = vector.extract_strided_slice %16 {offsets = [0, 0], sizes = [8, 3], strides = [1, 1]} : vector<8x51xf32> to vector<8x3xf32>
    %cst_26 = arith.constant 0.000000e+00 : f32
    %73 = vector.broadcast %cst_26 : f32 to vector<8x1xf32>
    %74 = vector.extract_strided_slice %71 {offsets = [0, 0], sizes = [8, 47], strides = [1, 1]} : vector<8x48xf32> to vector<8x47xf32>
    %75 = tpu.concatenate %73, %74 in 1 : vector<8x1xf32>, vector<8x47xf32> -> vector<8x48xf32>
    %76 = vector.extract_strided_slice %72 {offsets = [0, 0], sizes = [8, 1], strides = [1, 1]} : vector<8x3xf32> to vector<8x1xf32>
    %77 = vector.broadcast %76 : vector<8x1xf32> to vector<8x48xf32>
    %78 = arith.mulf %75, %77 : vector<8x48xf32>
    %79 = vector.extract_strided_slice %72 {offsets = [0, 1], sizes = [8, 1], strides = [1, 1]} : vector<8x3xf32> to vector<8x1xf32>
    %80 = vector.broadcast %79 : vector<8x1xf32> to vector<8x48xf32>
    %81 = arith.mulf %71, %80 : vector<8x48xf32>
    %82 = arith.addf %78, %81 : vector<8x48xf32>
    %83 = vector.extract_strided_slice %71 {offsets = [0, 1], sizes = [8, 47], strides = [1, 1]} : vector<8x48xf32> to vector<8x47xf32>
    %cst_27 = arith.constant 0.000000e+00 : f32
    %84 = vector.broadcast %cst_27 : f32 to vector<8x1xf32>
    %85 = tpu.concatenate %83, %84 in 1 : vector<8x47xf32>, vector<8x1xf32> -> vector<8x48xf32>
    %86 = vector.extract_strided_slice %72 {offsets = [0, 2], sizes = [8, 1], strides = [1, 1]} : vector<8x3xf32> to vector<8x1xf32>
    %87 = vector.broadcast %86 : vector<8x1xf32> to vector<8x48xf32>
    %88 = arith.mulf %85, %87 : vector<8x48xf32>
    %89 = arith.addf %82, %88 : vector<8x48xf32>
    %90 = arith.mulf %89, %14 : vector<8x48xf32>
    %91 = vector.extract_strided_slice %15 {offsets = [16, 0], sizes = [8, 8], strides = [1, 1]} : vector<120x8xbf16> to vector<8x8xbf16>
    %92 = arith.truncf %90 : vector<8x48xf32> to vector<8x48xbf16>
    %cst_28 = arith.constant dense<0.000000e+00> : vector<8x48xf32>
    %93 = tpu.matmul %91, %92, %cst_28 {dimension_numbers = #tpu.dot_dimension_numbers<[1], [0], [0], [1], [0, 0, 1, 1], [], []>} : vector<8x8xbf16>, vector<8x48xbf16>, vector<8x48xf32> -> vector<8x48xf32>
    %cst_29 = arith.constant dense<0.000000e+00> : vector<8xf32>
    %94 = vector.multi_reduction <add>, %93, %cst_29 [1] : vector<8x48xf32> to vector<8xf32>
    %95 = vector.shape_cast %94 : vector<8xf32> to vector<8x1xf32>
    %96 = arith.mulf %93, %93 : vector<8x48xf32>
    %cst_30 = arith.constant dense<0.000000e+00> : vector<8xf32>
    %97 = vector.multi_reduction <add>, %96, %cst_30 [1] : vector<8x48xf32> to vector<8xf32>
    %98 = vector.shape_cast %97 : vector<8xf32> to vector<8x1xf32>
    %cst_31 = arith.constant 3.125000e-02 : f32
    %99 = vector.broadcast %cst_31 : f32 to vector<8x1xf32>
    %100 = arith.mulf %95, %99 : vector<8x1xf32>
    %cst_32 = arith.constant 3.125000e-02 : f32
    %101 = vector.broadcast %cst_32 : f32 to vector<8x1xf32>
    %102 = arith.mulf %98, %101 : vector<8x1xf32>
    %103 = arith.mulf %100, %100 : vector<8x1xf32>
    %104 = arith.subf %102, %103 : vector<8x1xf32>
    %cst_33 = arith.constant 9.99999974E-6 : f32
    %105 = vector.broadcast %cst_33 : f32 to vector<8x1xf32>
    %106 = arith.addf %104, %105 : vector<8x1xf32>
    %107 = math.rsqrt %106 : vector<8x1xf32>
    %108 = vector.broadcast %100 : vector<8x1xf32> to vector<8x48xf32>
    %109 = arith.subf %93, %108 : vector<8x48xf32>
    %110 = vector.broadcast %107 : vector<8x1xf32> to vector<8x48xf32>
    %111 = arith.mulf %109, %110 : vector<8x48xf32>
    %cst_34 = arith.constant 0.000000e+00 : f32
    %112 = vector.broadcast %cst_34 : f32 to vector<8x48xf32>
    %113 = arith.select %11, %111, %112 : vector<8x48xi1>, vector<8x48xf32>
    %cst_35 = arith.constant 0.000000e+00 : f32
    %114 = vector.broadcast %cst_35 : f32 to vector<8x48xf32>
    %115 = arith.maximumf %113, %114 : vector<8x48xf32>
    %116 = vector.extract_strided_slice %16 {offsets = [0, 3], sizes = [8, 3], strides = [1, 1]} : vector<8x51xf32> to vector<8x3xf32>
    %cst_36 = arith.constant 0.000000e+00 : f32
    %117 = vector.broadcast %cst_36 : f32 to vector<8x1xf32>
    %118 = vector.extract_strided_slice %115 {offsets = [0, 0], sizes = [8, 47], strides = [1, 1]} : vector<8x48xf32> to vector<8x47xf32>
    %119 = tpu.concatenate %117, %118 in 1 : vector<8x1xf32>, vector<8x47xf32> -> vector<8x48xf32>
    %120 = vector.extract_strided_slice %116 {offsets = [0, 0], sizes = [8, 1], strides = [1, 1]} : vector<8x3xf32> to vector<8x1xf32>
    %121 = vector.broadcast %120 : vector<8x1xf32> to vector<8x48xf32>
    %122 = arith.mulf %119, %121 : vector<8x48xf32>
    %123 = vector.extract_strided_slice %116 {offsets = [0, 1], sizes = [8, 1], strides = [1, 1]} : vector<8x3xf32> to vector<8x1xf32>
    %124 = vector.broadcast %123 : vector<8x1xf32> to vector<8x48xf32>
    %125 = arith.mulf %115, %124 : vector<8x48xf32>
    %126 = arith.addf %122, %125 : vector<8x48xf32>
    %127 = vector.extract_strided_slice %115 {offsets = [0, 1], sizes = [8, 47], strides = [1, 1]} : vector<8x48xf32> to vector<8x47xf32>
    %cst_37 = arith.constant 0.000000e+00 : f32
    %128 = vector.broadcast %cst_37 : f32 to vector<8x1xf32>
    %129 = tpu.concatenate %127, %128 in 1 : vector<8x47xf32>, vector<8x1xf32> -> vector<8x48xf32>
    %130 = vector.extract_strided_slice %116 {offsets = [0, 2], sizes = [8, 1], strides = [1, 1]} : vector<8x3xf32> to vector<8x1xf32>
    %131 = vector.broadcast %130 : vector<8x1xf32> to vector<8x48xf32>
    %132 = arith.mulf %129, %131 : vector<8x48xf32>
    %133 = arith.addf %126, %132 : vector<8x48xf32>
    %134 = arith.mulf %133, %14 : vector<8x48xf32>
    %135 = vector.extract_strided_slice %15 {offsets = [24, 0], sizes = [8, 8], strides = [1, 1]} : vector<120x8xbf16> to vector<8x8xbf16>
    %136 = arith.truncf %134 : vector<8x48xf32> to vector<8x48xbf16>
    %cst_38 = arith.constant dense<0.000000e+00> : vector<8x48xf32>
    %137 = tpu.matmul %135, %136, %cst_38 {dimension_numbers = #tpu.dot_dimension_numbers<[1], [0], [0], [1], [0, 0, 1, 1], [], []>} : vector<8x8xbf16>, vector<8x48xbf16>, vector<8x48xf32> -> vector<8x48xf32>
    %cst_39 = arith.constant dense<0.000000e+00> : vector<8xf32>
    %138 = vector.multi_reduction <add>, %137, %cst_39 [1] : vector<8x48xf32> to vector<8xf32>
    %139 = vector.shape_cast %138 : vector<8xf32> to vector<8x1xf32>
    %140 = arith.mulf %137, %137 : vector<8x48xf32>
    %cst_40 = arith.constant dense<0.000000e+00> : vector<8xf32>
    %141 = vector.multi_reduction <add>, %140, %cst_40 [1] : vector<8x48xf32> to vector<8xf32>
    %142 = vector.shape_cast %141 : vector<8xf32> to vector<8x1xf32>
    %cst_41 = arith.constant 3.125000e-02 : f32
    %143 = vector.broadcast %cst_41 : f32 to vector<8x1xf32>
    %144 = arith.mulf %139, %143 : vector<8x1xf32>
    %cst_42 = arith.constant 3.125000e-02 : f32
    %145 = vector.broadcast %cst_42 : f32 to vector<8x1xf32>
    %146 = arith.mulf %142, %145 : vector<8x1xf32>
    %147 = arith.mulf %144, %144 : vector<8x1xf32>
    %148 = arith.subf %146, %147 : vector<8x1xf32>
    %cst_43 = arith.constant 9.99999974E-6 : f32
    %149 = vector.broadcast %cst_43 : f32 to vector<8x1xf32>
    %150 = arith.addf %148, %149 : vector<8x1xf32>
    %151 = math.rsqrt %150 : vector<8x1xf32>
    %152 = vector.broadcast %144 : vector<8x1xf32> to vector<8x48xf32>
    %153 = arith.subf %137, %152 : vector<8x48xf32>
    %154 = vector.broadcast %151 : vector<8x1xf32> to vector<8x48xf32>
    %155 = arith.mulf %153, %154 : vector<8x48xf32>
    %cst_44 = arith.constant 0.000000e+00 : f32
    %156 = vector.broadcast %cst_44 : f32 to vector<8x48xf32>
    %157 = arith.select %11, %155, %156 : vector<8x48xi1>, vector<8x48xf32>
    %158 = arith.addf %69, %157 : vector<8x48xf32>
    %cst_45 = arith.constant -1.000000e+30 : f32
    %159 = vector.broadcast %cst_45 : f32 to vector<8x48xf32>
    %160 = arith.select %11, %68, %159 : vector<8x48xi1>, vector<8x48xf32>
    %cst_46 = arith.constant 0.000000e+00 : f32
    %161 = vector.broadcast %cst_46 : f32 to vector<8x1xf32>
    %162 = vector.extract_strided_slice %160 {offsets = [0, 0], sizes = [8, 47], strides = [1, 1]} : vector<8x48xf32> to vector<8x47xf32>
    %163 = tpu.concatenate %161, %162 in 1 : vector<8x1xf32>, vector<8x47xf32> -> vector<8x48xf32>
    %164 = arith.maximumf %163, %160 : vector<8x48xf32>
    %165 = vector.extract_strided_slice %160 {offsets = [0, 1], sizes = [8, 47], strides = [1, 1]} : vector<8x48xf32> to vector<8x47xf32>
    %cst_47 = arith.constant 0.000000e+00 : f32
    %166 = vector.broadcast %cst_47 : f32 to vector<8x1xf32>
    %167 = tpu.concatenate %165, %166 in 1 : vector<8x47xf32>, vector<8x1xf32> -> vector<8x48xf32>
    %168 = arith.maximumf %164, %167 : vector<8x48xf32>
    %cst_48 = arith.constant 0.000000e+00 : f32
    %169 = vector.broadcast %cst_48 : f32 to vector<8x48xf32>
    %170 = arith.select %11, %168, %169 : vector<8x48xi1>, vector<8x48xf32>
    %cst_49 = arith.constant dense<0.000000e+00> : vector<8xf32>
    %171 = vector.multi_reduction <add>, %170, %cst_49 [1] : vector<8x48xf32> to vector<8xf32>
    %172 = vector.shape_cast %171 : vector<8xf32> to vector<8x1xf32>
    %173 = arith.mulf %170, %170 : vector<8x48xf32>
    %cst_50 = arith.constant dense<0.000000e+00> : vector<8xf32>
    %174 = vector.multi_reduction <add>, %173, %cst_50 [1] : vector<8x48xf32> to vector<8xf32>
    %175 = vector.shape_cast %174 : vector<8xf32> to vector<8x1xf32>
    %cst_51 = arith.constant 3.125000e-02 : f32
    %176 = vector.broadcast %cst_51 : f32 to vector<8x1xf32>
    %177 = arith.mulf %172, %176 : vector<8x1xf32>
    %cst_52 = arith.constant 3.125000e-02 : f32
    %178 = vector.broadcast %cst_52 : f32 to vector<8x1xf32>
    %179 = arith.mulf %175, %178 : vector<8x1xf32>
    %180 = arith.mulf %177, %177 : vector<8x1xf32>
    %181 = arith.subf %179, %180 : vector<8x1xf32>
    %cst_53 = arith.constant 9.99999974E-6 : f32
    %182 = vector.broadcast %cst_53 : f32 to vector<8x1xf32>
    %183 = arith.addf %181, %182 : vector<8x1xf32>
    %184 = math.rsqrt %183 : vector<8x1xf32>
    %185 = vector.broadcast %177 : vector<8x1xf32> to vector<8x48xf32>
    %186 = arith.subf %170, %185 : vector<8x48xf32>
    %187 = vector.broadcast %184 : vector<8x1xf32> to vector<8x48xf32>
    %188 = arith.mulf %186, %187 : vector<8x48xf32>
    %cst_54 = arith.constant 0.000000e+00 : f32
    %189 = vector.broadcast %cst_54 : f32 to vector<8x48xf32>
    %190 = arith.select %11, %188, %189 : vector<8x48xi1>, vector<8x48xf32>
    %191 = arith.addf %158, %190 : vector<8x48xf32>
    %cst_55 = arith.constant 0.000000e+00 : f32
    %192 = vector.broadcast %cst_55 : f32 to vector<8x48xf32>
    %cst_56 = arith.constant 0.000000e+00 : f32
    %193 = vector.broadcast %cst_56 : f32 to vector<8x1xf32>
    %194 = vector.extract_strided_slice %42 {offsets = [0, 0], sizes = [8, 47], strides = [1, 1]} : vector<8x48xf32> to vector<8x47xf32>
    %195 = tpu.concatenate %193, %194 in 1 : vector<8x1xf32>, vector<8x47xf32> -> vector<8x48xf32>
    %196 = arith.addf %195, %42 : vector<8x48xf32>
    %197 = vector.extract_strided_slice %42 {offsets = [0, 1], sizes = [8, 47], strides = [1, 1]} : vector<8x48xf32> to vector<8x47xf32>
    %cst_57 = arith.constant 0.000000e+00 : f32
    %198 = vector.broadcast %cst_57 : f32 to vector<8x1xf32>
    %199 = tpu.concatenate %197, %198 in 1 : vector<8x47xf32>, vector<8x1xf32> -> vector<8x48xf32>
    %200 = arith.addf %196, %199 : vector<8x48xf32>
    %cst_58 = arith.constant 0.000000e+00 : f32
    %201 = vector.broadcast %cst_58 : f32 to vector<8x1xf32>
    %202 = vector.extract_strided_slice %14 {offsets = [0, 0], sizes = [8, 47], strides = [1, 1]} : vector<8x48xf32> to vector<8x47xf32>
    %203 = tpu.concatenate %201, %202 in 1 : vector<8x1xf32>, vector<8x47xf32> -> vector<8x48xf32>
    %204 = arith.addf %203, %14 : vector<8x48xf32>
    %205 = vector.extract_strided_slice %14 {offsets = [0, 1], sizes = [8, 47], strides = [1, 1]} : vector<8x48xf32> to vector<8x47xf32>
    %cst_59 = arith.constant 0.000000e+00 : f32
    %206 = vector.broadcast %cst_59 : f32 to vector<8x1xf32>
    %207 = tpu.concatenate %205, %206 in 1 : vector<8x47xf32>, vector<8x1xf32> -> vector<8x48xf32>
    %208 = arith.addf %204, %207 : vector<8x48xf32>
    %cst_60 = arith.constant 1.000000e+00 : f32
    %209 = vector.broadcast %cst_60 : f32 to vector<8x48xf32>
    %210 = arith.maximumf %208, %209 : vector<8x48xf32>
    %cst_61 = arith.constant 1.000000e+00 : f32
    %211 = vector.broadcast %cst_61 : f32 to vector<8x48xf32>
    %212 = arith.divf %211, %210 : vector<8x48xf32>
    %213 = arith.mulf %200, %212 : vector<8x48xf32>
    %214 = arith.mulf %213, %14 : vector<8x48xf32>
    %cst_62 = arith.constant dense<0.000000e+00> : vector<8xf32>
    %215 = vector.multi_reduction <add>, %214, %cst_62 [1] : vector<8x48xf32> to vector<8xf32>
    %216 = vector.shape_cast %215 : vector<8xf32> to vector<8x1xf32>
    %217 = arith.mulf %214, %214 : vector<8x48xf32>
    %cst_63 = arith.constant dense<0.000000e+00> : vector<8xf32>
    %218 = vector.multi_reduction <add>, %217, %cst_63 [1] : vector<8x48xf32> to vector<8xf32>
    %219 = vector.shape_cast %218 : vector<8xf32> to vector<8x1xf32>
    %cst_64 = arith.constant 3.125000e-02 : f32
    %220 = vector.broadcast %cst_64 : f32 to vector<8x1xf32>
    %221 = arith.mulf %216, %220 : vector<8x1xf32>
    %cst_65 = arith.constant 3.125000e-02 : f32
    %222 = vector.broadcast %cst_65 : f32 to vector<8x1xf32>
    %223 = arith.mulf %219, %222 : vector<8x1xf32>
    %224 = arith.mulf %221, %221 : vector<8x1xf32>
    %225 = arith.subf %223, %224 : vector<8x1xf32>
    %cst_66 = arith.constant 9.99999974E-6 : f32
    %226 = vector.broadcast %cst_66 : f32 to vector<8x1xf32>
    %227 = arith.addf %225, %226 : vector<8x1xf32>
    %228 = math.rsqrt %227 : vector<8x1xf32>
    %229 = vector.broadcast %221 : vector<8x1xf32> to vector<8x48xf32>
    %230 = arith.subf %214, %229 : vector<8x48xf32>
    %231 = vector.broadcast %228 : vector<8x1xf32> to vector<8x48xf32>
    %232 = arith.mulf %230, %231 : vector<8x48xf32>
    %cst_67 = arith.constant 0.000000e+00 : f32
    %233 = vector.broadcast %cst_67 : f32 to vector<8x48xf32>
    %234 = arith.select %11, %232, %233 : vector<8x48xi1>, vector<8x48xf32>
    %235 = arith.addf %192, %234 : vector<8x48xf32>
    %236 = arith.addf %235, %68 : vector<8x48xf32>
    %cst_68 = arith.constant 0.000000e+00 : f32
    %237 = vector.broadcast %cst_68 : f32 to vector<8x48xf32>
    %238 = arith.maximumf %68, %237 : vector<8x48xf32>
    %239 = vector.extract_strided_slice %16 {offsets = [0, 6], sizes = [8, 5], strides = [1, 1]} : vector<8x51xf32> to vector<8x5xf32>
    %cst_69 = arith.constant 0.000000e+00 : f32
    %240 = vector.broadcast %cst_69 : f32 to vector<8x4xf32>
    %241 = vector.extract_strided_slice %238 {offsets = [0, 0], sizes = [8, 44], strides = [1, 1]} : vector<8x48xf32> to vector<8x44xf32>
    %242 = tpu.concatenate %240, %241 in 1 : vector<8x4xf32>, vector<8x44xf32> -> vector<8x48xf32>
    %243 = vector.extract_strided_slice %239 {offsets = [0, 0], sizes = [8, 1], strides = [1, 1]} : vector<8x5xf32> to vector<8x1xf32>
    %244 = vector.broadcast %243 : vector<8x1xf32> to vector<8x48xf32>
    %245 = arith.mulf %242, %244 : vector<8x48xf32>
    %cst_70 = arith.constant 0.000000e+00 : f32
    %246 = vector.broadcast %cst_70 : f32 to vector<8x2xf32>
    %247 = vector.extract_strided_slice %238 {offsets = [0, 0], sizes = [8, 46], strides = [1, 1]} : vector<8x48xf32> to vector<8x46xf32>
    %248 = tpu.concatenate %246, %247 in 1 : vector<8x2xf32>, vector<8x46xf32> -> vector<8x48xf32>
    %249 = vector.extract_strided_slice %239 {offsets = [0, 1], sizes = [8, 1], strides = [1, 1]} : vector<8x5xf32> to vector<8x1xf32>
    %250 = vector.broadcast %249 : vector<8x1xf32> to vector<8x48xf32>
    %251 = arith.mulf %248, %250 : vector<8x48xf32>
    %252 = arith.addf %245, %251 : vector<8x48xf32>
    %253 = vector.extract_strided_slice %239 {offsets = [0, 2], sizes = [8, 1], strides = [1, 1]} : vector<8x5xf32> to vector<8x1xf32>
    %254 = vector.broadcast %253 : vector<8x1xf32> to vector<8x48xf32>
    %255 = arith.mulf %238, %254 : vector<8x48xf32>
    %256 = arith.addf %252, %255 : vector<8x48xf32>
    %257 = vector.extract_strided_slice %238 {offsets = [0, 2], sizes = [8, 46], strides = [1, 1]} : vector<8x48xf32> to vector<8x46xf32>
    %cst_71 = arith.constant 0.000000e+00 : f32
    %258 = vector.broadcast %cst_71 : f32 to vector<8x2xf32>
    %259 = tpu.concatenate %257, %258 in 1 : vector<8x46xf32>, vector<8x2xf32> -> vector<8x48xf32>
    %260 = vector.extract_strided_slice %239 {offsets = [0, 3], sizes = [8, 1], strides = [1, 1]} : vector<8x5xf32> to vector<8x1xf32>
    %261 = vector.broadcast %260 : vector<8x1xf32> to vector<8x48xf32>
    %262 = arith.mulf %259, %261 : vector<8x48xf32>
    %263 = arith.addf %256, %262 : vector<8x48xf32>
    %264 = vector.extract_strided_slice %238 {offsets = [0, 4], sizes = [8, 44], strides = [1, 1]} : vector<8x48xf32> to vector<8x44xf32>
    %cst_72 = arith.constant 0.000000e+00 : f32
    %265 = vector.broadcast %cst_72 : f32 to vector<8x4xf32>
    %266 = tpu.concatenate %264, %265 in 1 : vector<8x44xf32>, vector<8x4xf32> -> vector<8x48xf32>
    %267 = vector.extract_strided_slice %239 {offsets = [0, 4], sizes = [8, 1], strides = [1, 1]} : vector<8x5xf32> to vector<8x1xf32>
    %268 = vector.broadcast %267 : vector<8x1xf32> to vector<8x48xf32>
    %269 = arith.mulf %266, %268 : vector<8x48xf32>
    %270 = arith.addf %263, %269 : vector<8x48xf32>
    %271 = arith.mulf %270, %14 : vector<8x48xf32>
    %272 = vector.extract_strided_slice %15 {offsets = [32, 0], sizes = [8, 8], strides = [1, 1]} : vector<120x8xbf16> to vector<8x8xbf16>
    %273 = arith.truncf %271 : vector<8x48xf32> to vector<8x48xbf16>
    %cst_73 = arith.constant dense<0.000000e+00> : vector<8x48xf32>
    %274 = tpu.matmul %272, %273, %cst_73 {dimension_numbers = #tpu.dot_dimension_numbers<[1], [0], [0], [1], [0, 0, 1, 1], [], []>} : vector<8x8xbf16>, vector<8x48xbf16>, vector<8x48xf32> -> vector<8x48xf32>
    %cst_74 = arith.constant dense<0.000000e+00> : vector<8xf32>
    %275 = vector.multi_reduction <add>, %274, %cst_74 [1] : vector<8x48xf32> to vector<8xf32>
    %276 = vector.shape_cast %275 : vector<8xf32> to vector<8x1xf32>
    %277 = arith.mulf %274, %274 : vector<8x48xf32>
    %cst_75 = arith.constant dense<0.000000e+00> : vector<8xf32>
    %278 = vector.multi_reduction <add>, %277, %cst_75 [1] : vector<8x48xf32> to vector<8xf32>
    %279 = vector.shape_cast %278 : vector<8xf32> to vector<8x1xf32>
    %cst_76 = arith.constant 3.125000e-02 : f32
    %280 = vector.broadcast %cst_76 : f32 to vector<8x1xf32>
    %281 = arith.mulf %276, %280 : vector<8x1xf32>
    %cst_77 = arith.constant 3.125000e-02 : f32
    %282 = vector.broadcast %cst_77 : f32 to vector<8x1xf32>
    %283 = arith.mulf %279, %282 : vector<8x1xf32>
    %284 = arith.mulf %281, %281 : vector<8x1xf32>
    %285 = arith.subf %283, %284 : vector<8x1xf32>
    %cst_78 = arith.constant 9.99999974E-6 : f32
    %286 = vector.broadcast %cst_78 : f32 to vector<8x1xf32>
    %287 = arith.addf %285, %286 : vector<8x1xf32>
    %288 = math.rsqrt %287 : vector<8x1xf32>
    %289 = vector.broadcast %281 : vector<8x1xf32> to vector<8x48xf32>
    %290 = arith.subf %274, %289 : vector<8x48xf32>
    %291 = vector.broadcast %288 : vector<8x1xf32> to vector<8x48xf32>
    %292 = arith.mulf %290, %291 : vector<8x48xf32>
    %cst_79 = arith.constant 0.000000e+00 : f32
    %293 = vector.broadcast %cst_79 : f32 to vector<8x48xf32>
    %294 = arith.select %11, %292, %293 : vector<8x48xi1>, vector<8x48xf32>
    %295 = arith.addf %236, %294 : vector<8x48xf32>
    %cst_80 = arith.constant 0.000000e+00 : f32
    %296 = vector.broadcast %cst_80 : f32 to vector<8x48xf32>
    %297 = arith.maximumf %191, %296 : vector<8x48xf32>
    %298 = vector.extract_strided_slice %16 {offsets = [0, 11], sizes = [8, 3], strides = [1, 1]} : vector<8x51xf32> to vector<8x3xf32>
    %cst_81 = arith.constant 0.000000e+00 : f32
    %299 = vector.broadcast %cst_81 : f32 to vector<8x1xf32>
    %300 = vector.extract_strided_slice %297 {offsets = [0, 0], sizes = [8, 47], strides = [1, 1]} : vector<8x48xf32> to vector<8x47xf32>
    %301 = tpu.concatenate %299, %300 in 1 : vector<8x1xf32>, vector<8x47xf32> -> vector<8x48xf32>
    %302 = vector.extract_strided_slice %298 {offsets = [0, 0], sizes = [8, 1], strides = [1, 1]} : vector<8x3xf32> to vector<8x1xf32>
    %303 = vector.broadcast %302 : vector<8x1xf32> to vector<8x48xf32>
    %304 = arith.mulf %301, %303 : vector<8x48xf32>
    %305 = vector.extract_strided_slice %298 {offsets = [0, 1], sizes = [8, 1], strides = [1, 1]} : vector<8x3xf32> to vector<8x1xf32>
    %306 = vector.broadcast %305 : vector<8x1xf32> to vector<8x48xf32>
    %307 = arith.mulf %297, %306 : vector<8x48xf32>
    %308 = arith.addf %304, %307 : vector<8x48xf32>
    %309 = vector.extract_strided_slice %297 {offsets = [0, 1], sizes = [8, 47], strides = [1, 1]} : vector<8x48xf32> to vector<8x47xf32>
    %cst_82 = arith.constant 0.000000e+00 : f32
    %310 = vector.broadcast %cst_82 : f32 to vector<8x1xf32>
    %311 = tpu.concatenate %309, %310 in 1 : vector<8x47xf32>, vector<8x1xf32> -> vector<8x48xf32>
    %312 = vector.extract_strided_slice %298 {offsets = [0, 2], sizes = [8, 1], strides = [1, 1]} : vector<8x3xf32> to vector<8x1xf32>
    %313 = vector.broadcast %312 : vector<8x1xf32> to vector<8x48xf32>
    %314 = arith.mulf %311, %313 : vector<8x48xf32>
    %315 = arith.addf %308, %314 : vector<8x48xf32>
    %316 = arith.mulf %315, %14 : vector<8x48xf32>
    %317 = vector.extract_strided_slice %15 {offsets = [40, 0], sizes = [8, 8], strides = [1, 1]} : vector<120x8xbf16> to vector<8x8xbf16>
    %318 = arith.truncf %316 : vector<8x48xf32> to vector<8x48xbf16>
    %cst_83 = arith.constant dense<0.000000e+00> : vector<8x48xf32>
    %319 = tpu.matmul %317, %318, %cst_83 {dimension_numbers = #tpu.dot_dimension_numbers<[1], [0], [0], [1], [0, 0, 1, 1], [], []>} : vector<8x8xbf16>, vector<8x48xbf16>, vector<8x48xf32> -> vector<8x48xf32>
    %cst_84 = arith.constant dense<0.000000e+00> : vector<8xf32>
    %320 = vector.multi_reduction <add>, %319, %cst_84 [1] : vector<8x48xf32> to vector<8xf32>
    %321 = vector.shape_cast %320 : vector<8xf32> to vector<8x1xf32>
    %322 = arith.mulf %319, %319 : vector<8x48xf32>
    %cst_85 = arith.constant dense<0.000000e+00> : vector<8xf32>
    %323 = vector.multi_reduction <add>, %322, %cst_85 [1] : vector<8x48xf32> to vector<8xf32>
    %324 = vector.shape_cast %323 : vector<8xf32> to vector<8x1xf32>
    %cst_86 = arith.constant 3.125000e-02 : f32
    %325 = vector.broadcast %cst_86 : f32 to vector<8x1xf32>
    %326 = arith.mulf %321, %325 : vector<8x1xf32>
    %cst_87 = arith.constant 3.125000e-02 : f32
    %327 = vector.broadcast %cst_87 : f32 to vector<8x1xf32>
    %328 = arith.mulf %324, %327 : vector<8x1xf32>
    %329 = arith.mulf %326, %326 : vector<8x1xf32>
    %330 = arith.subf %328, %329 : vector<8x1xf32>
    %cst_88 = arith.constant 9.99999974E-6 : f32
    %331 = vector.broadcast %cst_88 : f32 to vector<8x1xf32>
    %332 = arith.addf %330, %331 : vector<8x1xf32>
    %333 = math.rsqrt %332 : vector<8x1xf32>
    %334 = vector.broadcast %326 : vector<8x1xf32> to vector<8x48xf32>
    %335 = arith.subf %319, %334 : vector<8x48xf32>
    %336 = vector.broadcast %333 : vector<8x1xf32> to vector<8x48xf32>
    %337 = arith.mulf %335, %336 : vector<8x48xf32>
    %cst_89 = arith.constant 0.000000e+00 : f32
    %338 = vector.broadcast %cst_89 : f32 to vector<8x48xf32>
    %339 = arith.select %11, %337, %338 : vector<8x48xi1>, vector<8x48xf32>
    %cst_90 = arith.constant 0.000000e+00 : f32
    %340 = vector.broadcast %cst_90 : f32 to vector<8x48xf32>
    %341 = arith.maximumf %339, %340 : vector<8x48xf32>
    %342 = vector.extract_strided_slice %16 {offsets = [0, 14], sizes = [8, 3], strides = [1, 1]} : vector<8x51xf32> to vector<8x3xf32>
    %cst_91 = arith.constant 0.000000e+00 : f32
    %343 = vector.broadcast %cst_91 : f32 to vector<8x1xf32>
    %344 = vector.extract_strided_slice %341 {offsets = [0, 0], sizes = [8, 47], strides = [1, 1]} : vector<8x48xf32> to vector<8x47xf32>
    %345 = tpu.concatenate %343, %344 in 1 : vector<8x1xf32>, vector<8x47xf32> -> vector<8x48xf32>
    %346 = vector.extract_strided_slice %342 {offsets = [0, 0], sizes = [8, 1], strides = [1, 1]} : vector<8x3xf32> to vector<8x1xf32>
    %347 = vector.broadcast %346 : vector<8x1xf32> to vector<8x48xf32>
    %348 = arith.mulf %345, %347 : vector<8x48xf32>
    %349 = vector.extract_strided_slice %342 {offsets = [0, 1], sizes = [8, 1], strides = [1, 1]} : vector<8x3xf32> to vector<8x1xf32>
    %350 = vector.broadcast %349 : vector<8x1xf32> to vector<8x48xf32>
    %351 = arith.mulf %341, %350 : vector<8x48xf32>
    %352 = arith.addf %348, %351 : vector<8x48xf32>
    %353 = vector.extract_strided_slice %341 {offsets = [0, 1], sizes = [8, 47], strides = [1, 1]} : vector<8x48xf32> to vector<8x47xf32>
    %cst_92 = arith.constant 0.000000e+00 : f32
    %354 = vector.broadcast %cst_92 : f32 to vector<8x1xf32>
    %355 = tpu.concatenate %353, %354 in 1 : vector<8x47xf32>, vector<8x1xf32> -> vector<8x48xf32>
    %356 = vector.extract_strided_slice %342 {offsets = [0, 2], sizes = [8, 1], strides = [1, 1]} : vector<8x3xf32> to vector<8x1xf32>
    %357 = vector.broadcast %356 : vector<8x1xf32> to vector<8x48xf32>
    %358 = arith.mulf %355, %357 : vector<8x48xf32>
    %359 = arith.addf %352, %358 : vector<8x48xf32>
    %360 = arith.mulf %359, %14 : vector<8x48xf32>
    %361 = vector.extract_strided_slice %15 {offsets = [48, 0], sizes = [8, 8], strides = [1, 1]} : vector<120x8xbf16> to vector<8x8xbf16>
    %362 = arith.truncf %360 : vector<8x48xf32> to vector<8x48xbf16>
    %cst_93 = arith.constant dense<0.000000e+00> : vector<8x48xf32>
    %363 = tpu.matmul %361, %362, %cst_93 {dimension_numbers = #tpu.dot_dimension_numbers<[1], [0], [0], [1], [0, 0, 1, 1], [], []>} : vector<8x8xbf16>, vector<8x48xbf16>, vector<8x48xf32> -> vector<8x48xf32>
    %cst_94 = arith.constant dense<0.000000e+00> : vector<8xf32>
    %364 = vector.multi_reduction <add>, %363, %cst_94 [1] : vector<8x48xf32> to vector<8xf32>
    %365 = vector.shape_cast %364 : vector<8xf32> to vector<8x1xf32>
    %366 = arith.mulf %363, %363 : vector<8x48xf32>
    %cst_95 = arith.constant dense<0.000000e+00> : vector<8xf32>
    %367 = vector.multi_reduction <add>, %366, %cst_95 [1] : vector<8x48xf32> to vector<8xf32>
    %368 = vector.shape_cast %367 : vector<8xf32> to vector<8x1xf32>
    %cst_96 = arith.constant 3.125000e-02 : f32
    %369 = vector.broadcast %cst_96 : f32 to vector<8x1xf32>
    %370 = arith.mulf %365, %369 : vector<8x1xf32>
    %cst_97 = arith.constant 3.125000e-02 : f32
    %371 = vector.broadcast %cst_97 : f32 to vector<8x1xf32>
    %372 = arith.mulf %368, %371 : vector<8x1xf32>
    %373 = arith.mulf %370, %370 : vector<8x1xf32>
    %374 = arith.subf %372, %373 : vector<8x1xf32>
    %cst_98 = arith.constant 9.99999974E-6 : f32
    %375 = vector.broadcast %cst_98 : f32 to vector<8x1xf32>
    %376 = arith.addf %374, %375 : vector<8x1xf32>
    %377 = math.rsqrt %376 : vector<8x1xf32>
    %378 = vector.broadcast %370 : vector<8x1xf32> to vector<8x48xf32>
    %379 = arith.subf %363, %378 : vector<8x48xf32>
    %380 = vector.broadcast %377 : vector<8x1xf32> to vector<8x48xf32>
    %381 = arith.mulf %379, %380 : vector<8x48xf32>
    %cst_99 = arith.constant 0.000000e+00 : f32
    %382 = vector.broadcast %cst_99 : f32 to vector<8x48xf32>
    %383 = arith.select %11, %381, %382 : vector<8x48xi1>, vector<8x48xf32>
    %384 = arith.addf %295, %383 : vector<8x48xf32>
    %cst_100 = arith.constant 0.000000e+00 : f32
    %385 = vector.broadcast %cst_100 : f32 to vector<8x48xf32>
    %386 = vector.extract_strided_slice %16 {offsets = [0, 17], sizes = [8, 5], strides = [1, 1]} : vector<8x51xf32> to vector<8x5xf32>
    %cst_101 = arith.constant 0.000000e+00 : f32
    %387 = vector.broadcast %cst_101 : f32 to vector<8x2xf32>
    %388 = vector.extract_strided_slice %71 {offsets = [0, 0], sizes = [8, 46], strides = [1, 1]} : vector<8x48xf32> to vector<8x46xf32>
    %389 = tpu.concatenate %387, %388 in 1 : vector<8x2xf32>, vector<8x46xf32> -> vector<8x48xf32>
    %390 = vector.extract_strided_slice %386 {offsets = [0, 0], sizes = [8, 1], strides = [1, 1]} : vector<8x5xf32> to vector<8x1xf32>
    %391 = vector.broadcast %390 : vector<8x1xf32> to vector<8x48xf32>
    %392 = arith.mulf %389, %391 : vector<8x48xf32>
    %cst_102 = arith.constant 0.000000e+00 : f32
    %393 = vector.broadcast %cst_102 : f32 to vector<8x1xf32>
    %394 = vector.extract_strided_slice %71 {offsets = [0, 0], sizes = [8, 47], strides = [1, 1]} : vector<8x48xf32> to vector<8x47xf32>
    %395 = tpu.concatenate %393, %394 in 1 : vector<8x1xf32>, vector<8x47xf32> -> vector<8x48xf32>
    %396 = vector.extract_strided_slice %386 {offsets = [0, 1], sizes = [8, 1], strides = [1, 1]} : vector<8x5xf32> to vector<8x1xf32>
    %397 = vector.broadcast %396 : vector<8x1xf32> to vector<8x48xf32>
    %398 = arith.mulf %395, %397 : vector<8x48xf32>
    %399 = arith.addf %392, %398 : vector<8x48xf32>
    %400 = vector.extract_strided_slice %386 {offsets = [0, 2], sizes = [8, 1], strides = [1, 1]} : vector<8x5xf32> to vector<8x1xf32>
    %401 = vector.broadcast %400 : vector<8x1xf32> to vector<8x48xf32>
    %402 = arith.mulf %71, %401 : vector<8x48xf32>
    %403 = arith.addf %399, %402 : vector<8x48xf32>
    %404 = vector.extract_strided_slice %71 {offsets = [0, 1], sizes = [8, 47], strides = [1, 1]} : vector<8x48xf32> to vector<8x47xf32>
    %cst_103 = arith.constant 0.000000e+00 : f32
    %405 = vector.broadcast %cst_103 : f32 to vector<8x1xf32>
    %406 = tpu.concatenate %404, %405 in 1 : vector<8x47xf32>, vector<8x1xf32> -> vector<8x48xf32>
    %407 = vector.extract_strided_slice %386 {offsets = [0, 3], sizes = [8, 1], strides = [1, 1]} : vector<8x5xf32> to vector<8x1xf32>
    %408 = vector.broadcast %407 : vector<8x1xf32> to vector<8x48xf32>
    %409 = arith.mulf %406, %408 : vector<8x48xf32>
    %410 = arith.addf %403, %409 : vector<8x48xf32>
    %411 = vector.extract_strided_slice %71 {offsets = [0, 2], sizes = [8, 46], strides = [1, 1]} : vector<8x48xf32> to vector<8x46xf32>
    %cst_104 = arith.constant 0.000000e+00 : f32
    %412 = vector.broadcast %cst_104 : f32 to vector<8x2xf32>
    %413 = tpu.concatenate %411, %412 in 1 : vector<8x46xf32>, vector<8x2xf32> -> vector<8x48xf32>
    %414 = vector.extract_strided_slice %386 {offsets = [0, 4], sizes = [8, 1], strides = [1, 1]} : vector<8x5xf32> to vector<8x1xf32>
    %415 = vector.broadcast %414 : vector<8x1xf32> to vector<8x48xf32>
    %416 = arith.mulf %413, %415 : vector<8x48xf32>
    %417 = arith.addf %410, %416 : vector<8x48xf32>
    %418 = arith.mulf %417, %14 : vector<8x48xf32>
    %419 = vector.extract_strided_slice %15 {offsets = [56, 0], sizes = [8, 8], strides = [1, 1]} : vector<120x8xbf16> to vector<8x8xbf16>
    %420 = arith.truncf %418 : vector<8x48xf32> to vector<8x48xbf16>
    %cst_105 = arith.constant dense<0.000000e+00> : vector<8x48xf32>
    %421 = tpu.matmul %419, %420, %cst_105 {dimension_numbers = #tpu.dot_dimension_numbers<[1], [0], [0], [1], [0, 0, 1, 1], [], []>} : vector<8x8xbf16>, vector<8x48xbf16>, vector<8x48xf32> -> vector<8x48xf32>
    %cst_106 = arith.constant dense<0.000000e+00> : vector<8xf32>
    %422 = vector.multi_reduction <add>, %421, %cst_106 [1] : vector<8x48xf32> to vector<8xf32>
    %423 = vector.shape_cast %422 : vector<8xf32> to vector<8x1xf32>
    %424 = arith.mulf %421, %421 : vector<8x48xf32>
    %cst_107 = arith.constant dense<0.000000e+00> : vector<8xf32>
    %425 = vector.multi_reduction <add>, %424, %cst_107 [1] : vector<8x48xf32> to vector<8xf32>
    %426 = vector.shape_cast %425 : vector<8xf32> to vector<8x1xf32>
    %cst_108 = arith.constant 3.125000e-02 : f32
    %427 = vector.broadcast %cst_108 : f32 to vector<8x1xf32>
    %428 = arith.mulf %423, %427 : vector<8x1xf32>
    %cst_109 = arith.constant 3.125000e-02 : f32
    %429 = vector.broadcast %cst_109 : f32 to vector<8x1xf32>
    %430 = arith.mulf %426, %429 : vector<8x1xf32>
    %431 = arith.mulf %428, %428 : vector<8x1xf32>
    %432 = arith.subf %430, %431 : vector<8x1xf32>
    %cst_110 = arith.constant 9.99999974E-6 : f32
    %433 = vector.broadcast %cst_110 : f32 to vector<8x1xf32>
    %434 = arith.addf %432, %433 : vector<8x1xf32>
    %435 = math.rsqrt %434 : vector<8x1xf32>
    %436 = vector.broadcast %428 : vector<8x1xf32> to vector<8x48xf32>
    %437 = arith.subf %421, %436 : vector<8x48xf32>
    %438 = vector.broadcast %435 : vector<8x1xf32> to vector<8x48xf32>
    %439 = arith.mulf %437, %438 : vector<8x48xf32>
    %cst_111 = arith.constant 0.000000e+00 : f32
    %440 = vector.broadcast %cst_111 : f32 to vector<8x48xf32>
    %441 = arith.select %11, %439, %440 : vector<8x48xi1>, vector<8x48xf32>
    %cst_112 = arith.constant 0.000000e+00 : f32
    %442 = vector.broadcast %cst_112 : f32 to vector<8x48xf32>
    %443 = arith.maximumf %441, %442 : vector<8x48xf32>
    %444 = vector.extract_strided_slice %16 {offsets = [0, 22], sizes = [8, 5], strides = [1, 1]} : vector<8x51xf32> to vector<8x5xf32>
    %cst_113 = arith.constant 0.000000e+00 : f32
    %445 = vector.broadcast %cst_113 : f32 to vector<8x2xf32>
    %446 = vector.extract_strided_slice %443 {offsets = [0, 0], sizes = [8, 46], strides = [1, 1]} : vector<8x48xf32> to vector<8x46xf32>
    %447 = tpu.concatenate %445, %446 in 1 : vector<8x2xf32>, vector<8x46xf32> -> vector<8x48xf32>
    %448 = vector.extract_strided_slice %444 {offsets = [0, 0], sizes = [8, 1], strides = [1, 1]} : vector<8x5xf32> to vector<8x1xf32>
    %449 = vector.broadcast %448 : vector<8x1xf32> to vector<8x48xf32>
    %450 = arith.mulf %447, %449 : vector<8x48xf32>
    %cst_114 = arith.constant 0.000000e+00 : f32
    %451 = vector.broadcast %cst_114 : f32 to vector<8x1xf32>
    %452 = vector.extract_strided_slice %443 {offsets = [0, 0], sizes = [8, 47], strides = [1, 1]} : vector<8x48xf32> to vector<8x47xf32>
    %453 = tpu.concatenate %451, %452 in 1 : vector<8x1xf32>, vector<8x47xf32> -> vector<8x48xf32>
    %454 = vector.extract_strided_slice %444 {offsets = [0, 1], sizes = [8, 1], strides = [1, 1]} : vector<8x5xf32> to vector<8x1xf32>
    %455 = vector.broadcast %454 : vector<8x1xf32> to vector<8x48xf32>
    %456 = arith.mulf %453, %455 : vector<8x48xf32>
    %457 = arith.addf %450, %456 : vector<8x48xf32>
    %458 = vector.extract_strided_slice %444 {offsets = [0, 2], sizes = [8, 1], strides = [1, 1]} : vector<8x5xf32> to vector<8x1xf32>
    %459 = vector.broadcast %458 : vector<8x1xf32> to vector<8x48xf32>
    %460 = arith.mulf %443, %459 : vector<8x48xf32>
    %461 = arith.addf %457, %460 : vector<8x48xf32>
    %462 = vector.extract_strided_slice %443 {offsets = [0, 1], sizes = [8, 47], strides = [1, 1]} : vector<8x48xf32> to vector<8x47xf32>
    %cst_115 = arith.constant 0.000000e+00 : f32
    %463 = vector.broadcast %cst_115 : f32 to vector<8x1xf32>
    %464 = tpu.concatenate %462, %463 in 1 : vector<8x47xf32>, vector<8x1xf32> -> vector<8x48xf32>
    %465 = vector.extract_strided_slice %444 {offsets = [0, 3], sizes = [8, 1], strides = [1, 1]} : vector<8x5xf32> to vector<8x1xf32>
    %466 = vector.broadcast %465 : vector<8x1xf32> to vector<8x48xf32>
    %467 = arith.mulf %464, %466 : vector<8x48xf32>
    %468 = arith.addf %461, %467 : vector<8x48xf32>
    %469 = vector.extract_strided_slice %443 {offsets = [0, 2], sizes = [8, 46], strides = [1, 1]} : vector<8x48xf32> to vector<8x46xf32>
    %cst_116 = arith.constant 0.000000e+00 : f32
    %470 = vector.broadcast %cst_116 : f32 to vector<8x2xf32>
    %471 = tpu.concatenate %469, %470 in 1 : vector<8x46xf32>, vector<8x2xf32> -> vector<8x48xf32>
    %472 = vector.extract_strided_slice %444 {offsets = [0, 4], sizes = [8, 1], strides = [1, 1]} : vector<8x5xf32> to vector<8x1xf32>
    %473 = vector.broadcast %472 : vector<8x1xf32> to vector<8x48xf32>
    %474 = arith.mulf %471, %473 : vector<8x48xf32>
    %475 = arith.addf %468, %474 : vector<8x48xf32>
    %476 = arith.mulf %475, %14 : vector<8x48xf32>
    %477 = vector.extract_strided_slice %15 {offsets = [64, 0], sizes = [8, 8], strides = [1, 1]} : vector<120x8xbf16> to vector<8x8xbf16>
    %478 = arith.truncf %476 : vector<8x48xf32> to vector<8x48xbf16>
    %cst_117 = arith.constant dense<0.000000e+00> : vector<8x48xf32>
    %479 = tpu.matmul %477, %478, %cst_117 {dimension_numbers = #tpu.dot_dimension_numbers<[1], [0], [0], [1], [0, 0, 1, 1], [], []>} : vector<8x8xbf16>, vector<8x48xbf16>, vector<8x48xf32> -> vector<8x48xf32>
    %cst_118 = arith.constant dense<0.000000e+00> : vector<8xf32>
    %480 = vector.multi_reduction <add>, %479, %cst_118 [1] : vector<8x48xf32> to vector<8xf32>
    %481 = vector.shape_cast %480 : vector<8xf32> to vector<8x1xf32>
    %482 = arith.mulf %479, %479 : vector<8x48xf32>
    %cst_119 = arith.constant dense<0.000000e+00> : vector<8xf32>
    %483 = vector.multi_reduction <add>, %482, %cst_119 [1] : vector<8x48xf32> to vector<8xf32>
    %484 = vector.shape_cast %483 : vector<8xf32> to vector<8x1xf32>
    %cst_120 = arith.constant 3.125000e-02 : f32
    %485 = vector.broadcast %cst_120 : f32 to vector<8x1xf32>
    %486 = arith.mulf %481, %485 : vector<8x1xf32>
    %cst_121 = arith.constant 3.125000e-02 : f32
    %487 = vector.broadcast %cst_121 : f32 to vector<8x1xf32>
    %488 = arith.mulf %484, %487 : vector<8x1xf32>
    %489 = arith.mulf %486, %486 : vector<8x1xf32>
    %490 = arith.subf %488, %489 : vector<8x1xf32>
    %cst_122 = arith.constant 9.99999974E-6 : f32
    %491 = vector.broadcast %cst_122 : f32 to vector<8x1xf32>
    %492 = arith.addf %490, %491 : vector<8x1xf32>
    %493 = math.rsqrt %492 : vector<8x1xf32>
    %494 = vector.broadcast %486 : vector<8x1xf32> to vector<8x48xf32>
    %495 = arith.subf %479, %494 : vector<8x48xf32>
    %496 = vector.broadcast %493 : vector<8x1xf32> to vector<8x48xf32>
    %497 = arith.mulf %495, %496 : vector<8x48xf32>
    %cst_123 = arith.constant 0.000000e+00 : f32
    %498 = vector.broadcast %cst_123 : f32 to vector<8x48xf32>
    %499 = arith.select %11, %497, %498 : vector<8x48xi1>, vector<8x48xf32>
    %500 = arith.addf %385, %499 : vector<8x48xf32>
    %cst_124 = arith.constant 0.000000e+00 : f32
    %501 = vector.broadcast %cst_124 : f32 to vector<8x1xf32>
    %502 = vector.extract_strided_slice %68 {offsets = [0, 0], sizes = [8, 47], strides = [1, 1]} : vector<8x48xf32> to vector<8x47xf32>
    %503 = tpu.concatenate %501, %502 in 1 : vector<8x1xf32>, vector<8x47xf32> -> vector<8x48xf32>
    %504 = arith.addf %503, %68 : vector<8x48xf32>
    %505 = vector.extract_strided_slice %68 {offsets = [0, 1], sizes = [8, 47], strides = [1, 1]} : vector<8x48xf32> to vector<8x47xf32>
    %cst_125 = arith.constant 0.000000e+00 : f32
    %506 = vector.broadcast %cst_125 : f32 to vector<8x1xf32>
    %507 = tpu.concatenate %505, %506 in 1 : vector<8x47xf32>, vector<8x1xf32> -> vector<8x48xf32>
    %508 = arith.addf %504, %507 : vector<8x48xf32>
    %509 = arith.mulf %508, %212 : vector<8x48xf32>
    %510 = arith.mulf %509, %14 : vector<8x48xf32>
    %cst_126 = arith.constant dense<0.000000e+00> : vector<8xf32>
    %511 = vector.multi_reduction <add>, %510, %cst_126 [1] : vector<8x48xf32> to vector<8xf32>
    %512 = vector.shape_cast %511 : vector<8xf32> to vector<8x1xf32>
    %513 = arith.mulf %510, %510 : vector<8x48xf32>
    %cst_127 = arith.constant dense<0.000000e+00> : vector<8xf32>
    %514 = vector.multi_reduction <add>, %513, %cst_127 [1] : vector<8x48xf32> to vector<8xf32>
    %515 = vector.shape_cast %514 : vector<8xf32> to vector<8x1xf32>
    %cst_128 = arith.constant 3.125000e-02 : f32
    %516 = vector.broadcast %cst_128 : f32 to vector<8x1xf32>
    %517 = arith.mulf %512, %516 : vector<8x1xf32>
    %cst_129 = arith.constant 3.125000e-02 : f32
    %518 = vector.broadcast %cst_129 : f32 to vector<8x1xf32>
    %519 = arith.mulf %515, %518 : vector<8x1xf32>
    %520 = arith.mulf %517, %517 : vector<8x1xf32>
    %521 = arith.subf %519, %520 : vector<8x1xf32>
    %cst_130 = arith.constant 9.99999974E-6 : f32
    %522 = vector.broadcast %cst_130 : f32 to vector<8x1xf32>
    %523 = arith.addf %521, %522 : vector<8x1xf32>
    %524 = math.rsqrt %523 : vector<8x1xf32>
    %525 = vector.broadcast %517 : vector<8x1xf32> to vector<8x48xf32>
    %526 = arith.subf %510, %525 : vector<8x48xf32>
    %527 = vector.broadcast %524 : vector<8x1xf32> to vector<8x48xf32>
    %528 = arith.mulf %526, %527 : vector<8x48xf32>
    %cst_131 = arith.constant 0.000000e+00 : f32
    %529 = vector.broadcast %cst_131 : f32 to vector<8x48xf32>
    %530 = arith.select %11, %528, %529 : vector<8x48xi1>, vector<8x48xf32>
    %531 = arith.addf %500, %530 : vector<8x48xf32>
    %532 = vector.extract_strided_slice %16 {offsets = [0, 27], sizes = [8, 3], strides = [1, 1]} : vector<8x51xf32> to vector<8x3xf32>
    %cst_132 = arith.constant 0.000000e+00 : f32
    %533 = vector.broadcast %cst_132 : f32 to vector<8x2xf32>
    %534 = vector.extract_strided_slice %238 {offsets = [0, 0], sizes = [8, 46], strides = [1, 1]} : vector<8x48xf32> to vector<8x46xf32>
    %535 = tpu.concatenate %533, %534 in 1 : vector<8x2xf32>, vector<8x46xf32> -> vector<8x48xf32>
    %536 = vector.extract_strided_slice %532 {offsets = [0, 0], sizes = [8, 1], strides = [1, 1]} : vector<8x3xf32> to vector<8x1xf32>
    %537 = vector.broadcast %536 : vector<8x1xf32> to vector<8x48xf32>
    %538 = arith.mulf %535, %537 : vector<8x48xf32>
    %539 = vector.extract_strided_slice %532 {offsets = [0, 1], sizes = [8, 1], strides = [1, 1]} : vector<8x3xf32> to vector<8x1xf32>
    %540 = vector.broadcast %539 : vector<8x1xf32> to vector<8x48xf32>
    %541 = arith.mulf %238, %540 : vector<8x48xf32>
    %542 = arith.addf %538, %541 : vector<8x48xf32>
    %543 = vector.extract_strided_slice %238 {offsets = [0, 2], sizes = [8, 46], strides = [1, 1]} : vector<8x48xf32> to vector<8x46xf32>
    %cst_133 = arith.constant 0.000000e+00 : f32
    %544 = vector.broadcast %cst_133 : f32 to vector<8x2xf32>
    %545 = tpu.concatenate %543, %544 in 1 : vector<8x46xf32>, vector<8x2xf32> -> vector<8x48xf32>
    %546 = vector.extract_strided_slice %532 {offsets = [0, 2], sizes = [8, 1], strides = [1, 1]} : vector<8x3xf32> to vector<8x1xf32>
    %547 = vector.broadcast %546 : vector<8x1xf32> to vector<8x48xf32>
    %548 = arith.mulf %545, %547 : vector<8x48xf32>
    %549 = arith.addf %542, %548 : vector<8x48xf32>
    %550 = arith.mulf %549, %14 : vector<8x48xf32>
    %551 = vector.extract_strided_slice %15 {offsets = [72, 0], sizes = [8, 8], strides = [1, 1]} : vector<120x8xbf16> to vector<8x8xbf16>
    %552 = arith.truncf %550 : vector<8x48xf32> to vector<8x48xbf16>
    %cst_134 = arith.constant dense<0.000000e+00> : vector<8x48xf32>
    %553 = tpu.matmul %551, %552, %cst_134 {dimension_numbers = #tpu.dot_dimension_numbers<[1], [0], [0], [1], [0, 0, 1, 1], [], []>} : vector<8x8xbf16>, vector<8x48xbf16>, vector<8x48xf32> -> vector<8x48xf32>
    %cst_135 = arith.constant dense<0.000000e+00> : vector<8xf32>
    %554 = vector.multi_reduction <add>, %553, %cst_135 [1] : vector<8x48xf32> to vector<8xf32>
    %555 = vector.shape_cast %554 : vector<8xf32> to vector<8x1xf32>
    %556 = arith.mulf %553, %553 : vector<8x48xf32>
    %cst_136 = arith.constant dense<0.000000e+00> : vector<8xf32>
    %557 = vector.multi_reduction <add>, %556, %cst_136 [1] : vector<8x48xf32> to vector<8xf32>
    %558 = vector.shape_cast %557 : vector<8xf32> to vector<8x1xf32>
    %cst_137 = arith.constant 3.125000e-02 : f32
    %559 = vector.broadcast %cst_137 : f32 to vector<8x1xf32>
    %560 = arith.mulf %555, %559 : vector<8x1xf32>
    %cst_138 = arith.constant 3.125000e-02 : f32
    %561 = vector.broadcast %cst_138 : f32 to vector<8x1xf32>
    %562 = arith.mulf %558, %561 : vector<8x1xf32>
    %563 = arith.mulf %560, %560 : vector<8x1xf32>
    %564 = arith.subf %562, %563 : vector<8x1xf32>
    %cst_139 = arith.constant 9.99999974E-6 : f32
    %565 = vector.broadcast %cst_139 : f32 to vector<8x1xf32>
    %566 = arith.addf %564, %565 : vector<8x1xf32>
    %567 = math.rsqrt %566 : vector<8x1xf32>
    %568 = vector.broadcast %560 : vector<8x1xf32> to vector<8x48xf32>
    %569 = arith.subf %553, %568 : vector<8x48xf32>
    %570 = vector.broadcast %567 : vector<8x1xf32> to vector<8x48xf32>
    %571 = arith.mulf %569, %570 : vector<8x48xf32>
    %cst_140 = arith.constant 0.000000e+00 : f32
    %572 = vector.broadcast %cst_140 : f32 to vector<8x48xf32>
    %573 = arith.select %11, %571, %572 : vector<8x48xi1>, vector<8x48xf32>
    %574 = arith.addf %531, %573 : vector<8x48xf32>
    %575 = vector.extract_strided_slice %16 {offsets = [0, 30], sizes = [8, 5], strides = [1, 1]} : vector<8x51xf32> to vector<8x5xf32>
    %cst_141 = arith.constant 0.000000e+00 : f32
    %576 = vector.broadcast %cst_141 : f32 to vector<8x4xf32>
    %577 = vector.extract_strided_slice %297 {offsets = [0, 0], sizes = [8, 44], strides = [1, 1]} : vector<8x48xf32> to vector<8x44xf32>
    %578 = tpu.concatenate %576, %577 in 1 : vector<8x4xf32>, vector<8x44xf32> -> vector<8x48xf32>
    %579 = vector.extract_strided_slice %575 {offsets = [0, 0], sizes = [8, 1], strides = [1, 1]} : vector<8x5xf32> to vector<8x1xf32>
    %580 = vector.broadcast %579 : vector<8x1xf32> to vector<8x48xf32>
    %581 = arith.mulf %578, %580 : vector<8x48xf32>
    %cst_142 = arith.constant 0.000000e+00 : f32
    %582 = vector.broadcast %cst_142 : f32 to vector<8x2xf32>
    %583 = vector.extract_strided_slice %297 {offsets = [0, 0], sizes = [8, 46], strides = [1, 1]} : vector<8x48xf32> to vector<8x46xf32>
    %584 = tpu.concatenate %582, %583 in 1 : vector<8x2xf32>, vector<8x46xf32> -> vector<8x48xf32>
    %585 = vector.extract_strided_slice %575 {offsets = [0, 1], sizes = [8, 1], strides = [1, 1]} : vector<8x5xf32> to vector<8x1xf32>
    %586 = vector.broadcast %585 : vector<8x1xf32> to vector<8x48xf32>
    %587 = arith.mulf %584, %586 : vector<8x48xf32>
    %588 = arith.addf %581, %587 : vector<8x48xf32>
    %589 = vector.extract_strided_slice %575 {offsets = [0, 2], sizes = [8, 1], strides = [1, 1]} : vector<8x5xf32> to vector<8x1xf32>
    %590 = vector.broadcast %589 : vector<8x1xf32> to vector<8x48xf32>
    %591 = arith.mulf %297, %590 : vector<8x48xf32>
    %592 = arith.addf %588, %591 : vector<8x48xf32>
    %593 = vector.extract_strided_slice %297 {offsets = [0, 2], sizes = [8, 46], strides = [1, 1]} : vector<8x48xf32> to vector<8x46xf32>
    %cst_143 = arith.constant 0.000000e+00 : f32
    %594 = vector.broadcast %cst_143 : f32 to vector<8x2xf32>
    %595 = tpu.concatenate %593, %594 in 1 : vector<8x46xf32>, vector<8x2xf32> -> vector<8x48xf32>
    %596 = vector.extract_strided_slice %575 {offsets = [0, 3], sizes = [8, 1], strides = [1, 1]} : vector<8x5xf32> to vector<8x1xf32>
    %597 = vector.broadcast %596 : vector<8x1xf32> to vector<8x48xf32>
    %598 = arith.mulf %595, %597 : vector<8x48xf32>
    %599 = arith.addf %592, %598 : vector<8x48xf32>
    %600 = vector.extract_strided_slice %297 {offsets = [0, 4], sizes = [8, 44], strides = [1, 1]} : vector<8x48xf32> to vector<8x44xf32>
    %cst_144 = arith.constant 0.000000e+00 : f32
    %601 = vector.broadcast %cst_144 : f32 to vector<8x4xf32>
    %602 = tpu.concatenate %600, %601 in 1 : vector<8x44xf32>, vector<8x4xf32> -> vector<8x48xf32>
    %603 = vector.extract_strided_slice %575 {offsets = [0, 4], sizes = [8, 1], strides = [1, 1]} : vector<8x5xf32> to vector<8x1xf32>
    %604 = vector.broadcast %603 : vector<8x1xf32> to vector<8x48xf32>
    %605 = arith.mulf %602, %604 : vector<8x48xf32>
    %606 = arith.addf %599, %605 : vector<8x48xf32>
    %607 = arith.mulf %606, %14 : vector<8x48xf32>
    %608 = vector.extract_strided_slice %15 {offsets = [80, 0], sizes = [8, 8], strides = [1, 1]} : vector<120x8xbf16> to vector<8x8xbf16>
    %609 = arith.truncf %607 : vector<8x48xf32> to vector<8x48xbf16>
    %cst_145 = arith.constant dense<0.000000e+00> : vector<8x48xf32>
    %610 = tpu.matmul %608, %609, %cst_145 {dimension_numbers = #tpu.dot_dimension_numbers<[1], [0], [0], [1], [0, 0, 1, 1], [], []>} : vector<8x8xbf16>, vector<8x48xbf16>, vector<8x48xf32> -> vector<8x48xf32>
    %cst_146 = arith.constant dense<0.000000e+00> : vector<8xf32>
    %611 = vector.multi_reduction <add>, %610, %cst_146 [1] : vector<8x48xf32> to vector<8xf32>
    %612 = vector.shape_cast %611 : vector<8xf32> to vector<8x1xf32>
    %613 = arith.mulf %610, %610 : vector<8x48xf32>
    %cst_147 = arith.constant dense<0.000000e+00> : vector<8xf32>
    %614 = vector.multi_reduction <add>, %613, %cst_147 [1] : vector<8x48xf32> to vector<8xf32>
    %615 = vector.shape_cast %614 : vector<8xf32> to vector<8x1xf32>
    %cst_148 = arith.constant 3.125000e-02 : f32
    %616 = vector.broadcast %cst_148 : f32 to vector<8x1xf32>
    %617 = arith.mulf %612, %616 : vector<8x1xf32>
    %cst_149 = arith.constant 3.125000e-02 : f32
    %618 = vector.broadcast %cst_149 : f32 to vector<8x1xf32>
    %619 = arith.mulf %615, %618 : vector<8x1xf32>
    %620 = arith.mulf %617, %617 : vector<8x1xf32>
    %621 = arith.subf %619, %620 : vector<8x1xf32>
    %cst_150 = arith.constant 9.99999974E-6 : f32
    %622 = vector.broadcast %cst_150 : f32 to vector<8x1xf32>
    %623 = arith.addf %621, %622 : vector<8x1xf32>
    %624 = math.rsqrt %623 : vector<8x1xf32>
    %625 = vector.broadcast %617 : vector<8x1xf32> to vector<8x48xf32>
    %626 = arith.subf %610, %625 : vector<8x48xf32>
    %627 = vector.broadcast %624 : vector<8x1xf32> to vector<8x48xf32>
    %628 = arith.mulf %626, %627 : vector<8x48xf32>
    %cst_151 = arith.constant 0.000000e+00 : f32
    %629 = vector.broadcast %cst_151 : f32 to vector<8x48xf32>
    %630 = arith.select %11, %628, %629 : vector<8x48xi1>, vector<8x48xf32>
    %631 = arith.addf %574, %630 : vector<8x48xf32>
    %cst_152 = arith.constant 0.000000e+00 : f32
    %632 = vector.broadcast %cst_152 : f32 to vector<8x48xf32>
    %cst_153 = arith.constant -1.000000e+30 : f32
    %633 = vector.broadcast %cst_153 : f32 to vector<8x48xf32>
    %634 = arith.select %11, %42, %633 : vector<8x48xi1>, vector<8x48xf32>
    %cst_154 = arith.constant 0.000000e+00 : f32
    %635 = vector.broadcast %cst_154 : f32 to vector<8x1xf32>
    %636 = vector.extract_strided_slice %634 {offsets = [0, 0], sizes = [8, 47], strides = [1, 1]} : vector<8x48xf32> to vector<8x47xf32>
    %637 = tpu.concatenate %635, %636 in 1 : vector<8x1xf32>, vector<8x47xf32> -> vector<8x48xf32>
    %638 = arith.maximumf %637, %634 : vector<8x48xf32>
    %639 = vector.extract_strided_slice %634 {offsets = [0, 1], sizes = [8, 47], strides = [1, 1]} : vector<8x48xf32> to vector<8x47xf32>
    %cst_155 = arith.constant 0.000000e+00 : f32
    %640 = vector.broadcast %cst_155 : f32 to vector<8x1xf32>
    %641 = tpu.concatenate %639, %640 in 1 : vector<8x47xf32>, vector<8x1xf32> -> vector<8x48xf32>
    %642 = arith.maximumf %638, %641 : vector<8x48xf32>
    %cst_156 = arith.constant 0.000000e+00 : f32
    %643 = vector.broadcast %cst_156 : f32 to vector<8x48xf32>
    %644 = arith.select %11, %642, %643 : vector<8x48xi1>, vector<8x48xf32>
    %cst_157 = arith.constant dense<0.000000e+00> : vector<8xf32>
    %645 = vector.multi_reduction <add>, %644, %cst_157 [1] : vector<8x48xf32> to vector<8xf32>
    %646 = vector.shape_cast %645 : vector<8xf32> to vector<8x1xf32>
    %647 = arith.mulf %644, %644 : vector<8x48xf32>
    %cst_158 = arith.constant dense<0.000000e+00> : vector<8xf32>
    %648 = vector.multi_reduction <add>, %647, %cst_158 [1] : vector<8x48xf32> to vector<8xf32>
    %649 = vector.shape_cast %648 : vector<8xf32> to vector<8x1xf32>
    %cst_159 = arith.constant 3.125000e-02 : f32
    %650 = vector.broadcast %cst_159 : f32 to vector<8x1xf32>
    %651 = arith.mulf %646, %650 : vector<8x1xf32>
    %cst_160 = arith.constant 3.125000e-02 : f32
    %652 = vector.broadcast %cst_160 : f32 to vector<8x1xf32>
    %653 = arith.mulf %649, %652 : vector<8x1xf32>
    %654 = arith.mulf %651, %651 : vector<8x1xf32>
    %655 = arith.subf %653, %654 : vector<8x1xf32>
    %cst_161 = arith.constant 9.99999974E-6 : f32
    %656 = vector.broadcast %cst_161 : f32 to vector<8x1xf32>
    %657 = arith.addf %655, %656 : vector<8x1xf32>
    %658 = math.rsqrt %657 : vector<8x1xf32>
    %659 = vector.broadcast %651 : vector<8x1xf32> to vector<8x48xf32>
    %660 = arith.subf %644, %659 : vector<8x48xf32>
    %661 = vector.broadcast %658 : vector<8x1xf32> to vector<8x48xf32>
    %662 = arith.mulf %660, %661 : vector<8x48xf32>
    %cst_162 = arith.constant 0.000000e+00 : f32
    %663 = vector.broadcast %cst_162 : f32 to vector<8x48xf32>
    %664 = arith.select %11, %662, %663 : vector<8x48xi1>, vector<8x48xf32>
    %665 = arith.addf %632, %664 : vector<8x48xf32>
    %666 = vector.extract_strided_slice %16 {offsets = [0, 35], sizes = [8, 5], strides = [1, 1]} : vector<8x51xf32> to vector<8x5xf32>
    %cst_163 = arith.constant 0.000000e+00 : f32
    %667 = vector.broadcast %cst_163 : f32 to vector<8x2xf32>
    %668 = vector.extract_strided_slice %71 {offsets = [0, 0], sizes = [8, 46], strides = [1, 1]} : vector<8x48xf32> to vector<8x46xf32>
    %669 = tpu.concatenate %667, %668 in 1 : vector<8x2xf32>, vector<8x46xf32> -> vector<8x48xf32>
    %670 = vector.extract_strided_slice %666 {offsets = [0, 0], sizes = [8, 1], strides = [1, 1]} : vector<8x5xf32> to vector<8x1xf32>
    %671 = vector.broadcast %670 : vector<8x1xf32> to vector<8x48xf32>
    %672 = arith.mulf %669, %671 : vector<8x48xf32>
    %cst_164 = arith.constant 0.000000e+00 : f32
    %673 = vector.broadcast %cst_164 : f32 to vector<8x1xf32>
    %674 = vector.extract_strided_slice %71 {offsets = [0, 0], sizes = [8, 47], strides = [1, 1]} : vector<8x48xf32> to vector<8x47xf32>
    %675 = tpu.concatenate %673, %674 in 1 : vector<8x1xf32>, vector<8x47xf32> -> vector<8x48xf32>
    %676 = vector.extract_strided_slice %666 {offsets = [0, 1], sizes = [8, 1], strides = [1, 1]} : vector<8x5xf32> to vector<8x1xf32>
    %677 = vector.broadcast %676 : vector<8x1xf32> to vector<8x48xf32>
    %678 = arith.mulf %675, %677 : vector<8x48xf32>
    %679 = arith.addf %672, %678 : vector<8x48xf32>
    %680 = vector.extract_strided_slice %666 {offsets = [0, 2], sizes = [8, 1], strides = [1, 1]} : vector<8x5xf32> to vector<8x1xf32>
    %681 = vector.broadcast %680 : vector<8x1xf32> to vector<8x48xf32>
    %682 = arith.mulf %71, %681 : vector<8x48xf32>
    %683 = arith.addf %679, %682 : vector<8x48xf32>
    %684 = vector.extract_strided_slice %71 {offsets = [0, 1], sizes = [8, 47], strides = [1, 1]} : vector<8x48xf32> to vector<8x47xf32>
    %cst_165 = arith.constant 0.000000e+00 : f32
    %685 = vector.broadcast %cst_165 : f32 to vector<8x1xf32>
    %686 = tpu.concatenate %684, %685 in 1 : vector<8x47xf32>, vector<8x1xf32> -> vector<8x48xf32>
    %687 = vector.extract_strided_slice %666 {offsets = [0, 3], sizes = [8, 1], strides = [1, 1]} : vector<8x5xf32> to vector<8x1xf32>
    %688 = vector.broadcast %687 : vector<8x1xf32> to vector<8x48xf32>
    %689 = arith.mulf %686, %688 : vector<8x48xf32>
    %690 = arith.addf %683, %689 : vector<8x48xf32>
    %691 = vector.extract_strided_slice %71 {offsets = [0, 2], sizes = [8, 46], strides = [1, 1]} : vector<8x48xf32> to vector<8x46xf32>
    %cst_166 = arith.constant 0.000000e+00 : f32
    %692 = vector.broadcast %cst_166 : f32 to vector<8x2xf32>
    %693 = tpu.concatenate %691, %692 in 1 : vector<8x46xf32>, vector<8x2xf32> -> vector<8x48xf32>
    %694 = vector.extract_strided_slice %666 {offsets = [0, 4], sizes = [8, 1], strides = [1, 1]} : vector<8x5xf32> to vector<8x1xf32>
    %695 = vector.broadcast %694 : vector<8x1xf32> to vector<8x48xf32>
    %696 = arith.mulf %693, %695 : vector<8x48xf32>
    %697 = arith.addf %690, %696 : vector<8x48xf32>
    %698 = arith.mulf %697, %14 : vector<8x48xf32>
    %699 = vector.extract_strided_slice %15 {offsets = [88, 0], sizes = [8, 8], strides = [1, 1]} : vector<120x8xbf16> to vector<8x8xbf16>
    %700 = arith.truncf %698 : vector<8x48xf32> to vector<8x48xbf16>
    %cst_167 = arith.constant dense<0.000000e+00> : vector<8x48xf32>
    %701 = tpu.matmul %699, %700, %cst_167 {dimension_numbers = #tpu.dot_dimension_numbers<[1], [0], [0], [1], [0, 0, 1, 1], [], []>} : vector<8x8xbf16>, vector<8x48xbf16>, vector<8x48xf32> -> vector<8x48xf32>
    %cst_168 = arith.constant dense<0.000000e+00> : vector<8xf32>
    %702 = vector.multi_reduction <add>, %701, %cst_168 [1] : vector<8x48xf32> to vector<8xf32>
    %703 = vector.shape_cast %702 : vector<8xf32> to vector<8x1xf32>
    %704 = arith.mulf %701, %701 : vector<8x48xf32>
    %cst_169 = arith.constant dense<0.000000e+00> : vector<8xf32>
    %705 = vector.multi_reduction <add>, %704, %cst_169 [1] : vector<8x48xf32> to vector<8xf32>
    %706 = vector.shape_cast %705 : vector<8xf32> to vector<8x1xf32>
    %cst_170 = arith.constant 3.125000e-02 : f32
    %707 = vector.broadcast %cst_170 : f32 to vector<8x1xf32>
    %708 = arith.mulf %703, %707 : vector<8x1xf32>
    %cst_171 = arith.constant 3.125000e-02 : f32
    %709 = vector.broadcast %cst_171 : f32 to vector<8x1xf32>
    %710 = arith.mulf %706, %709 : vector<8x1xf32>
    %711 = arith.mulf %708, %708 : vector<8x1xf32>
    %712 = arith.subf %710, %711 : vector<8x1xf32>
    %cst_172 = arith.constant 9.99999974E-6 : f32
    %713 = vector.broadcast %cst_172 : f32 to vector<8x1xf32>
    %714 = arith.addf %712, %713 : vector<8x1xf32>
    %715 = math.rsqrt %714 : vector<8x1xf32>
    %716 = vector.broadcast %708 : vector<8x1xf32> to vector<8x48xf32>
    %717 = arith.subf %701, %716 : vector<8x48xf32>
    %718 = vector.broadcast %715 : vector<8x1xf32> to vector<8x48xf32>
    %719 = arith.mulf %717, %718 : vector<8x48xf32>
    %cst_173 = arith.constant 0.000000e+00 : f32
    %720 = vector.broadcast %cst_173 : f32 to vector<8x48xf32>
    %721 = arith.select %11, %719, %720 : vector<8x48xi1>, vector<8x48xf32>
    %cst_174 = arith.constant 0.000000e+00 : f32
    %722 = vector.broadcast %cst_174 : f32 to vector<8x48xf32>
    %723 = arith.maximumf %721, %722 : vector<8x48xf32>
    %724 = vector.extract_strided_slice %16 {offsets = [0, 40], sizes = [8, 5], strides = [1, 1]} : vector<8x51xf32> to vector<8x5xf32>
    %cst_175 = arith.constant 0.000000e+00 : f32
    %725 = vector.broadcast %cst_175 : f32 to vector<8x2xf32>
    %726 = vector.extract_strided_slice %723 {offsets = [0, 0], sizes = [8, 46], strides = [1, 1]} : vector<8x48xf32> to vector<8x46xf32>
    %727 = tpu.concatenate %725, %726 in 1 : vector<8x2xf32>, vector<8x46xf32> -> vector<8x48xf32>
    %728 = vector.extract_strided_slice %724 {offsets = [0, 0], sizes = [8, 1], strides = [1, 1]} : vector<8x5xf32> to vector<8x1xf32>
    %729 = vector.broadcast %728 : vector<8x1xf32> to vector<8x48xf32>
    %730 = arith.mulf %727, %729 : vector<8x48xf32>
    %cst_176 = arith.constant 0.000000e+00 : f32
    %731 = vector.broadcast %cst_176 : f32 to vector<8x1xf32>
    %732 = vector.extract_strided_slice %723 {offsets = [0, 0], sizes = [8, 47], strides = [1, 1]} : vector<8x48xf32> to vector<8x47xf32>
    %733 = tpu.concatenate %731, %732 in 1 : vector<8x1xf32>, vector<8x47xf32> -> vector<8x48xf32>
    %734 = vector.extract_strided_slice %724 {offsets = [0, 1], sizes = [8, 1], strides = [1, 1]} : vector<8x5xf32> to vector<8x1xf32>
    %735 = vector.broadcast %734 : vector<8x1xf32> to vector<8x48xf32>
    %736 = arith.mulf %733, %735 : vector<8x48xf32>
    %737 = arith.addf %730, %736 : vector<8x48xf32>
    %738 = vector.extract_strided_slice %724 {offsets = [0, 2], sizes = [8, 1], strides = [1, 1]} : vector<8x5xf32> to vector<8x1xf32>
    %739 = vector.broadcast %738 : vector<8x1xf32> to vector<8x48xf32>
    %740 = arith.mulf %723, %739 : vector<8x48xf32>
    %741 = arith.addf %737, %740 : vector<8x48xf32>
    %742 = vector.extract_strided_slice %723 {offsets = [0, 1], sizes = [8, 47], strides = [1, 1]} : vector<8x48xf32> to vector<8x47xf32>
    %cst_177 = arith.constant 0.000000e+00 : f32
    %743 = vector.broadcast %cst_177 : f32 to vector<8x1xf32>
    %744 = tpu.concatenate %742, %743 in 1 : vector<8x47xf32>, vector<8x1xf32> -> vector<8x48xf32>
    %745 = vector.extract_strided_slice %724 {offsets = [0, 3], sizes = [8, 1], strides = [1, 1]} : vector<8x5xf32> to vector<8x1xf32>
    %746 = vector.broadcast %745 : vector<8x1xf32> to vector<8x48xf32>
    %747 = arith.mulf %744, %746 : vector<8x48xf32>
    %748 = arith.addf %741, %747 : vector<8x48xf32>
    %749 = vector.extract_strided_slice %723 {offsets = [0, 2], sizes = [8, 46], strides = [1, 1]} : vector<8x48xf32> to vector<8x46xf32>
    %cst_178 = arith.constant 0.000000e+00 : f32
    %750 = vector.broadcast %cst_178 : f32 to vector<8x2xf32>
    %751 = tpu.concatenate %749, %750 in 1 : vector<8x46xf32>, vector<8x2xf32> -> vector<8x48xf32>
    %752 = vector.extract_strided_slice %724 {offsets = [0, 4], sizes = [8, 1], strides = [1, 1]} : vector<8x5xf32> to vector<8x1xf32>
    %753 = vector.broadcast %752 : vector<8x1xf32> to vector<8x48xf32>
    %754 = arith.mulf %751, %753 : vector<8x48xf32>
    %755 = arith.addf %748, %754 : vector<8x48xf32>
    %756 = arith.mulf %755, %14 : vector<8x48xf32>
    %757 = vector.extract_strided_slice %15 {offsets = [96, 0], sizes = [8, 8], strides = [1, 1]} : vector<120x8xbf16> to vector<8x8xbf16>
    %758 = arith.truncf %756 : vector<8x48xf32> to vector<8x48xbf16>
    %cst_179 = arith.constant dense<0.000000e+00> : vector<8x48xf32>
    %759 = tpu.matmul %757, %758, %cst_179 {dimension_numbers = #tpu.dot_dimension_numbers<[1], [0], [0], [1], [0, 0, 1, 1], [], []>} : vector<8x8xbf16>, vector<8x48xbf16>, vector<8x48xf32> -> vector<8x48xf32>
    %cst_180 = arith.constant dense<0.000000e+00> : vector<8xf32>
    %760 = vector.multi_reduction <add>, %759, %cst_180 [1] : vector<8x48xf32> to vector<8xf32>
    %761 = vector.shape_cast %760 : vector<8xf32> to vector<8x1xf32>
    %762 = arith.mulf %759, %759 : vector<8x48xf32>
    %cst_181 = arith.constant dense<0.000000e+00> : vector<8xf32>
    %763 = vector.multi_reduction <add>, %762, %cst_181 [1] : vector<8x48xf32> to vector<8xf32>
    %764 = vector.shape_cast %763 : vector<8xf32> to vector<8x1xf32>
    %cst_182 = arith.constant 3.125000e-02 : f32
    %765 = vector.broadcast %cst_182 : f32 to vector<8x1xf32>
    %766 = arith.mulf %761, %765 : vector<8x1xf32>
    %cst_183 = arith.constant 3.125000e-02 : f32
    %767 = vector.broadcast %cst_183 : f32 to vector<8x1xf32>
    %768 = arith.mulf %764, %767 : vector<8x1xf32>
    %769 = arith.mulf %766, %766 : vector<8x1xf32>
    %770 = arith.subf %768, %769 : vector<8x1xf32>
    %cst_184 = arith.constant 9.99999974E-6 : f32
    %771 = vector.broadcast %cst_184 : f32 to vector<8x1xf32>
    %772 = arith.addf %770, %771 : vector<8x1xf32>
    %773 = math.rsqrt %772 : vector<8x1xf32>
    %774 = vector.broadcast %766 : vector<8x1xf32> to vector<8x48xf32>
    %775 = arith.subf %759, %774 : vector<8x48xf32>
    %776 = vector.broadcast %773 : vector<8x1xf32> to vector<8x48xf32>
    %777 = arith.mulf %775, %776 : vector<8x48xf32>
    %cst_185 = arith.constant 0.000000e+00 : f32
    %778 = vector.broadcast %cst_185 : f32 to vector<8x48xf32>
    %779 = arith.select %11, %777, %778 : vector<8x48xi1>, vector<8x48xf32>
    %780 = arith.addf %665, %779 : vector<8x48xf32>
    %cst_186 = arith.constant 0.000000e+00 : f32
    %781 = vector.broadcast %cst_186 : f32 to vector<8x1xf32>
    %782 = vector.extract_strided_slice %68 {offsets = [0, 0], sizes = [8, 47], strides = [1, 1]} : vector<8x48xf32> to vector<8x47xf32>
    %783 = tpu.concatenate %781, %782 in 1 : vector<8x1xf32>, vector<8x47xf32> -> vector<8x48xf32>
    %784 = arith.addf %783, %68 : vector<8x48xf32>
    %785 = vector.extract_strided_slice %68 {offsets = [0, 1], sizes = [8, 47], strides = [1, 1]} : vector<8x48xf32> to vector<8x47xf32>
    %cst_187 = arith.constant 0.000000e+00 : f32
    %786 = vector.broadcast %cst_187 : f32 to vector<8x1xf32>
    %787 = tpu.concatenate %785, %786 in 1 : vector<8x47xf32>, vector<8x1xf32> -> vector<8x48xf32>
    %788 = arith.addf %784, %787 : vector<8x48xf32>
    %789 = arith.mulf %788, %212 : vector<8x48xf32>
    %790 = arith.mulf %789, %14 : vector<8x48xf32>
    %cst_188 = arith.constant dense<0.000000e+00> : vector<8xf32>
    %791 = vector.multi_reduction <add>, %790, %cst_188 [1] : vector<8x48xf32> to vector<8xf32>
    %792 = vector.shape_cast %791 : vector<8xf32> to vector<8x1xf32>
    %793 = arith.mulf %790, %790 : vector<8x48xf32>
    %cst_189 = arith.constant dense<0.000000e+00> : vector<8xf32>
    %794 = vector.multi_reduction <add>, %793, %cst_189 [1] : vector<8x48xf32> to vector<8xf32>
    %795 = vector.shape_cast %794 : vector<8xf32> to vector<8x1xf32>
    %cst_190 = arith.constant 3.125000e-02 : f32
    %796 = vector.broadcast %cst_190 : f32 to vector<8x1xf32>
    %797 = arith.mulf %792, %796 : vector<8x1xf32>
    %cst_191 = arith.constant 3.125000e-02 : f32
    %798 = vector.broadcast %cst_191 : f32 to vector<8x1xf32>
    %799 = arith.mulf %795, %798 : vector<8x1xf32>
    %800 = arith.mulf %797, %797 : vector<8x1xf32>
    %801 = arith.subf %799, %800 : vector<8x1xf32>
    %cst_192 = arith.constant 9.99999974E-6 : f32
    %802 = vector.broadcast %cst_192 : f32 to vector<8x1xf32>
    %803 = arith.addf %801, %802 : vector<8x1xf32>
    %804 = math.rsqrt %803 : vector<8x1xf32>
    %805 = vector.broadcast %797 : vector<8x1xf32> to vector<8x48xf32>
    %806 = arith.subf %790, %805 : vector<8x48xf32>
    %807 = vector.broadcast %804 : vector<8x1xf32> to vector<8x48xf32>
    %808 = arith.mulf %806, %807 : vector<8x48xf32>
    %cst_193 = arith.constant 0.000000e+00 : f32
    %809 = vector.broadcast %cst_193 : f32 to vector<8x48xf32>
    %810 = arith.select %11, %808, %809 : vector<8x48xi1>, vector<8x48xf32>
    %811 = arith.addf %780, %810 : vector<8x48xf32>
    %812 = arith.addf %811, %191 : vector<8x48xf32>
    %cst_194 = arith.constant 0.000000e+00 : f32
    %813 = vector.broadcast %cst_194 : f32 to vector<8x48xf32>
    %814 = arith.maximumf %384, %813 : vector<8x48xf32>
    %815 = vector.extract_strided_slice %16 {offsets = [0, 45], sizes = [8, 3], strides = [1, 1]} : vector<8x51xf32> to vector<8x3xf32>
    %cst_195 = arith.constant 0.000000e+00 : f32
    %816 = vector.broadcast %cst_195 : f32 to vector<8x1xf32>
    %817 = vector.extract_strided_slice %814 {offsets = [0, 0], sizes = [8, 47], strides = [1, 1]} : vector<8x48xf32> to vector<8x47xf32>
    %818 = tpu.concatenate %816, %817 in 1 : vector<8x1xf32>, vector<8x47xf32> -> vector<8x48xf32>
    %819 = vector.extract_strided_slice %815 {offsets = [0, 0], sizes = [8, 1], strides = [1, 1]} : vector<8x3xf32> to vector<8x1xf32>
    %820 = vector.broadcast %819 : vector<8x1xf32> to vector<8x48xf32>
    %821 = arith.mulf %818, %820 : vector<8x48xf32>
    %822 = vector.extract_strided_slice %815 {offsets = [0, 1], sizes = [8, 1], strides = [1, 1]} : vector<8x3xf32> to vector<8x1xf32>
    %823 = vector.broadcast %822 : vector<8x1xf32> to vector<8x48xf32>
    %824 = arith.mulf %814, %823 : vector<8x48xf32>
    %825 = arith.addf %821, %824 : vector<8x48xf32>
    %826 = vector.extract_strided_slice %814 {offsets = [0, 1], sizes = [8, 47], strides = [1, 1]} : vector<8x48xf32> to vector<8x47xf32>
    %cst_196 = arith.constant 0.000000e+00 : f32
    %827 = vector.broadcast %cst_196 : f32 to vector<8x1xf32>
    %828 = tpu.concatenate %826, %827 in 1 : vector<8x47xf32>, vector<8x1xf32> -> vector<8x48xf32>
    %829 = vector.extract_strided_slice %815 {offsets = [0, 2], sizes = [8, 1], strides = [1, 1]} : vector<8x3xf32> to vector<8x1xf32>
    %830 = vector.broadcast %829 : vector<8x1xf32> to vector<8x48xf32>
    %831 = arith.mulf %828, %830 : vector<8x48xf32>
    %832 = arith.addf %825, %831 : vector<8x48xf32>
    %833 = arith.mulf %832, %14 : vector<8x48xf32>
    %834 = vector.extract_strided_slice %15 {offsets = [104, 0], sizes = [8, 8], strides = [1, 1]} : vector<120x8xbf16> to vector<8x8xbf16>
    %835 = arith.truncf %833 : vector<8x48xf32> to vector<8x48xbf16>
    %cst_197 = arith.constant dense<0.000000e+00> : vector<8x48xf32>
    %836 = tpu.matmul %834, %835, %cst_197 {dimension_numbers = #tpu.dot_dimension_numbers<[1], [0], [0], [1], [0, 0, 1, 1], [], []>} : vector<8x8xbf16>, vector<8x48xbf16>, vector<8x48xf32> -> vector<8x48xf32>
    %cst_198 = arith.constant dense<0.000000e+00> : vector<8xf32>
    %837 = vector.multi_reduction <add>, %836, %cst_198 [1] : vector<8x48xf32> to vector<8xf32>
    %838 = vector.shape_cast %837 : vector<8xf32> to vector<8x1xf32>
    %839 = arith.mulf %836, %836 : vector<8x48xf32>
    %cst_199 = arith.constant dense<0.000000e+00> : vector<8xf32>
    %840 = vector.multi_reduction <add>, %839, %cst_199 [1] : vector<8x48xf32> to vector<8xf32>
    %841 = vector.shape_cast %840 : vector<8xf32> to vector<8x1xf32>
    %cst_200 = arith.constant 3.125000e-02 : f32
    %842 = vector.broadcast %cst_200 : f32 to vector<8x1xf32>
    %843 = arith.mulf %838, %842 : vector<8x1xf32>
    %cst_201 = arith.constant 3.125000e-02 : f32
    %844 = vector.broadcast %cst_201 : f32 to vector<8x1xf32>
    %845 = arith.mulf %841, %844 : vector<8x1xf32>
    %846 = arith.mulf %843, %843 : vector<8x1xf32>
    %847 = arith.subf %845, %846 : vector<8x1xf32>
    %cst_202 = arith.constant 9.99999974E-6 : f32
    %848 = vector.broadcast %cst_202 : f32 to vector<8x1xf32>
    %849 = arith.addf %847, %848 : vector<8x1xf32>
    %850 = math.rsqrt %849 : vector<8x1xf32>
    %851 = vector.broadcast %843 : vector<8x1xf32> to vector<8x48xf32>
    %852 = arith.subf %836, %851 : vector<8x48xf32>
    %853 = vector.broadcast %850 : vector<8x1xf32> to vector<8x48xf32>
    %854 = arith.mulf %852, %853 : vector<8x48xf32>
    %cst_203 = arith.constant 0.000000e+00 : f32
    %855 = vector.broadcast %cst_203 : f32 to vector<8x48xf32>
    %856 = arith.select %11, %854, %855 : vector<8x48xi1>, vector<8x48xf32>
    %cst_204 = arith.constant 0.000000e+00 : f32
    %857 = vector.broadcast %cst_204 : f32 to vector<8x48xf32>
    %858 = arith.maximumf %856, %857 : vector<8x48xf32>
    %859 = vector.extract_strided_slice %16 {offsets = [0, 48], sizes = [8, 3], strides = [1, 1]} : vector<8x51xf32> to vector<8x3xf32>
    %cst_205 = arith.constant 0.000000e+00 : f32
    %860 = vector.broadcast %cst_205 : f32 to vector<8x1xf32>
    %861 = vector.extract_strided_slice %858 {offsets = [0, 0], sizes = [8, 47], strides = [1, 1]} : vector<8x48xf32> to vector<8x47xf32>
    %862 = tpu.concatenate %860, %861 in 1 : vector<8x1xf32>, vector<8x47xf32> -> vector<8x48xf32>
    %863 = vector.extract_strided_slice %859 {offsets = [0, 0], sizes = [8, 1], strides = [1, 1]} : vector<8x3xf32> to vector<8x1xf32>
    %864 = vector.broadcast %863 : vector<8x1xf32> to vector<8x48xf32>
    %865 = arith.mulf %862, %864 : vector<8x48xf32>
    %866 = vector.extract_strided_slice %859 {offsets = [0, 1], sizes = [8, 1], strides = [1, 1]} : vector<8x3xf32> to vector<8x1xf32>
    %867 = vector.broadcast %866 : vector<8x1xf32> to vector<8x48xf32>
    %868 = arith.mulf %858, %867 : vector<8x48xf32>
    %869 = arith.addf %865, %868 : vector<8x48xf32>
    %870 = vector.extract_strided_slice %858 {offsets = [0, 1], sizes = [8, 47], strides = [1, 1]} : vector<8x48xf32> to vector<8x47xf32>
    %cst_206 = arith.constant 0.000000e+00 : f32
    %871 = vector.broadcast %cst_206 : f32 to vector<8x1xf32>
    %872 = tpu.concatenate %870, %871 in 1 : vector<8x47xf32>, vector<8x1xf32> -> vector<8x48xf32>
    %873 = vector.extract_strided_slice %859 {offsets = [0, 2], sizes = [8, 1], strides = [1, 1]} : vector<8x3xf32> to vector<8x1xf32>
    %874 = vector.broadcast %873 : vector<8x1xf32> to vector<8x48xf32>
    %875 = arith.mulf %872, %874 : vector<8x48xf32>
    %876 = arith.addf %869, %875 : vector<8x48xf32>
    %877 = arith.mulf %876, %14 : vector<8x48xf32>
    %878 = vector.extract_strided_slice %15 {offsets = [112, 0], sizes = [8, 8], strides = [1, 1]} : vector<120x8xbf16> to vector<8x8xbf16>
    %879 = arith.truncf %877 : vector<8x48xf32> to vector<8x48xbf16>
    %cst_207 = arith.constant dense<0.000000e+00> : vector<8x48xf32>
    %880 = tpu.matmul %878, %879, %cst_207 {dimension_numbers = #tpu.dot_dimension_numbers<[1], [0], [0], [1], [0, 0, 1, 1], [], []>} : vector<8x8xbf16>, vector<8x48xbf16>, vector<8x48xf32> -> vector<8x48xf32>
    %cst_208 = arith.constant dense<0.000000e+00> : vector<8xf32>
    %881 = vector.multi_reduction <add>, %880, %cst_208 [1] : vector<8x48xf32> to vector<8xf32>
    %882 = vector.shape_cast %881 : vector<8xf32> to vector<8x1xf32>
    %883 = arith.mulf %880, %880 : vector<8x48xf32>
    %cst_209 = arith.constant dense<0.000000e+00> : vector<8xf32>
    %884 = vector.multi_reduction <add>, %883, %cst_209 [1] : vector<8x48xf32> to vector<8xf32>
    %885 = vector.shape_cast %884 : vector<8xf32> to vector<8x1xf32>
    %cst_210 = arith.constant 3.125000e-02 : f32
    %886 = vector.broadcast %cst_210 : f32 to vector<8x1xf32>
    %887 = arith.mulf %882, %886 : vector<8x1xf32>
    %cst_211 = arith.constant 3.125000e-02 : f32
    %888 = vector.broadcast %cst_211 : f32 to vector<8x1xf32>
    %889 = arith.mulf %885, %888 : vector<8x1xf32>
    %890 = arith.mulf %887, %887 : vector<8x1xf32>
    %891 = arith.subf %889, %890 : vector<8x1xf32>
    %cst_212 = arith.constant 9.99999974E-6 : f32
    %892 = vector.broadcast %cst_212 : f32 to vector<8x1xf32>
    %893 = arith.addf %891, %892 : vector<8x1xf32>
    %894 = math.rsqrt %893 : vector<8x1xf32>
    %895 = vector.broadcast %887 : vector<8x1xf32> to vector<8x48xf32>
    %896 = arith.subf %880, %895 : vector<8x48xf32>
    %897 = vector.broadcast %894 : vector<8x1xf32> to vector<8x48xf32>
    %898 = arith.mulf %896, %897 : vector<8x48xf32>
    %cst_213 = arith.constant 0.000000e+00 : f32
    %899 = vector.broadcast %cst_213 : f32 to vector<8x48xf32>
    %900 = arith.select %11, %898, %899 : vector<8x48xi1>, vector<8x48xf32>
    %901 = arith.addf %812, %900 : vector<8x48xf32>
    %902 = tpu.concatenate %191, %384, %631, %901 in 0 : vector<8x48xf32>, vector<8x48xf32>, vector<8x48xf32>, vector<8x48xf32> -> vector<32x48xf32>
    %c0_214 = arith.constant 0 : index
    %c0_215 = arith.constant 0 : index
    %903 = vector.load %arg4[%c0_214, %c0_215] : memref<32x48xf32, #tpu.memory_space<vmem>>, vector<32x48xf32>
    tpu.vector_store %arg4[%c0_214, %c0_215], %902 {strides = array<i32>} : memref<32x48xf32, #tpu.memory_space<vmem>>, vector<32x48xf32>,
    return
  }
}

</mosaic_0001>

<bundles_post_ra>
// kernel: fwd_fn.1
= control target key start
LH: loop header
LB: loop body
LE: loop exit
PB: predicated region body
PF: predicated region fallthrough
CT: control target
= control target key end

     0   :  { %vm51_vm0 = vcmask 1043456   ;;  %vm47_vm1 = vcmask 64512   ;;  %v1545_v6 = vmov 1   ;;  %vm68_vm2 = vcmask 392192   ;;  %s1549_s21 = smov 1   ;;  %s1555_s29 = smov 4   ;;  %s2187_s0 = inlined_call_operand.vmem [shape: f32[8,48], index: 0, kind: input, shape index: {}]   ;;  %s2188_s2 = inlined_call_operand.vmem [shape: bf16[120,8], index: 2, kind: input, shape index: {}]   ;;  %s2189_s3 = inlined_call_operand.vmem [shape: f32[8,51], index: 3, kind: input, shape index: {}]   ;;  %s2190_s1 = inlined_call_operand.vmem [shape: f32[8,48], index: 1, kind: input, shape index: {}]   ;;  %s2191_s4 = inlined_call_operand.vmem [shape: f32[32,48], index: 4, kind: output, shape index: {}]  }
   0x1   :  { %v44_v0 = vld [vmem:[%s2187_s0] sm:$0xff]  ;;  %1453 = vset.pattern.permute.xlu2 %v1545_v6  ;;  %v1546_v12 = vmov 2   ;;  %v1547_v15 = vmov 0   ;;  %v18_v21 = vlaneseq  ;;  %s1548_s0 = smov 127   ;;  %vm163_vm13 = vcmask 384000   ;;  %s1557_s30 = smov 2  }
   0x2   :  { %v45_v1 = vmax.f32 %v44_v0, 0.0  ;;  %v28_v4 = vld [vmem:[%s2188_s2] sm:$0xf]  ;;  %1454 = vset.pattern.permute.xlu0 %v1546_v12  ;;  %1452 = vset.pattern.permute.xlu1 %v1547_v15  ;;  %v29_v40 = vld [vmem:[%s2188_s2 + $0x4] sm:$0xf]  ;;  %vm146_vm14 = vcmask 7168  }
   0x3   :  { %v1639_v5 = vld [vmem:[%s2189_s3] sm:$0xff]  ;;  %v19_v23 = vand.u32 127, %v18_v21  ;;  %v1550_v51 = vmov 0.0   ;;  %v30_v57 = vld [vmem:[%s2188_s2 + $0x8] sm:$0xf]  ;;  %v1551_v58 = vmov 3  }
   0x4   :  { %v46_v2 = vpack.c.bf16 %v45_v1, %v45_v1  ;;  %155 = vperm.xlu2 %1453, %v1639_v5   ;;  %v94_v35 = vld [vmem:[%s2190_s1] sm:$0xff]  ;;  %v1552_v59 = vmov 4   ;;  %s1559_s5 = smov 126   ;;  %s1568_s10 = smov 124  }
   0x5   :  { %vm20_vm3 = vcmp.ge.s32.totalorder %v19_v23, 4  ;;  %vm21_vm4 = vcmp.lt.s32.totalorder %v19_v23, 20  ;;  %vm23_vm5 = vcmp.ge.s32.totalorder %v19_v23, 28  ;;  %vm24_vm6 = vcmp.lt.s32.totalorder %v19_v23, 44 }
   0x6   :  { %v53_v3 = vsel %vm51_vm0, %v46_v2, 0  ;;  %vm22_vm7 = vmand %vm20_vm3, %vm21_vm4  ;;  %v95_v36 = vmax.f32 %v94_v35, 0.0 }
   0x7   :  { %62 = vmatpush.bf16.msra.mxu0 %v53_v3  ;;  %vm25_vm9 = vmand %vm23_vm5, %vm24_vm6 }
   0x8   :  { %vm1645_vm12 = vmor %vm22_vm7, %vm25_vm9  ;;  %v96_v37 = vpack.c.bf16 %v95_v36, %v95_v36 }
   0x9   :  { %v1683_v52 = vsel %vm1645_vm12, 1.0, %v1550_v51 }
   0xa   :  { %1379 = vmatmul.msk.bf16.vlgmr.msra.gmra.mxu0 %vm47_vm1, %v28_v4  ;;  %v101_v38 = vsel %vm51_vm0, %v96_v37, 0 }
   0xb   :  { %110 = vmatpush.bf16.msra.mxu1 %v101_v38 }
   0xc   :  { %1455 = vset.pattern.permute.xlu2 %v1551_v58 }
   0xe   :  { %1380 = vmatmul.msk.bf16.vlgmr.msra.gmra.mxu1 %vm47_vm1, %v29_v40 }
  0x5e   :  { %v156_v39 = vpop.permute.xlu2 %155 }
  0x87   :  { %v64_v7 = vpop.f32.mrf.mxu0 }
  0x88   :  { %v69_v8 = vsel %vm68_vm2, %v64_v7, 0.0  ;;  %v72_v9 = vmul.f32 %v64_v7, %v64_v7 }
  0x89   :  { %70 = vadd.xlane.f32.xlu0 %v69_v8 }
  0x8a   :  { %v73_v11 = vsel %vm68_vm2, %v72_v9, 0.0 }
  0x8b   :  { %v1691_v60 = vpop.f32.mrf.mxu1 }
  0x8c   :  { %v119_v3 = vmul.f32 %v1691_v60, %v1691_v60  ;;  %v116_v4 = vsel %vm68_vm2, %v1691_v60, 0.0 }
  0x8e   :  { %v120_v6 = vsel %vm68_vm2, %v119_v3, 0.0 }
  0x8f   :  { %v66_v10 = vpop.f32.mrf.mxu0 }
  0x91   :  { %74 = vadd.xlane.f32.xlu0 %v73_v11 }
  0x93   :  { %v114_v1 = vpop.f32.mrf.mxu1 }
  0x94   :  { %v31_v1 = vld [vmem:[%s2188_s2 + $0xc] sm:$0xf] }
  0xa5   :  { %166 = vperm.xlu0 %1454, %v1639_v5  }
  0xfc   :  { %v71_v13 = vpop.xlane.xlu0 %70 }
  0xfd   :  { %v76_v14 = vmul.f32 0.03125, %v71_v13 }
  0xff   :  { %v78_v17 = vmul.f32 %v76_v14, %v76_v14  ;;  %v91_v29 = vsub.f32 %v64_v7, %v76_v14  ;;  %v1553_v14 = vmov 5  }
 0x100   :  { %1457 = vset.pattern.permute.xlu0 %v1553_v14 }
 0x104   :  { %v75_v16 = vpop.xlane.xlu0 %74 }
 0x105   :  { %v77_v18 = vmul.f32 0.03125, %v75_v16 }
 0x107   :  { %v79_v19 = vsub.f32 %v77_v18, %v78_v17 }
 0x109   :  { %v80_v20 = vadd.f32 1e-05, %v79_v19 }
 0x10b   :  { %1504 = vrsqrt.f32 %v80_v20  ;;  %vm87_vm10 = vweird.f32 %v80_v20 }
 0x111   :  { %v1505_v22 = vpop.eup %1504 }
 0x112   :  { %v82_v24 = vmul.f32 %v1505_v22, %v80_v20  ;;  %vm88_vm8 = vweird.f32 %v1505_v22 }
 0x113   :  { %vm89_vm11 = vmor %vm87_vm10, %vm88_vm8 }
 0x114   :  { %v83_v25 = vmul.f32 %v1505_v22, %v82_v24 }
 0x116   :  { %v84_v26 = vmul.f32 0.5, %v83_v25 }
 0x117   :  { %v167_v44 = vpop.permute.xlu0 %166 }
 0x118   :  { %v85_v27 = vsub.f32 1.5, %v84_v26 }
 0x11a   :  { %v86_v28 = vmul.f32 %v1505_v22, %v85_v27 }
 0x11c   :  { %v90_v31 = vsel %vm89_vm11, %v1505_v22, %v86_v28 }
 0x11d   :  { %v1649_v32 = vmul.f32 %v91_v29, %v90_v31 }
 0x11f   :  { %v1654_v33 = vsel %vm1645_vm12, %v1649_v32, 0.0 }
 0x120   :  { %v1657_v34 = vmax.f32 %v1654_v33, 0.0 }
 0x122   :  { %160 = vrot.lane.b32.xlu2 %v1657_v34, %s1548_s0  ;;  %143 = vrot.lane.b32.xlu1 %v1657_v34, %s1549_s21  ;;  %v158_v47 = vmul.f32 %v156_v39, %v1657_v34 }
 0x12a   :  { %150 = vperm.xlu1 %1452, %v1639_v5  }
 0x132   :  { %1456 = vset.pattern.permute.xlu1 %v1552_v59 }
 0x17c   :  { %v161_v42 = vpop.permute.xlu2 %160 }
 0x17d   :  { %v1673_v43 = vsel %vm163_vm13, %v161_v42, 0.0 }
 0x17e   :  { %v169_v49 = vmul.f32 %v167_v44, %v1673_v43 }
 0x194   :  { %v144_v41 = vpop.permute.xlu1 %143 }
 0x195   :  { %v1676_v45 = vsel %vm146_vm14, 0.0, %v144_v41 }
 0x19c   :  { %v151_v46 = vpop.permute.xlu1 %150 }
 0x19d   :  { %v153_v48 = vmul.f32 %v151_v46, %v1676_v45 }
 0x19f   :  { %v159_v50 = vadd.f32 %v158_v47, %v153_v48 }
 0x1a1   :  { %v170_v53 = vadd.f32 %v169_v49, %v159_v50 }
 0x1a3   :  { %v171_v54 = vmul.f32 %v170_v53, %v1683_v52 }
 0x1a5   :  { %v172_v55 = vpack.c.bf16 %v171_v54, %v171_v54 }
 0x1a7   :  { %v177_v56 = vsel %vm51_vm0, %v172_v55, 0 }
 0x1a8   :  { %186 = vmatpush.bf16.msra.mxu2 %v177_v56 }
 0x1ab   :  { %1381 = vmatmul.msk.bf16.vlgmr.msra.gmra.mxu2 %vm47_vm1, %v30_v57 }
 0x22e   :  { %v188_v61 = vpop.f32.mrf.mxu2 }
 0x22f   :  { %v192_v62 = vsel %vm68_vm2, %v188_v61, 0.0  ;;  %v195_v63 = vmul.f32 %v188_v61, %v188_v61 }
 0x230   :  { %193 = vadd.xlane.f32.xlu1 %v192_v62 }
 0x231   :  { %v196_v0 = vsel %vm68_vm2, %v195_v63, 0.0 }
 0x232   :  { %197 = vadd.xlane.f32.xlu2 %v196_v0 }
 0x236   :  { %v190_v2 = vpop.f32.mrf.mxu2 }
 0x249   :  { %229 = vperm.xlu1 %1456, %v1639_v5  }
 0x24a   :  { %224 = vperm.xlu2 %1455, %v1639_v5  }
 0x273   :  { %117 = vadd.xlane.f32.xlu2 %v116_v4  ;;  %121 = vadd.xlane.f32.xlu1 %v120_v6 }
 0x2a3   :  { %v194_v7 = vpop.xlane.xlu1 %193 }
 0x2a4   :  { %v199_v8 = vmul.f32 0.03125, %v194_v7 }
 0x2a5   :  { %v198_v9 = vpop.xlane.xlu2 %197 }
 0x2a6   :  { %v201_v10 = vmul.f32 %v199_v8, %v199_v8  ;;  %v200_v11 = vmul.f32 0.03125, %v198_v9  ;;  %v214_v21 = vsub.f32 %v188_v61, %v199_v8 }
 0x2a8   :  { %v202_v12 = vsub.f32 %v200_v11, %v201_v10 }
 0x2aa   :  { %v203_v13 = vadd.f32 1e-05, %v202_v12 }
 0x2ac   :  { %1506 = vrsqrt.f32 %v203_v13  ;;  %vm210_vm3 = vweird.f32 %v203_v13 }
 0x2ad   :  { %v225_v28 = vpop.permute.xlu2 %224 }
 0x2b2   :  { %v1507_v15 = vpop.eup %1506 }
 0x2b3   :  { %v205_v16 = vmul.f32 %v1507_v15, %v203_v13  ;;  %vm211_vm15 = vweird.f32 %v1507_v15  ;;  %v1554_v13 = vmov 12  }
 0x2b4   :  { %vm212_vm4 = vmor %vm210_vm3, %vm211_vm15 }
 0x2b5   :  { %v206_v17 = vmul.f32 %v1507_v15, %v205_v16 }
 0x2b7   :  { %v207_v18 = vmul.f32 0.5, %v206_v17 }
 0x2b9   :  { %v208_v19 = vsub.f32 1.5, %v207_v18 }
 0x2bb   :  { %v209_v20 = vmul.f32 %v1507_v15, %v208_v19  ;;  %v230_v25 = vpop.permute.xlu1 %229 }
 0x2bd   :  { %v213_v22 = vsel %vm212_vm4, %v1507_v15, %v209_v20 }
 0x2be   :  { %v215_v23 = vmul.f32 %v214_v21, %v213_v22  ;;  %v1556_v21 = vmov 7   ;;  %v1558_v22 = vmov 15  }
 0x2c0   :  { %v216_v24 = vsel %vm1645_vm12, %v215_v23, 0.0 }
 0x2c1   :  { %v217_v26 = vmax.f32 %v216_v24, 0.0 }
 0x2c3   :  { %v232_v27 = vmul.f32 %v230_v25, %v217_v26  ;;  %219 = vrot.lane.b32.xlu0 %v217_v26, %s1549_s21 }
 0x2cb   :  { %234 = vrot.lane.b32.xlu0 %v217_v26, %s1548_s0 }
 0x2d3   :  { %239 = vperm.xlu0 %1457, %v1639_v5  }
 0x2db   :  { %1459 = vset.pattern.permute.xlu0 %v1554_v13 }
 0x2e6   :  { %v118_v29 = vpop.xlane.xlu2 %117  ;;  %v122_v31 = vpop.xlane.xlu1 %121 }
 0x2e7   :  { %v123_v35 = vmul.f32 0.03125, %v118_v29  ;;  %v124_v36 = vmul.f32 0.03125, %v122_v31 }
 0x2e9   :  { %v125_v37 = vmul.f32 %v123_v35, %v123_v35  ;;  %v138_v48 = vsub.f32 %v1691_v60, %v123_v35 }
 0x2eb   :  { %v126_v38 = vsub.f32 %v124_v36, %v125_v37 }
 0x2ed   :  { %v127_v39 = vadd.f32 1e-05, %v126_v38 }
 0x2ef   :  { %1508 = vrsqrt.f32 %v127_v39  ;;  %vm134_vm5 = vweird.f32 %v127_v39 }
 0x2f5   :  { %v1509_v40 = vpop.eup %1508 }
 0x2f6   :  { %v129_v41 = vmul.f32 %v1509_v40, %v127_v39  ;;  %vm135_vm6 = vweird.f32 %v1509_v40 }
 0x2f7   :  { %vm136_vm7 = vmor %vm134_vm5, %vm135_vm6 }
 0x2f8   :  { %v130_v42 = vmul.f32 %v1509_v40, %v129_v41 }
 0x2fa   :  { %v131_v44 = vmul.f32 0.5, %v130_v42 }
 0x2fc   :  { %v132_v46 = vsub.f32 1.5, %v131_v44 }
 0x2fe   :  { %v133_v47 = vmul.f32 %v1509_v40, %v132_v46 }
 0x300   :  { %v137_v49 = vsel %vm136_vm7, %v1509_v40, %v133_v47  ;;  %vm2193_vm7 = vcmask 31744  }
 0x301   :  { %v139_v50 = vmul.f32 %v138_v48, %v137_v49 }
 0x303   :  { %v291_v51 = vsel %vm1645_vm12, %v139_v50, -1e+30  ;;  %v1741_v19 = vsel %vm1645_vm12, %v139_v50, 0.0 }
 0x304   :  { %293 = vrot.lane.b32.xlu0 %v291_v51, %s1549_s21  ;;  %v1744_v20 = vmax.f32 %v1741_v19, 0.0 }
 0x30c   :  { %298 = vrot.lane.b32.xlu0 %v291_v51, %s1548_s0 }
 0x335   :  { %v220_v53 = vpop.permute.xlu0 %219 }
 0x336   :  { %v222_v55 = vsel %vm146_vm14, 0.0, %v220_v53 }
 0x337   :  { %v227_v56 = vmul.f32 %v225_v28, %v222_v55 }
 0x339   :  { %v233_v59 = vadd.f32 %v232_v27, %v227_v56 }
 0x33d   :  { %v235_v54 = vpop.permute.xlu0 %234 }
 0x33e   :  { %v237_v57 = vsel %vm163_vm13, %v235_v54, 0.0  ;;  %v1560_v54 = vmov 11  }
 0x33f   :  { %1458 = vset.pattern.permute.xlu2 %v1560_v54 }
 0x345   :  { %v240_v58 = vpop.permute.xlu0 %239 }
 0x346   :  { %v242_v61 = vmul.f32 %v240_v58, %v237_v57 }
 0x348   :  { %v243_v60 = vadd.f32 %v242_v61, %v233_v59 }
 0x34a   :  { %v244_v62 = vmul.f32 %v243_v60, %v1683_v52 }
 0x34c   :  { %v245_v63 = vpack.c.bf16 %v244_v62, %v244_v62 }
 0x34e   :  { %v250_v0 = vsel %vm51_vm0, %v245_v63, 0 }
 0x34f   :  { %259 = vmatpush.bf16.msra.mxu3 %v250_v0 }
 0x352   :  { %1382 = vmatmul.msk.bf16.vlgmr.msra.gmra.mxu3 %vm47_vm1, %v31_v1 }
 0x376   :  { %v294_v2 = vpop.permute.xlu0 %293 }
 0x377   :  { %v296_v3 = vsel %vm146_vm14, 0.0, %v294_v2  ;;  %v1561_v2 = vmov 13  }
 0x378   :  { %v297_v4 = vmax.f32 %v296_v3, %v291_v51 }
 0x37e   :  { %v299_v6 = vpop.permute.xlu0 %298 }
 0x37f   :  { %v301_v7 = vsel %vm163_vm13, %v299_v6, 0.0 }
 0x380   :  { %v302_v8 = vmax.f32 %v297_v4, %v301_v7 }
 0x382   :  { %v1724_v9 = vsel %vm1645_vm12, %v302_v8, 0.0 }
 0x383   :  { %v304_v10 = vsel %vm68_vm2, %v1724_v9, 0.0  ;;  %v307_v11 = vmul.f32 %v1724_v9, %v1724_v9 }
 0x384   :  { %305 = vadd.xlane.f32.xlu2 %v304_v10 }
 0x385   :  { %v308_v12 = vsel %vm68_vm2, %v307_v11, 0.0 }
 0x38c   :  { %309 = vadd.xlane.f32.xlu2 %v308_v12 }
 0x3a4   :  { %502 = vperm.xlu2 %1458, %v1639_v5  }
 0x3ac   :  { %1460 = vset.pattern.permute.xlu2 %v1561_v2 }
 0x3ad   :  { %517 = vperm.xlu2 %1460, %v1639_v5  }
 0x3d5   :  { %v1731_v14 = vpop.f32.mrf.mxu3 }
 0x3d6   :  { %v265_v15 = vsel %vm68_vm2, %v1731_v14, 0.0  ;;  %v268_v16 = vmul.f32 %v1731_v14, %v1731_v14 }
 0x3d7   :  { %266 = vadd.xlane.f32.xlu0 %v265_v15 }
 0x3d8   :  { %v269_v17 = vsel %vm68_vm2, %v268_v16, 0.0 }
 0x3d9   :  { %270 = vadd.xlane.f32.xlu1 %v269_v17 }
 0x3dd   :  { %v263_v18 = vpop.f32.mrf.mxu3 }
 0x3eb   :  { %507 = vperm.xlu0 %1459, %v1639_v5  }
 0x3f3   :  { %399 = vrot.lane.b32.xlu0 %v1744_v20, %s1555_s29 }
 0x3f4   :  { %1462 = vset.pattern.permute.xlu0 %v1556_v21 }
 0x3f7   :  { %v306_v23 = vpop.xlane.xlu2 %305 }
 0x3f8   :  { %v311_v25 = vmul.f32 0.03125, %v306_v23  ;;  %v1562_v23 = vmov 6  }
 0x3f9   :  { %1461 = vset.pattern.permute.xlu1 %v1562_v23 }
 0x3fa   :  { %v313_v27 = vmul.f32 %v311_v25, %v311_v25  ;;  %v326_v57 = vsub.f32 %v1724_v9, %v311_v25 }
 0x3fb   :  { %409 = vrot.lane.b32.xlu0 %v1744_v20, %s1557_s30 }
 0x3ff   :  { %v310_v24 = vpop.xlane.xlu2 %309 }
 0x400   :  { %v312_v26 = vmul.f32 0.03125, %v310_v24  ;;  %v1563_v24 = vmov 14  }
 0x401   :  { %1463 = vset.pattern.permute.xlu2 %v1563_v24 }
 0x402   :  { %v314_v28 = vsub.f32 %v312_v26, %v313_v27 }
 0x403   :  { %415 = vperm.xlu0 %1462, %v1639_v5  }
 0x404   :  { %v315_v29 = vadd.f32 1e-05, %v314_v28 }
 0x406   :  { %1510 = vrsqrt.f32 %v315_v29  ;;  %vm322_vm9 = vweird.f32 %v315_v29 }
 0x407   :  { %v503_v4 = vpop.permute.xlu2 %502 }
 0x40b   :  { %1464 = vset.pattern.permute.xlu0 %v1558_v22  ;;  %v33_v22 = vld [vmem:[%s2188_s2 + $0x14] sm:$0xf] }
 0x40c   :  { %580 = vperm.xlu0 %1464, %v1639_v5   ;;  %v1511_v31 = vpop.eup %1510 }
 0x40d   :  { %v317_v37 = vmul.f32 %v1511_v31, %v315_v29  ;;  %vm323_vm8 = vweird.f32 %v1511_v31 }
 0x40e   :  { %vm324_vm10 = vmor %vm322_vm9, %vm323_vm8  ;;  %vm412_vm8 = vcmask 15360   ;;  %vm2194_vm9 = vcmask 375808  }
 0x40f   :  { %v318_v42 = vmul.f32 %v1511_v31, %v317_v37  ;;  %v518_v10 = vpop.permute.xlu2 %517 }
 0x411   :  { %v319_v46 = vmul.f32 0.5, %v318_v42 }
 0x413   :  { %v320_v47 = vsub.f32 1.5, %v319_v46 }
 0x414   :  { %426 = vrot.lane.b32.xlu0 %v1744_v20, %s1559_s5 }
 0x415   :  { %v321_v50 = vmul.f32 %v1511_v31, %v320_v47 }
 0x417   :  { %v325_v55 = vsel %vm324_vm10, %v1511_v31, %v321_v50  ;;  %v1564_v31 = vmov 8   ;;  %vm2192_vm10 = vcmask 359424  }
 0x418   :  { %v327_v59 = vmul.f32 %v326_v57, %v325_v55 }
 0x41a   :  { %v328_v63 = vsel %vm1645_vm12, %v327_v59, 0.0 }
 0x44a   :  { %v267_v35 = vpop.xlane.xlu0 %266 }
 0x44b   :  { %v272_v36 = vmul.f32 0.03125, %v267_v35  ;;  %v1565_v35 = vmov 9  }
 0x44c   :  { %v271_v38 = vpop.xlane.xlu1 %270 }
 0x44d   :  { %v274_v39 = vmul.f32 %v272_v36, %v272_v36  ;;  %v273_v40 = vmul.f32 0.03125, %v271_v38  ;;  %v287_v61 = vsub.f32 %v1731_v14, %v272_v36  ;;  %v1566_v36 = vmov 16  }
 0x44f   :  { %v275_v41 = vsub.f32 %v273_v40, %v274_v39 }
 0x451   :  { %v276_v44 = vadd.f32 1e-05, %v275_v41 }
 0x453   :  { %1512 = vrsqrt.f32 %v276_v44  ;;  %vm283_vm15 = vweird.f32 %v276_v44 }
 0x459   :  { %v1513_v48 = vpop.eup %1512 }
 0x45a   :  { %v278_v49 = vmul.f32 %v1513_v48, %v276_v44  ;;  %vm284_vm11 = vweird.f32 %v1513_v48  ;;  %v1567_v44 = vmov 10  }
 0x45b   :  { %vm285_vm3 = vmor %vm283_vm15, %vm284_vm11  ;;  %1468 = vset.pattern.permute.xlu0 %v1567_v44  ;;  %v34_v44 = vld [vmem:[%s2188_s2 + $0x18] sm:$0xf] }
 0x45c   :  { %v279_v51 = vmul.f32 %v1513_v48, %v278_v49 }
 0x45d   :  { %v508_v9 = vpop.permute.xlu0 %507 }
 0x45e   :  { %v280_v53 = vmul.f32 0.5, %v279_v51 }
 0x460   :  { %v281_v56 = vsub.f32 1.5, %v280_v53 }
 0x462   :  { %v282_v58 = vmul.f32 %v1513_v48, %v281_v56 }
 0x464   :  { %v286_v60 = vsel %vm285_vm3, %v1513_v48, %v282_v58 }
 0x465   :  { %v288_v62 = vmul.f32 %v287_v61, %v286_v60  ;;  %v400_v59 = vpop.permute.xlu0 %399 }
 0x467   :  { %v289_v0 = vsel %vm1645_vm12, %v288_v62, 0.0 }
 0x468   :  { %v1761_v1 = vadd.f32 %v328_v63, %v289_v0 }
 0x46a   :  { %v1765_v3 = vmax.f32 %v1761_v1, 0.0  ;;  %1371 = vst.msk [vmem:[%s2191_s4] sm:$0xff] %vm68_vm2, %v1761_v1 }
 0x46c   :  { %497 = vrot.lane.b32.xlu1 %v1765_v3, %s1549_s21  ;;  %v510_v11 = vmul.f32 %v508_v9, %v1765_v3 }
 0x46d   :  { %v410_v61 = vpop.permute.xlu0 %409 }
 0x46e   :  { %v1809_v9 = vsel %vm412_vm8, 0.0, %v410_v61 }
 0x474   :  { %512 = vrot.lane.b32.xlu1 %v1765_v3, %s1548_s0 }
 0x475   :  { %v416_v60 = vpop.permute.xlu0 %415 }
 0x47e   :  { %v581_v63 = vpop.permute.xlu0 %580 }
 0x4de   :  { %v498_v6 = vpop.permute.xlu1 %497 }
 0x4df   :  { %v500_v7 = vsel %vm146_vm14, 0.0, %v498_v6  ;;  %v427_v6 = vpop.permute.xlu0 %426 }
 0x4e0   :  { %v505_v8 = vmul.f32 %v503_v4, %v500_v7  ;;  %v403_v7 = vsel %vm2193_vm7, 0.0, %v400_v59 }
 0x4e2   :  { %v511_v14 = vadd.f32 %v510_v11, %v505_v8  ;;  %v418_v11 = vmul.f32 %v416_v60, %v1809_v9 }
 0x4e6   :  { %v513_v12 = vpop.permute.xlu1 %512 }
 0x4e7   :  { %v515_v13 = vsel %vm163_vm13, %v513_v12, 0.0 }
 0x4e8   :  { %v520_v15 = vmul.f32 %v518_v10, %v515_v13 }
 0x4ea   :  { %v521_v16 = vadd.f32 %v520_v15, %v511_v14 }
 0x4ec   :  { %v522_v17 = vmul.f32 %v521_v16, %v1683_v52 }
 0x4ee   :  { %v523_v18 = vpack.c.bf16 %v522_v17, %v522_v17 }
 0x4f0   :  { %v528_v21 = vsel %vm51_vm0, %v523_v18, 0 }
 0x4f1   :  { %537 = vmatpush.bf16.msrb.mxu1 %v528_v21 }
 0x4f4   :  { %1384 = vmatmul.msk.bf16.vlgmr.msrb.gmra.mxu1 %vm47_vm1, %v33_v22 }
 0x571   :  { %v539_v25 = vpop.f32.mrf.mxu1 }
 0x572   :  { %v543_v26 = vsel %vm68_vm2, %v539_v25, 0.0  ;;  %v546_v27 = vmul.f32 %v539_v25, %v539_v25 }
 0x573   :  { %544 = vadd.xlane.f32.xlu1 %v543_v26  ;;  %v1816_v26 = vsel %vm2194_vm9, %v427_v6, 0.0 }
 0x574   :  { %v547_v28 = vsel %vm68_vm2, %v546_v27, 0.0 }
 0x575   :  { %548 = vadd.xlane.f32.xlu2 %v547_v28 }
 0x579   :  { %v541_v29 = vpop.f32.mrf.mxu1 }
 0x58c   :  { %405 = vperm.xlu1 %1461, %v1639_v5  }
 0x58d   :  { %575 = vperm.xlu2 %1463, %v1639_v5  }
 0x594   :  { %1466 = vset.pattern.permute.xlu1 %v1566_v36 }
 0x595   :  { %1465 = vset.pattern.permute.xlu2 %v1564_v31  ;;  %590 = vperm.xlu1 %1466, %v1639_v5  }
 0x596   :  { %421 = vperm.xlu2 %1465, %v1639_v5  }
 0x59e   :  { %1467 = vset.pattern.permute.xlu2 %v1565_v35 }
 0x59f   :  { %432 = vperm.xlu2 %1467, %v1639_v5  }
 0x5a7   :  { %342 = vrot.lane.b32.xlu2 %v1683_v52, %s1549_s21 }
 0x5af   :  { %331 = vrot.lane.b32.xlu2 %v1654_v33, %s1549_s21 }
 0x5e6   :  { %v545_v37 = vpop.xlane.xlu1 %544 }
 0x5e7   :  { %v550_v38 = vmul.f32 0.03125, %v545_v37 }
 0x5e8   :  { %v549_v39 = vpop.xlane.xlu2 %548 }
 0x5e9   :  { %v552_v40 = vmul.f32 %v550_v38, %v550_v38  ;;  %v551_v41 = vmul.f32 0.03125, %v549_v39  ;;  %v565_v54 = vsub.f32 %v539_v25, %v550_v38 }
 0x5eb   :  { %v553_v42 = vsub.f32 %v551_v41, %v552_v40 }
 0x5ed   :  { %v554_v46 = vadd.f32 1e-05, %v553_v42 }
 0x5ef   :  { %1514 = vrsqrt.f32 %v554_v46  ;;  %vm561_vm5 = vweird.f32 %v554_v46 }
 0x5f0   :  { %v576_v62 = vpop.permute.xlu2 %575 }
 0x5f5   :  { %v1515_v47 = vpop.eup %1514 }
 0x5f6   :  { %v556_v48 = vmul.f32 %v1515_v47, %v554_v46  ;;  %vm562_vm4 = vweird.f32 %v1515_v47 }
 0x5f7   :  { %vm563_vm6 = vmor %vm561_vm5, %vm562_vm4 }
 0x5f8   :  { %v557_v49 = vmul.f32 %v1515_v47, %v556_v48  ;;  %v422_v2 = vpop.permute.xlu2 %421  ;;  %v1569_v48 = vmov 17  }
 0x5f9   :  { %v424_v21 = vmul.f32 %v422_v2, %v1744_v20  ;;  %1469 = vset.pattern.permute.xlu2 %v1569_v48  ;;  %v1582_v48 = vmov 38  }
 0x5fa   :  { %v558_v50 = vmul.f32 0.5, %v557_v49 }
 0x5fc   :  { %v559_v51 = vsub.f32 1.5, %v558_v50 }
 0x5fe   :  { %v560_v53 = vmul.f32 %v1515_v47, %v559_v51  ;;  %v406_v0 = vpop.permute.xlu1 %405 }
 0x5ff   :  { %v408_v8 = vmul.f32 %v406_v0, %v403_v7 }
 0x600   :  { %v564_v55 = vsel %vm563_vm6, %v1515_v47, %v560_v53  ;;  %v433_v10 = vpop.permute.xlu2 %432 }
 0x601   :  { %v566_v56 = vmul.f32 %v565_v54, %v564_v55  ;;  %v419_v16 = vadd.f32 %v418_v11, %v408_v8  ;;  %v435_v27 = vmul.f32 %v433_v10, %v1816_v26  ;;  %v32_v55 = vld [vmem:[%s2188_s2 + $0x10] sm:$0xf] }
 0x603   :  { %v567_v57 = vsel %vm1645_vm12, %v566_v56, 0.0  ;;  %v425_v24 = vadd.f32 %v424_v21, %v419_v16  ;;  %v1572_v21 = vmov 18  }
 0x604   :  { %v568_v58 = vmax.f32 %v567_v57, 0.0  ;;  %1470 = vset.pattern.permute.xlu1 %v1572_v21 }
 0x605   :  { %v436_v36 = vadd.f32 %v435_v27, %v425_v24 }
 0x606   :  { %585 = vrot.lane.b32.xlu1 %v568_v58, %s1548_s0  ;;  %570 = vrot.lane.b32.xlu0 %v568_v58, %s1549_s21  ;;  %v583_v18 = vmul.f32 %v581_v63, %v568_v58 }
 0x607   :  { %v591_v4 = vpop.permute.xlu1 %590 }
 0x608   :  { %v343_v37 = vpop.permute.xlu2 %342 }
 0x609   :  { %v345_v40 = vsel %vm146_vm14, 0.0, %v343_v37  ;;  %v1575_v37 = vmov 36  }
 0x60a   :  { %v346_v46 = vadd.f32 %v345_v40, %v1683_v52  ;;  %v1578_v40 = vmov 28  }
 0x60e   :  { %437 = vrot.lane.b32.xlu1 %v1744_v20, %s1568_s10  ;;  %443 = vperm.xlu0 %1468, %v1639_v5  }
 0x610   :  { %v332_v58 = vpop.permute.xlu2 %331 }
 0x611   :  { %v334_v0 = vsel %vm146_vm14, 0.0, %v332_v58 }
 0x612   :  { %v335_v7 = vadd.f32 %v334_v0, %v1654_v33 }
 0x616   :  { %347 = vrot.lane.b32.xlu1 %v1683_v52, %s1548_s0 }
 0x61e   :  { %336 = vrot.lane.b32.xlu1 %v1654_v33, %s1548_s0 }
 0x678   :  { %v571_v12 = vpop.permute.xlu0 %570  ;;  %v586_v13 = vpop.permute.xlu1 %585 }
 0x679   :  { %v573_v14 = vsel %vm146_vm14, 0.0, %v571_v12  ;;  %v588_v15 = vsel %vm163_vm13, %v586_v13, 0.0 }
 0x67a   :  { %v578_v17 = vmul.f32 %v576_v62, %v573_v14  ;;  %v593_v23 = vmul.f32 %v591_v4, %v588_v15 }
 0x67c   :  { %v584_v22 = vadd.f32 %v583_v18, %v578_v17  ;;  %v1570_v17 = vmov 20   ;;  %v1571_v18 = vmov 21  }
 0x67e   :  { %v594_v25 = vadd.f32 %v593_v23, %v584_v22  ;;  %v1573_v22 = vmov 19  }
 0x67f   :  { %1471 = vset.pattern.permute.xlu0 %v1573_v22 }
 0x680   :  { %v438_v28 = vpop.permute.xlu1 %437  ;;  %v444_v29 = vpop.permute.xlu0 %443  ;;  %v595_v31 = vmul.f32 %v594_v25, %v1683_v52 }
 0x681   :  { %v441_v35 = vsel %vm2192_vm10, %v438_v28, 0.0 }
 0x682   :  { %v446_v38 = vmul.f32 %v444_v29, %v441_v35  ;;  %v596_v39 = vpack.c.bf16 %v595_v31, %v595_v31  ;;  %v1574_v29 = vmov 29  }
 0x684   :  { %v447_v41 = vadd.f32 %v446_v38, %v436_v36  ;;  %v601_v42 = vsel %vm51_vm0, %v596_v39, 0  ;;  %v1576_v38 = vmov 27   ;;  %v1577_v39 = vmov 39  }
 0x685   :  { %610 = vmatpush.bf16.msrb.mxu2 %v601_v42 }
 0x686   :  { %v448_v47 = vmul.f32 %v447_v41, %v1683_v52  ;;  %v1579_v41 = vmov 37  }
 0x688   :  { %1385 = vmatmul.msk.bf16.vlgmr.msrb.gmra.mxu2 %vm47_vm1, %v34_v44  ;;  %v348_v49 = vpop.permute.xlu1 %347  ;;  %v449_v50 = vpack.c.bf16 %v448_v47, %v448_v47  ;;  %v1580_v44 = vmov 46   ;;  %v1581_v47 = vmov 35  }
 0x689   :  { %v350_v51 = vsel %vm163_vm13, %v348_v49, 0.0 }
 0x68a   :  { %v351_v53 = vadd.f32 %v350_v51, %v346_v46  ;;  %v454_v54 = vsel %vm51_vm0, %v449_v50, 0 }
 0x68b   :  { %463 = vmatpush.bf16.msrb.mxu0 %v454_v54 }
 0x68c   :  { %v352_v56 = vmax.f32 %v351_v53, 1.0 }
 0x68e   :  { %1516 = vrcp.f32 %v352_v56  ;;  %1383 = vmatmul.msk.bf16.vlgmr.msrb.gmra.mxu0 %vm47_vm1, %v32_v55  ;;  %v364_v61 = vand.u32 2147483648, %v352_v56  ;;  %vm358_vm11 = vweird.f32 %v352_v56  ;;  %v362_v62 = vand.u32 2147483647, %v352_v56 }
 0x690   :  { %v337_v63 = vpop.permute.xlu1 %336  ;;  %v365_v4 = vor.u32 1.1754944e-38, %v364_v61  ;;  %vm363_vm4 = vcmp.eq.f32.partialorder %v362_v62, 8.507059e+37 }
 0x691   :  { %v339_v6 = vsel %vm163_vm13, %v337_v63, 0.0 }
 0x692   :  { %v340_v11 = vadd.f32 %v339_v6, %v335_v7 }
 0x694   :  { %v1517_v57 = vpop.eup %1516 }
 0x695   :  { %v354_v59 = vmul.f32 %v1517_v57, %v352_v56  ;;  %vm359_vm15 = vweird.f32 %v1517_v57 }
 0x696   :  { %vm360_vm3 = vmor %vm358_vm11, %vm359_vm15 }
 0x697   :  { %v355_v60 = vsub.f32 1.0, %v354_v59 }
 0x699   :  { %v356_v2 = vmul.f32 %v1517_v57, %v355_v60 }
 0x69b   :  { %v357_v8 = vadd.f32 %v1517_v57, %v356_v2 }
 0x69d   :  { %v361_v10 = vsel %vm360_vm3, %v1517_v57, %v357_v8 }
 0x69e   :  { %v1838_v12 = vsel %vm363_vm4, %v365_v4, %v361_v10 }
 0x69f   :  { %v368_v13 = vmul.f32 %v1838_v12, %v340_v11 }
 0x6a1   :  { %v1842_v14 = vmul.f32 %v368_v13, %v1683_v52 }
 0x6a3   :  { %v370_v15 = vsel %vm68_vm2, %v1842_v14, 0.0  ;;  %v373_v16 = vmul.f32 %v1842_v14, %v1842_v14 }
 0x6a4   :  { %371 = vadd.xlane.f32.xlu0 %v370_v15 }
 0x6a5   :  { %v374_v33 = vsel %vm68_vm2, %v373_v16, 0.0  ;;  %v35_v16 = vld [vmem:[%s2188_s2 + $0x1c] sm:$0xf] }
 0x6a6   :  { %375 = vadd.xlane.f32.xlu2 %v374_v33 }
 0x6be   :  { %647 = vperm.xlu2 %1469, %v1639_v5  }
 0x6c6   :  { %1472 = vset.pattern.permute.xlu2 %v1570_v17 }
 0x6c7   :  { %664 = vperm.xlu2 %1472, %v1639_v5  }
 0x6cf   :  { %1473 = vset.pattern.permute.xlu2 %v1571_v18 }
 0x6d0   :  { %674 = vperm.xlu2 %1473, %v1639_v5  }
 0x6d8   :  { %1476 = vset.pattern.permute.xlu2 %v1574_v29 }
 0x70b   :  { %v1852_v23 = vpop.f32.mrf.mxu0  ;;  %v1854_v24 = vpop.f32.mrf.mxu2 }
 0x70c   :  { %v616_v25 = vsel %vm68_vm2, %v1854_v24, 0.0  ;;  %v469_v27 = vsel %vm68_vm2, %v1852_v23, 0.0  ;;  %v472_v28 = vmul.f32 %v1852_v23, %v1852_v23  ;;  %v619_v42 = vmul.f32 %v1854_v24, %v1854_v24 }
 0x70d   :  { %617 = vadd.xlane.f32.xlu2 %v616_v25  ;;  %470 = vadd.xlane.f32.xlu1 %v469_v27 }
 0x70e   :  { %v473_v31 = vsel %vm68_vm2, %v472_v28, 0.0  ;;  %v620_v46 = vsel %vm68_vm2, %v619_v42, 0.0 }
 0x70f   :  { %474 = vadd.xlane.f32.xlu0 %v473_v31 }
 0x713   :  { %v467_v35 = vpop.f32.mrf.mxu0  ;;  %v614_v36 = vpop.f32.mrf.mxu2 }
 0x717   :  { %v372_v49 = vpop.xlane.xlu0 %371 }
 0x718   :  { %v377_v33 = vmul.f32 0.03125, %v372_v49 }
 0x719   :  { %v376_v50 = vpop.xlane.xlu2 %375 }
 0x71a   :  { %v379_v18 = vmul.f32 %v377_v33, %v377_v33  ;;  %v378_v21 = vmul.f32 0.03125, %v376_v50 }
 0x71c   :  { %v380_v27 = vsub.f32 %v378_v21, %v379_v18  ;;  %v1915_v21 = vld [vmem:[%s2189_s3] sm:$0xff] }
 0x71e   :  { %v381_v29 = vadd.f32 1e-05, %v380_v27 }
 0x720   :  { %1518 = vrsqrt.f32 %v381_v29  ;;  %vm388_vm6 = vweird.f32 %v381_v29 }
 0x721   :  { %v648_v53 = vpop.permute.xlu2 %647 }
 0x723   :  { %642 = vrot.lane.b32.xlu0 %v1657_v34, %s1557_s30 }
 0x725   :  { %870 = vperm.xlu2 %1476, %v1639_v5  }
 0x726   :  { %652 = vperm.xlu1 %1470, %v1639_v5   ;;  %v1519_v35 = vpop.eup %1518 }
 0x727   :  { %vm389_vm5 = vweird.f32 %v1519_v35 }
 0x728   :  { %vm390_vm15 = vmor %vm388_vm6, %vm389_vm5  ;;  %vm2199_vm5 = vcmask 375808   ;;  %vm2200_vm6 = vcmask 31744  }
 0x729   :  { %v665_v57 = vpop.permute.xlu2 %664 }
 0x72b   :  { %658 = vperm.xlu0 %1471, %v1639_v5  }
 0x72d   :  { %1478 = vset.pattern.permute.xlu2 %v1575_v37  ;;  %v383_v37 = vmul.f32 %v1519_v35, %v381_v29 }
 0x72e   :  { %669 = vrot.lane.b32.xlu1 %v1657_v34, %s1559_s5  ;;  %1059 = vperm.xlu2 %1478, %v1639_v5  }
 0x72f   :  { %1475 = vset.pattern.permute.xlu1 %v1578_v40 }
 0x731   :  { %v675_v4 = vpop.permute.xlu2 %674 }
 0x733   :  { %1474 = vset.pattern.permute.xlu0 %v1576_v38 }
 0x734   :  { %859 = vperm.xlu0 %1474, %v1639_v5  }
 0x736   :  { %1481 = vset.pattern.permute.xlu2 %v1577_v39 }
 0x737   :  { %1077 = vperm.xlu2 %1481, %v1639_v5  }
 0x73c   :  { %1479 = vset.pattern.permute.xlu0 %v1579_v41  ;;  %v384_v41 = vmul.f32 %v1519_v35, %v383_v37 }
 0x73d   :  { %1065 = vperm.xlu0 %1479, %v1639_v5  }
 0x745   :  { %1483 = vset.pattern.permute.xlu0 %v1580_v44 }
 0x746   :  { %1236 = vperm.xlu0 %1483, %v1639_v5  }
 0x758   :  { %621 = vadd.xlane.f32.xlu1 %v620_v46 }
 0x771   :  { %864 = vperm.xlu1 %1475, %v1639_v5  }
 0x779   :  { %1477 = vset.pattern.permute.xlu1 %v1581_v47 }
 0x77a   :  { %1054 = vperm.xlu1 %1477, %v1639_v5  }
 0x780   :  { %v471_v54 = vpop.xlane.xlu1 %470  ;;  %v618_v38 = vpop.xlane.xlu2 %617 }
 0x781   :  { %v476_v17 = vmul.f32 0.03125, %v471_v54  ;;  %v623_v40 = vmul.f32 0.03125, %v618_v38 }
 0x782   :  { %1480 = vset.pattern.permute.xlu1 %v1582_v48  ;;  %v475_v51 = vpop.xlane.xlu0 %474  ;;  %v385_v48 = vmul.f32 0.5, %v384_v41 }
 0x783   :  { %1071 = vperm.xlu1 %1480, %v1639_v5   ;;  %v667_v5 = vmul.f32 %v665_v57, %v1673_v43  ;;  %v478_v22 = vmul.f32 %v476_v17, %v476_v17  ;;  %v477_v25 = vmul.f32 0.03125, %v475_v51  ;;  %v625_v42 = vmul.f32 %v623_v40, %v623_v40 }
 0x785   :  { %v479_v28 = vsub.f32 %v477_v25, %v478_v22 }
 0x787   :  { %v480_v31 = vadd.f32 1e-05, %v479_v28 }
 0x789   :  { %1520 = vrsqrt.f32 %v480_v31  ;;  %vm487_vm3 = vweird.f32 %v480_v31 }
 0x78f   :  { %v1521_v36 = vpop.eup %1520 }
 0x790   :  { %v482_v39 = vmul.f32 %v1521_v36, %v480_v31  ;;  %vm488_vm11 = vweird.f32 %v1521_v36 }
 0x791   :  { %vm489_vm4 = vmor %vm487_vm3, %vm488_vm11 }
 0x792   :  { %v483_v44 = vmul.f32 %v1521_v36, %v482_v39 }
 0x794   :  { %v484_v50 = vmul.f32 0.5, %v483_v44 }
 0x795   :  { %v643_v55 = vpop.permute.xlu0 %642 }
 0x796   :  { %v1882_v58 = vsel %vm412_vm8, 0.0, %v643_v55  ;;  %v485_v54 = vsub.f32 1.5, %v484_v50 }
 0x797   :  { %v650_v61 = vmul.f32 %v648_v53, %v1882_v58  ;;  %v386_v53 = vsub.f32 1.5, %v385_v48 }
 0x798   :  { %v653_v56 = vpop.permute.xlu1 %652 }
 0x799   :  { %v655_v59 = vmul.f32 %v653_v56, %v1676_v45  ;;  %v387_v55 = vmul.f32 %v1519_v35, %v386_v53  ;;  %v486_v56 = vmul.f32 %v1521_v36, %v485_v54 }
 0x79b   :  { %v656_v62 = vadd.f32 %v655_v59, %v650_v61  ;;  %v391_v59 = vsel %vm390_vm15, %v1519_v35, %v387_v55 }
 0x79d   :  { %v659_v60 = vpop.permute.xlu0 %658 }
 0x79e   :  { %v661_v63 = vmul.f32 %v659_v60, %v1657_v34  ;;  %v392_v60 = vsub.f32 %v1842_v14, %v377_v33 }
 0x7a0   :  { %v662_v0 = vadd.f32 %v661_v63, %v656_v62  ;;  %v670_v2 = vpop.permute.xlu1 %669  ;;  %v490_v62 = vsel %vm489_vm4, %v1521_v36, %v486_v56 }
 0x7a1   :  { %v1889_v6 = vsel %vm2194_vm9, %v670_v2, 0.0 }
 0x7a2   :  { %v668_v7 = vadd.f32 %v667_v5, %v662_v0  ;;  %v677_v8 = vmul.f32 %v675_v4, %v1889_v6  ;;  %v393_v5 = vmul.f32 %v392_v60, %v391_v59  ;;  %v491_v0 = vsub.f32 %v1852_v23, %v476_v17 }
 0x7a3   :  { %v1583_v23 = vmov 45  }
 0x7a4   :  { %v678_v10 = vadd.f32 %v677_v8, %v668_v7  ;;  %v492_v4 = vmul.f32 %v491_v0, %v490_v62  ;;  %1482 = vset.pattern.permute.xlu2 %v1583_v23 }
 0x7a5   :  { %1231 = vperm.xlu2 %1482, %v1915_v21  }
 0x7a6   :  { %v679_v11 = vmul.f32 %v678_v10, %v1683_v52  ;;  %v394_v10 = vsel %vm1645_vm12, %v393_v5, 0.0 }
 0x7a7   :  { %v396_v18 = vadd.f32 %v394_v10, %v1741_v19 }
 0x7a8   :  { %v680_v13 = vpack.c.bf16 %v679_v11, %v679_v11  ;;  %v860_v11 = vpop.permute.xlu0 %859 }
 0x7aa   :  { %v685_v15 = vsel %vm51_vm0, %v680_v13, 0  ;;  %v638_v13 = vsub.f32 %v1854_v24, %v623_v40  ;;  %v862_v24 = vmul.f32 %v860_v11, %v1809_v9 }
 0x7ab   :  { %694 = vmatpush.bf16.msrb.mxu3 %v685_v15  ;;  %v493_v15 = vsel %vm1645_vm12, %v492_v4, 0.0 }
 0x7ac   :  { %v494_v27 = vadd.f32 %v493_v15, %v396_v18 }
 0x7ae   :  { %1386 = vmatmul.msk.bf16.vlgmr.msrb.gmra.mxu3 %vm47_vm1, %v35_v16  ;;  %v871_v16 = vpop.permute.xlu2 %870 }
 0x7af   :  { %v873_v28 = vmul.f32 %v871_v16, %v1816_v26 }
 0x7b0   :  { %v1066_v44 = vpop.permute.xlu0 %1065 }
 0x7b6   :  { %v1060_v39 = vpop.permute.xlu2 %1059 }
 0x7b8   :  { %v1237_v0 = vpop.permute.xlu0 %1236 }
 0x7be   :  { %v1078_v48 = vpop.permute.xlu2 %1077 }
 0x7bf   :  { %v1080_v53 = vmul.f32 %v1078_v48, %v1889_v6  ;;  %v1585_v6 = vmov 24  }
 0x7cb   :  { %v622_v46 = vpop.xlane.xlu1 %621 }
 0x7cc   :  { %v624_v47 = vmul.f32 0.03125, %v622_v46 }
 0x7ce   :  { %v626_v49 = vsub.f32 %v624_v47, %v625_v42  ;;  %v1062_v42 = vmul.f32 %v1060_v39, %v1676_v45  ;;  %v1068_v47 = vmul.f32 %v1066_v44, %v1657_v34 }
 0x7d0   :  { %v627_v51 = vadd.f32 1e-05, %v626_v49 }
 0x7d2   :  { %1522 = vrsqrt.f32 %v627_v51  ;;  %vm634_vm10 = vweird.f32 %v627_v51 }
 0x7d8   :  { %v1523_v57 = vpop.eup %1522 }
 0x7d9   :  { %v629_v61 = vmul.f32 %v1523_v57, %v627_v51  ;;  %vm635_vm7 = vweird.f32 %v1523_v57 }
 0x7da   :  { %vm1900_vm9 = vmor %vm634_vm10, %vm635_vm7 }
 0x7db   :  { %v630_v63 = vmul.f32 %v1523_v57, %v629_v61 }
 0x7dd   :  { %v631_v2 = vmul.f32 0.5, %v630_v63 }
 0x7df   :  { %v632_v7 = vsub.f32 1.5, %v631_v2 }
 0x7e1   :  { %v633_v14 = vmul.f32 %v1523_v57, %v632_v7 }
 0x7e3   :  { %v637_v33 = vsel %vm1900_vm9, %v1523_v57, %v633_v14  ;;  %v865_v17 = vpop.permute.xlu1 %864 }
 0x7e4   :  { %v867_v22 = vmul.f32 %v865_v17, %v1744_v20  ;;  %v639_v25 = vmul.f32 %v638_v13, %v637_v33  ;;  %v1584_v20 = vmov 47  }
 0x7e5   :  { %1484 = vset.pattern.permute.xlu2 %v1584_v20 }
 0x7e6   :  { %v868_v29 = vadd.f32 %v867_v22, %v862_v24  ;;  %v640_v31 = vsel %vm1645_vm12, %v639_v25, 0.0  ;;  %1246 = vperm.xlu2 %1484, %v1915_v21   ;;  %v1586_v24 = vmov 22   ;;  %v1587_v22 = vmov 26  }
 0x7e7   :  { %v641_v35 = vadd.f32 %v640_v31, %v494_v27  ;;  %1485 = vset.pattern.permute.xlu0 %v1586_v24  ;;  %1489 = vset.pattern.permute.xlu1 %v1587_v22  ;;  %v36_v22 = vld [vmem:[%s2188_s2 + $0x20] sm:$0xf] }
 0x7e8   :  { %v874_v36 = vadd.f32 %v873_v28, %v868_v29 }
 0x7e9   :  { %v1224_v37 = vmax.f32 %v641_v35, 0.0  ;;  %1372 = vst.msk [vmem:[%s2191_s4 + $0x8] sm:$0xff] %vm68_vm2, %v641_v35 }
 0x7ea   :  { %v875_v9 = vmul.f32 %v874_v36, %v1683_v52 }
 0x7eb   :  { %1226 = vrot.lane.b32.xlu1 %v1224_v37, %s1549_s21  ;;  %v1239_v7 = vmul.f32 %v1237_v0, %v1224_v37 }
 0x7ec   :  { %v1055_v38 = vpop.permute.xlu1 %1054  ;;  %v876_v26 = vpack.c.bf16 %v875_v9, %v875_v9 }
 0x7ed   :  { %v1057_v40 = vmul.f32 %v1055_v38, %v1882_v58 }
 0x7ee   :  { %v881_v41 = vsel %vm51_vm0, %v876_v26, 0  ;;  %1487 = vset.pattern.permute.xlu2 %v1585_v6 }
 0x7ef   :  { %890 = vmatpush.bf16.msra.mxu1 %v881_v41  ;;  %v1063_v46 = vadd.f32 %v1062_v42, %v1057_v40 }
 0x7f1   :  { %v1069_v50 = vadd.f32 %v1068_v47, %v1063_v46  ;;  %v1588_v46 = vmov 23   ;;  %v1589_v47 = vmov 25  }
 0x7f3   :  { %1241 = vrot.lane.b32.xlu1 %v1224_v37, %s1548_s0 }
 0x7f5   :  { %v1072_v49 = vpop.permute.xlu1 %1071 }
 0x7f6   :  { %v1074_v51 = vmul.f32 %v1072_v49, %v1673_v43  ;;  %v39_v43 = vld [vmem:[%s2188_s2 + $0x2c] sm:$0xf]  ;;  %v1590_v49 = vmov 30  }
 0x7f8   :  { %v1075_v54 = vadd.f32 %v1074_v51, %v1069_v50 }
 0x7fa   :  { %v1081_v58 = vadd.f32 %v1080_v53, %v1075_v54  ;;  %v37_v53 = vld [vmem:[%s2188_s2 + $0x24] sm:$0xf]  ;;  %v41_v54 = vld [vmem:[%s2188_s2 + $0x34] sm:$0xf] }
 0x7fb   :  { %1388 = vmatmul.msk.bf16.vlgmr.msra.gmra.mxu1 %vm47_vm1, %v37_v53 }
 0x7fc   :  { %v1082_v55 = vmul.f32 %v1081_v58, %v1683_v52  ;;  %v1591_v58 = vmov 31  }
 0x7fe   :  { %v1083_v56 = vpack.c.bf16 %v1082_v55, %v1082_v55  ;;  %v1592_v55 = vmov 32  }
 0x7ff   :  { %v1232_v62 = vpop.permute.xlu2 %1231 }
 0x800   :  { %v1088_v45 = vsel %vm51_vm0, %v1083_v56, 0 }
 0x801   :  { %1097 = vmatpush.bf16.msra.mxu3 %v1088_v45 }
 0x804   :  { %1390 = vmatmul.msk.bf16.vlgmr.msra.gmra.mxu3 %vm47_vm1, %v39_v43 }
 0x831   :  { %v696_v57 = vpop.f32.mrf.mxu3 }
 0x832   :  { %v700_v59 = vsel %vm68_vm2, %v696_v57, 0.0  ;;  %v703_v61 = vmul.f32 %v696_v57, %v696_v57 }
 0x833   :  { %701 = vadd.xlane.f32.xlu1 %v700_v59 }
 0x834   :  { %v704_v34 = vsel %vm68_vm2, %v703_v61, 0.0 }
 0x835   :  { %705 = vadd.xlane.f32.xlu2 %v704_v34 }
 0x839   :  { %v698_v60 = vpop.f32.mrf.mxu3 }
 0x840   :  { %v1247_v4 = vpop.permute.xlu2 %1246 }
 0x84d   :  { %747 = vperm.xlu2 %1487, %v1915_v21  }
 0x855   :  { %1490 = vset.pattern.permute.xlu2 %v1590_v49 }
 0x85d   :  { %v1227_v63 = vpop.permute.xlu1 %1226 }
 0x85e   :  { %v1229_v5 = vsel %vm146_vm14, 0.0, %v1227_v63 }
 0x85f   :  { %v1234_v2 = vmul.f32 %v1232_v62, %v1229_v5 }
 0x861   :  { %v1240_v11 = vadd.f32 %v1239_v7, %v1234_v2 }
 0x865   :  { %v1242_v8 = vpop.permute.xlu1 %1241 }
 0x866   :  { %v1244_v10 = vsel %vm163_vm13, %v1242_v8, 0.0 }
 0x867   :  { %v1249_v14 = vmul.f32 %v1247_v4, %v1244_v10 }
 0x869   :  { %v1250_v13 = vadd.f32 %v1249_v14, %v1240_v11 }
 0x86b   :  { %v1251_v15 = vmul.f32 %v1250_v13, %v1683_v52 }
 0x86d   :  { %v1252_v23 = vpack.c.bf16 %v1251_v15, %v1251_v15 }
 0x86f   :  { %v1257_v16 = vsel %vm51_vm0, %v1252_v23, 0 }
 0x870   :  { %1266 = vmatpush.bf16.msrb.mxu1 %v1257_v16  ;;  %v1593_v16 = vmov 33  }
 0x873   :  { %1392 = vmatmul.msk.bf16.vlgmr.msrb.gmra.mxu1 %vm47_vm1, %v41_v54 }
 0x887   :  { %v1956_v42 = vpop.f32.mrf.mxu3 }
 0x888   :  { %v1103_v48 = vsel %vm68_vm2, %v1956_v42, 0.0  ;;  %v1106_v50 = vmul.f32 %v1956_v42, %v1956_v42 }
 0x88a   :  { %v1107_v51 = vsel %vm68_vm2, %v1106_v50, 0.0 }
 0x88f   :  { %v1101_v44 = vpop.f32.mrf.mxu3 }
 0x890   :  { %v1998_v44 = vpop.f32.mrf.mxu1 }
 0x898   :  { %v894_v53 = vpop.f32.mrf.mxu1 }
 0x8a6   :  { %v702_v33 = vpop.xlane.xlu1 %701 }
 0x8a7   :  { %v707_v17 = vmul.f32 0.03125, %v702_v33 }
 0x8a8   :  { %v706_v18 = vpop.xlane.xlu2 %705 }
 0x8a9   :  { %v709_v25 = vmul.f32 %v707_v17, %v707_v17  ;;  %v708_v27 = vmul.f32 0.03125, %v706_v18  ;;  %v722_v38 = vsub.f32 %v696_v57, %v707_v17 }
 0x8ab   :  { %v710_v28 = vsub.f32 %v708_v27, %v709_v25 }
 0x8ad   :  { %v711_v29 = vadd.f32 1e-05, %v710_v28 }
 0x8af   :  { %1524 = vrsqrt.f32 %v711_v29  ;;  %vm718_vm9 = vweird.f32 %v711_v29 }
 0x8b0   :  { %v748_v61 = vpop.permute.xlu2 %747 }
 0x8b5   :  { %v1525_v31 = vpop.eup %1524 }
 0x8b6   :  { %v713_v35 = vmul.f32 %v1525_v31, %v711_v29  ;;  %vm719_vm7 = vweird.f32 %v1525_v31 }
 0x8b7   :  { %vm720_vm10 = vmor %vm718_vm9, %vm719_vm7 }
 0x8b8   :  { %v714_v36 = vmul.f32 %v1525_v31, %v713_v35 }
 0x8ba   :  { %v715_v37 = vmul.f32 0.5, %v714_v36 }
 0x8bc   :  { %v716_v9 = vsub.f32 1.5, %v715_v37 }
 0x8be   :  { %v717_v20 = vmul.f32 %v1525_v31, %v716_v9 }
 0x8c0   :  { %v721_v26 = vsel %vm720_vm10, %v1525_v31, %v717_v20 }
 0x8c1   :  { %v723_v39 = vmul.f32 %v722_v38, %v721_v26 }
 0x8c3   :  { %v724_v40 = vsel %vm1645_vm12, %v723_v39, 0.0 }
 0x8c4   :  { %v725_v41 = vmax.f32 %v724_v40, 0.0 }
 0x8c6   :  { %762 = vrot.lane.b32.xlu2 %v725_v41, %s1559_s5  ;;  %752 = vrot.lane.b32.xlu1 %v725_v41, %s1548_s0  ;;  %v750_v5 = vmul.f32 %v748_v61, %v725_v41 }
 0x8c7   :  { %727 = vrot.lane.b32.xlu0 %v725_v41, %s1557_s30 }
 0x8ce   :  { %767 = vperm.xlu1 %1489, %v1915_v21  }
 0x8cf   :  { %732 = vperm.xlu0 %1485, %v1915_v21  }
 0x8d7   :  { %736 = vrot.lane.b32.xlu0 %v725_v41, %s1549_s21 }
 0x8d8   :  { %1486 = vset.pattern.permute.xlu0 %v1588_v46 }
 0x8df   :  { %741 = vperm.xlu0 %1486, %v1915_v21  }
 0x8e7   :  { %1488 = vset.pattern.permute.xlu0 %v1589_v47 }
 0x8e8   :  { %757 = vperm.xlu0 %1488, %v1915_v21  }
 0x8ef   :  { %1104 = vadd.xlane.f32.xlu2 %v1103_v48 }
 0x8f0   :  { %v2007_v54 = vpop.f32.mrf.mxu1 }
 0x8f8   :  { %1108 = vadd.xlane.f32.xlu1 %v1107_v51 }
 0x907   :  { %825 = vrot.lane.b32.xlu2 %v1741_v19, %s1548_s0 }
 0x90f   :  { %922 = vrot.lane.b32.xlu2 %v1765_v3, %s1555_s29 }
 0x917   :  { %927 = vperm.xlu2 %1490, %v1915_v21  }
 0x91f   :  { %1491 = vset.pattern.permute.xlu2 %v1591_v58  ;;  %v1594_v58 = vmov 40  }
 0x920   :  { %936 = vperm.xlu2 %1491, %v1915_v21   ;;  %v763_v0 = vpop.permute.xlu2 %762 }
 0x921   :  { %v765_v11 = vsel %vm2199_vm5, %v763_v0, 0.0 }
 0x928   :  { %1492 = vset.pattern.permute.xlu2 %v1592_v55  ;;  %v1270_v55 = vpop.f32.mrf.mxu1 }
 0x929   :  { %942 = vperm.xlu2 %1492, %v1915_v21  }
 0x931   :  { %1493 = vset.pattern.permute.xlu2 %v1593_v16 }
 0x932   :  { %952 = vperm.xlu2 %1493, %v1915_v21  }
 0x938   :  { %v753_v59 = vpop.permute.xlu1 %752 }
 0x939   :  { %v728_v56 = vpop.permute.xlu0 %727  ;;  %v755_v2 = vsel %vm163_vm13, %v753_v59, 0.0 }
 0x93a   :  { %v730_v6 = vsel %vm412_vm8, 0.0, %v728_v56  ;;  %1495 = vset.pattern.permute.xlu2 %v1594_v58 }
 0x940   :  { %v768_v4 = vpop.permute.xlu1 %767 }
 0x941   :  { %v733_v45 = vpop.permute.xlu0 %732  ;;  %v770_v14 = vmul.f32 %v768_v4, %v765_v11 }
 0x942   :  { %v735_v62 = vmul.f32 %v733_v45, %v730_v6  ;;  %v1595_v45 = vmov 43   ;;  %v1272_v6 = vsel %vm68_vm2, %v2007_v54, 0.0 }
 0x949   :  { %v737_v57 = vpop.permute.xlu0 %736 }
 0x94a   :  { %v739_v60 = vsel %vm146_vm14, 0.0, %v737_v57  ;;  %v1596_v57 = vmov 44  }
 0x951   :  { %v742_v34 = vpop.permute.xlu0 %741 }
 0x952   :  { %v744_v43 = vmul.f32 %v742_v34, %v739_v60 }
 0x954   :  { %v745_v63 = vadd.f32 %v744_v43, %v735_v62  ;;  %v1597_v62 = vmov 42  }
 0x955   :  { %1497 = vset.pattern.permute.xlu0 %v1597_v62 }
 0x956   :  { %v751_v8 = vadd.f32 %v750_v5, %v745_v63  ;;  %v896_v63 = vsel %vm68_vm2, %v1998_v44, 0.0  ;;  %v1598_v5 = vmov 49  }
 0x95a   :  { %v758_v7 = vpop.permute.xlu0 %757 }
 0x95b   :  { %v760_v10 = vmul.f32 %v758_v7, %v755_v2 }
 0x95d   :  { %v761_v13 = vadd.f32 %v760_v10, %v751_v8 }
 0x95f   :  { %v771_v15 = vadd.f32 %v770_v14, %v761_v13 }
 0x961   :  { %v772_v23 = vmul.f32 %v771_v15, %v1683_v52 }
 0x962   :  { %v1105_v33 = vpop.xlane.xlu2 %1104 }
 0x963   :  { %v773_v17 = vpack.c.bf16 %v772_v23, %v772_v23  ;;  %v1110_v24 = vmul.f32 0.03125, %v1105_v33 }
 0x965   :  { %v778_v18 = vsel %vm51_vm0, %v773_v17, 0  ;;  %v1112_v25 = vmul.f32 %v1110_v24, %v1110_v24  ;;  %v1125_v46 = vsub.f32 %v1956_v42, %v1110_v24  ;;  %v1275_v42 = vmul.f32 %v2007_v54, %v2007_v54 }
 0x966   :  { %787 = vmatpush.bf16.msra.mxu0 %v778_v18  ;;  %v1599_v18 = vmov 34  }
 0x967   :  { %v1276_v56 = vsel %vm68_vm2, %v1275_v42, 0.0  ;;  %1494 = vset.pattern.permute.xlu1 %v1599_v18 }
 0x969   :  { %1387 = vmatmul.msk.bf16.vlgmr.msra.gmra.mxu0 %vm47_vm1, %v36_v22 }
 0x96a   :  { %v1993_v27 = vpop.permute.xlu2 %825 }
 0x96b   :  { %v1109_v28 = vpop.xlane.xlu1 %1108  ;;  %v828_v8 = vsel %vm163_vm13, %v1993_v27, 0.0 }
 0x96c   :  { %v1111_v29 = vmul.f32 0.03125, %v1109_v28 }
 0x96e   :  { %v1113_v31 = vsub.f32 %v1111_v29, %v1112_v25 }
 0x970   :  { %v1114_v35 = vadd.f32 1e-05, %v1113_v31 }
 0x972   :  { %1526 = vrsqrt.f32 %v1114_v35  ;;  %v923_v36 = vpop.permute.xlu2 %922  ;;  %vm1121_vm11 = vweird.f32 %v1114_v35 }
 0x973   :  { %v925_v20 = vsel %vm2200_vm6, 0.0, %v923_v36 }
 0x978   :  { %v1527_v37 = vpop.eup %1526 }
 0x979   :  { %v1116_v9 = vmul.f32 %v1527_v37, %v1114_v35  ;;  %vm1122_vm15 = vweird.f32 %v1527_v37 }
 0x97a   :  { %v928_v38 = vpop.permute.xlu2 %927  ;;  %vm1123_vm3 = vmor %vm1121_vm11, %vm1122_vm15 }
 0x97b   :  { %v1117_v26 = vmul.f32 %v1527_v37, %v1116_v9  ;;  %v1996_v39 = vmul.f32 %v928_v38, %v925_v20  ;;  %v1600_v38 = vmov 41  }
 0x97d   :  { %v1118_v40 = vmul.f32 0.5, %v1117_v26  ;;  %v1601_v26 = vmov 50  }
 0x97f   :  { %v1119_v41 = vsub.f32 1.5, %v1118_v40 }
 0x981   :  { %v1120_v47 = vmul.f32 %v1527_v37, %v1119_v41 }
 0x982   :  { %v2046_v15 = vpop.permute.xlu2 %936 }
 0x983   :  { %v1124_v48 = vsel %vm1123_vm3, %v1527_v37, %v1120_v47 }
 0x984   :  { %v1126_v49 = vmul.f32 %v1125_v46, %v1124_v48 }
 0x986   :  { %v1127_v50 = vsel %vm1645_vm12, %v1126_v49, 0.0  ;;  %v1602_v49 = vmov 48  }
 0x987   :  { %v2003_v51 = vmax.f32 %v1127_v50, 0.0 }
 0x989   :  { %1130 = vrot.lane.b32.xlu2 %v2003_v51, %s1557_s30 }
 0x98a   :  { %v2051_v16 = vpop.permute.xlu2 %942 }
 0x992   :  { %v2056_v17 = vpop.permute.xlu2 %952 }
 0x9b2   :  { %1277 = vadd.xlane.f32.xlu2 %v1276_v56 }
 0x9ca   :  { %1135 = vperm.xlu2 %1495, %v1915_v21  }
 0x9d2   :  { %1155 = vrot.lane.b32.xlu2 %v2003_v51, %s1548_s0 }
 0x9d3   :  { %1498 = vset.pattern.permute.xlu2 %v1595_v45 }
 0x9da   :  { %1160 = vperm.xlu2 %1498, %v1915_v21  }
 0x9e2   :  { %1165 = vrot.lane.b32.xlu2 %v2003_v51, %s1559_s5 }
 0x9e3   :  { %1501 = vset.pattern.permute.xlu2 %v1596_v57  ;;  %v2058_v24 = vpop.permute.xlu2 %1130  ;;  %v2082_v57 = vsel %vm1645_vm12, %v1649_v32, -1e+30 }
 0x9e6   :  { %v2018_v59 = vpop.f32.mrf.mxu0 }
 0x9e7   :  { %v793_v61 = vsel %vm68_vm2, %v2018_v59, 0.0  ;;  %v796_v34 = vmul.f32 %v2018_v59, %v2018_v59 }
 0x9e8   :  { %794 = vadd.xlane.f32.xlu0 %v793_v61 }
 0x9e9   :  { %v797_v60 = vsel %vm68_vm2, %v796_v34, 0.0 }
 0x9ea   :  { %798 = vadd.xlane.f32.xlu1 %v797_v60  ;;  %1170 = vperm.xlu2 %1501, %v1915_v21  }
 0x9ee   :  { %v791_v43 = vpop.f32.mrf.mxu0 }
 0x9fc   :  { %820 = vrot.lane.b32.xlu0 %v1741_v19, %s1549_s21 }
 0xa25   :  { %v1278_v27 = vpop.xlane.xlu2 %1277 }
 0xa26   :  { %1273 = vadd.xlane.f32.xlu0 %v1272_v6  ;;  %v1280_v28 = vmul.f32 0.03125, %v1278_v27 }
 0xa2e   :  { %897 = vadd.xlane.f32.xlu0 %v896_v63 }
 0xa42   :  { %957 = vrot.lane.b32.xlu0 %v1765_v3, %s1568_s10 }
 0xa4a   :  { %1150 = vperm.xlu0 %1497, %v1915_v21  }
 0xa52   :  { %1500 = vset.pattern.permute.xlu0 %v1598_v5 }
 0xa53   :  { %1309 = vperm.xlu0 %1500, %v1915_v21  }
 0xa5b   :  { %v795_v0 = vpop.xlane.xlu0 %794  ;;  %1503 = vset.pattern.permute.xlu0 %v1601_v26 }
 0xa5c   :  { %v800_v58 = vmul.f32 0.03125, %v795_v0 }
 0xa5d   :  { %v799_v55 = vpop.xlane.xlu1 %798 }
 0xa5e   :  { %v801_v42 = vmul.f32 0.03125, %v799_v55 }
 0xa6e   :  { %v821_v2 = vpop.permute.xlu0 %820 }
 0xa6f   :  { %v823_v4 = vsel %vm146_vm14, 0.0, %v821_v2 }
 0xa70   :  { %v824_v7 = vadd.f32 %v823_v4, %v1741_v19 }
 0xa72   :  { %v829_v10 = vadd.f32 %v828_v8, %v824_v7 }
 0xa74   :  { %v830_v11 = vmul.f32 %v829_v10, %v1838_v12  ;;  %v899_v12 = vmul.f32 %v1998_v44, %v1998_v44 }
 0xa76   :  { %v2042_v14 = vmul.f32 %v830_v11, %v1683_v52  ;;  %v900_v33 = vsel %vm68_vm2, %v899_v12, 0.0 }
 0xa78   :  { %v832_v13 = vsel %vm68_vm2, %v2042_v14, 0.0  ;;  %v835_v23 = vmul.f32 %v2042_v14, %v2042_v14 }
 0xa79   :  { %833 = vadd.xlane.f32.xlu1 %v832_v13 }
 0xa7a   :  { %v836_v19 = vsel %vm68_vm2, %v835_v23, 0.0 }
 0xa81   :  { %837 = vadd.xlane.f32.xlu1 %v836_v19 }
 0xa89   :  { %901 = vadd.xlane.f32.xlu1 %v900_v33 }
 0xa99   :  { %v1274_v22 = vpop.xlane.xlu0 %1273 }
 0xa9a   :  { %v1279_v25 = vmul.f32 0.03125, %v1274_v22 }
 0xa9c   :  { %v1281_v29 = vmul.f32 %v1279_v25, %v1279_v25  ;;  %v1294_v47 = vsub.f32 %v2007_v54, %v1279_v25  ;;  %v802_v54 = vmul.f32 %v800_v58, %v800_v58 }
 0xa9e   :  { %v1282_v31 = vsub.f32 %v1280_v28, %v1281_v29  ;;  %v803_v56 = vsub.f32 %v801_v42, %v802_v54  ;;  %v815_v29 = vsub.f32 %v2018_v59, %v800_v58 }
 0xaa0   :  { %v1283_v35 = vadd.f32 1e-05, %v1282_v31  ;;  %v804_v45 = vadd.f32 1e-05, %v803_v56  ;;  %v945_v56 = vmul.f32 %v2051_v16, %v1765_v3 }
 0xaa1   :  { %v898_v0 = vpop.xlane.xlu0 %897 }
 0xaa2   :  { %931 = vrot.lane.b32.xlu1 %v1765_v3, %s1557_s30  ;;  %1528 = vrsqrt.f32 %v1283_v35  ;;  %vm1290_vm4 = vweird.f32 %v1283_v35  ;;  %v903_v32 = vmul.f32 0.03125, %v898_v0  ;;  %vm811_vm5 = vweird.f32 %v804_v45 }
 0xaa3   :  { %1530 = vrsqrt.f32 %v804_v45 }
 0xaa4   :  { %v905_v8 = vmul.f32 %v903_v32, %v903_v32 }
 0xaa8   :  { %v1529_v36 = vpop.eup %1528 }
 0xaa9   :  { %v1285_v37 = vmul.f32 %v1529_v36, %v1283_v35  ;;  %vm1291_vm7 = vweird.f32 %v1529_v36  ;;  %v1531_v34 = vpop.eup %1530 }
 0xaaa   :  { %947 = vrot.lane.b32.xlu1 %v1765_v3, %s1559_s5  ;;  %vm1292_vm9 = vmor %vm1290_vm4, %vm1291_vm7  ;;  %v806_v43 = vmul.f32 %v1531_v34, %v804_v45  ;;  %vm812_vm10 = vweird.f32 %v1531_v34 }
 0xaab   :  { %v1286_v9 = vmul.f32 %v1529_v36, %v1285_v37  ;;  %vm813_vm6 = vmor %vm811_vm5, %vm812_vm10  ;;  %vm2201_vm10 = vcmask 375808   ;;  %vm2202_vm5 = vcmask 359424  }
 0xaac   :  { %v807_v5 = vmul.f32 %v1531_v34, %v806_v43 }
 0xaad   :  { %v1287_v20 = vmul.f32 0.5, %v1286_v9 }
 0xaae   :  { %v808_v4 = vmul.f32 0.5, %v807_v5 }
 0xaaf   :  { %v1288_v40 = vsub.f32 1.5, %v1287_v20 }
 0xab0   :  { %v809_v13 = vsub.f32 1.5, %v808_v4 }
 0xab1   :  { %v1289_v41 = vmul.f32 %v1529_v36, %v1288_v40 }
 0xab2   :  { %962 = vperm.xlu1 %1494, %v1915_v21   ;;  %v810_v33 = vmul.f32 %v1531_v34, %v809_v13 }
 0xab3   :  { %v1293_v46 = vsel %vm1292_vm9, %v1529_v36, %v1289_v41 }
 0xab4   :  { %v1295_v48 = vmul.f32 %v1294_v47, %v1293_v46  ;;  %v814_v25 = vsel %vm813_vm6, %v1531_v34, %v810_v33  ;;  %v1136_v46 = vpop.permute.xlu2 %1135  ;;  %vm2203_vm6 = vmmov %vm2201_vm10 }
 0xab5   :  { %v816_v36 = vmul.f32 %v815_v29, %v814_v25 }
 0xab6   :  { %v1296_v50 = vsel %vm1645_vm12, %v1295_v48, 0.0 }
 0xab7   :  { %v2072_v53 = vmax.f32 %v1296_v50, 0.0  ;;  %v817_v40 = vsel %vm1645_vm12, %v816_v36, 0.0 }
 0xaba   :  { %1139 = vrot.lane.b32.xlu1 %v2003_v51, %s1549_s21 }
 0xabb   :  { %1496 = vset.pattern.permute.xlu1 %v1600_v38 }
 0xabc   :  { %v1156_v34 = vpop.permute.xlu2 %1155 }
 0xabd   :  { %v1158_v33 = vsel %vm163_vm13, %v1156_v34, 0.0 }
 0xac2   :  { %1144 = vperm.xlu1 %1496, %v1915_v21  }
 0xaca   :  { %1499 = vset.pattern.permute.xlu1 %v1602_v49 }
 0xacb   :  { %1304 = vperm.xlu1 %1499, %v1915_v21  }
 0xad3   :  { %1299 = vrot.lane.b32.xlu1 %v2072_v53, %s1549_s21 }
 0xad4   :  { %1502 = vset.pattern.permute.xlu1 %v1601_v26 }
 0xadb   :  { %1314 = vrot.lane.b32.xlu1 %v2072_v53, %s1548_s0 }
 0xae3   :  { %1319 = vperm.xlu1 %1502, %v1915_v21  }
 0xaeb   :  { %1016 = vrot.lane.b32.xlu1 %v2082_v57, %s1549_s21 }
 0xaec   :  { %v834_v61 = vpop.xlane.xlu1 %833 }
 0xaed   :  { %v839_v60 = vmul.f32 0.03125, %v834_v61 }
 0xaef   :  { %v841_v62 = vmul.f32 %v839_v60, %v839_v60  ;;  %v854_v37 = vsub.f32 %v2042_v14, %v839_v60  ;;  %v918_v14 = vsub.f32 %v1998_v44, %v903_v32 }
 0xaf3   :  { %1021 = vrot.lane.b32.xlu1 %v2082_v57, %s1548_s0 }
 0xaf4   :  { %v838_v6 = vpop.xlane.xlu1 %837 }
 0xaf5   :  { %v840_v21 = vmul.f32 0.03125, %v838_v6  ;;  %v958_v6 = vpop.permute.xlu0 %957 }
 0xaf7   :  { %v842_v63 = vsub.f32 %v840_v21, %v841_v62  ;;  %v1161_v21 = vpop.permute.xlu2 %1160 }
 0xaf9   :  { %v843_v2 = vadd.f32 1e-05, %v842_v63 }
 0xafb   :  { %1532 = vrsqrt.f32 %v843_v2  ;;  %vm850_vm15 = vweird.f32 %v843_v2 }
 0xafc   :  { %v902_v7 = vpop.xlane.xlu1 %901 }
 0xafd   :  { %v904_v10 = vmul.f32 0.03125, %v902_v7  ;;  %v38_v7 = vld [vmem:[%s2188_s2 + $0x28] sm:$0xf] }
 0xaff   :  { %v906_v11 = vsub.f32 %v904_v10, %v905_v8  ;;  %v1166_v4 = vpop.permute.xlu2 %1165  ;;  %v1151_v8 = vpop.permute.xlu0 %1150 }
 0xb01   :  { %v1533_v23 = vpop.eup %1532  ;;  %v907_v19 = vadd.f32 1e-05, %v906_v11 }
 0xb02   :  { %v845_v12 = vmul.f32 %v1533_v23, %v843_v2  ;;  %vm851_vm11 = vweird.f32 %v1533_v23 }
 0xb03   :  { %1534 = vrsqrt.f32 %v907_v19  ;;  %vm852_vm3 = vmor %vm850_vm15, %vm851_vm11  ;;  %vm914_vm7 = vweird.f32 %v907_v19 }
 0xb04   :  { %v846_v18 = vmul.f32 %v1533_v23, %v845_v12 }
 0xb06   :  { %v847_v22 = vmul.f32 0.5, %v846_v18 }
 0xb07   :  { %v1171_v18 = vpop.permute.xlu2 %1170 }
 0xb08   :  { %v848_v27 = vsub.f32 1.5, %v847_v22  ;;  %v1163_v22 = vmul.f32 %v1161_v21, %v1158_v33 }
 0xb09   :  { %v1535_v28 = vpop.eup %1534 }
 0xb0a   :  { %v849_v31 = vmul.f32 %v1533_v23, %v848_v27  ;;  %v909_v35 = vmul.f32 %v1535_v28, %v907_v19  ;;  %vm915_vm4 = vweird.f32 %v1535_v28  ;;  %v1153_v19 = vmul.f32 %v1151_v8, %v2003_v51  ;;  %v40_v51 = vld [vmem:[%s2188_s2 + $0x30] sm:$0xf] }
 0xb0b   :  { %vm916_vm9 = vmor %vm914_vm7, %vm915_vm4  ;;  %v1168_v27 = vsel %vm2203_vm6, %v1166_v4, 0.0 }
 0xb0c   :  { %v853_v9 = vsel %vm852_vm3, %v1533_v23, %v849_v31  ;;  %v910_v20 = vmul.f32 %v1535_v28, %v909_v35 }
 0xb0d   :  { %v855_v38 = vmul.f32 %v854_v37, %v853_v9 }
 0xb0e   :  { %v911_v26 = vmul.f32 0.5, %v910_v20 }
 0xb0f   :  { %v2094_v41 = vsel %vm1645_vm12, %v855_v38, 0.0 }
 0xb10   :  { %v857_v59 = vadd.f32 %v2094_v41, %v817_v40  ;;  %v912_v47 = vsub.f32 1.5, %v911_v26  ;;  %v1310_v26 = vpop.permute.xlu0 %1309 }
 0xb12   :  { %v913_v48 = vmul.f32 %v1535_v28, %v912_v47 }
 0xb14   :  { %v917_v49 = vsel %vm916_vm9, %v1535_v28, %v913_v48  ;;  %v932_v50 = vpop.permute.xlu1 %931  ;;  %v1173_v28 = vmul.f32 %v1171_v18, %v1168_v27 }
 0xb15   :  { %v919_v58 = vmul.f32 %v918_v14, %v917_v49  ;;  %v934_v55 = vsel %vm412_vm8, 0.0, %v932_v50 }
 0xb16   :  { %v939_v54 = vmul.f32 %v2046_v15, %v934_v55  ;;  %v960_v15 = vsel %vm2202_vm5, %v958_v6, 0.0 }
 0xb17   :  { %v920_v42 = vsel %vm1645_vm12, %v919_v58, 0.0 }
 0xb18   :  { %v2104_v45 = vadd.f32 %v920_v42, %v857_v59  ;;  %v940_v61 = vadd.f32 %v939_v54, %v1996_v39  ;;  %v42_v42 = vld [vmem:[%s2188_s2 + $0x38] sm:$0xf] }
 0xb1a   :  { %v946_v44 = vadd.f32 %v945_v56, %v940_v61 }
 0xb1c   :  { %v948_v60 = vpop.permute.xlu1 %947 }
 0xb1d   :  { %v950_v43 = vsel %vm2201_vm10, %v948_v60, 0.0 }
 0xb1e   :  { %v955_v62 = vmul.f32 %v2056_v17, %v950_v43  ;;  %v1133_v17 = vsel %vm412_vm8, 0.0, %v2058_v24 }
 0xb1f   :  { %v1138_v13 = vmul.f32 %v1136_v46, %v1133_v17  ;;  %v1312_v46 = vmul.f32 %v1310_v26, %v2072_v53 }
 0xb20   :  { %v956_v5 = vadd.f32 %v955_v62, %v946_v44 }
 0xb24   :  { %v963_v63 = vpop.permute.xlu1 %962 }
 0xb25   :  { %v965_v0 = vmul.f32 %v963_v63, %v960_v15 }
 0xb27   :  { %v966_v2 = vadd.f32 %v965_v0, %v956_v5 }
 0xb29   :  { %v967_v3 = vmul.f32 %v966_v2, %v1683_v52 }
 0xb2b   :  { %v968_v16 = vpack.c.bf16 %v967_v3, %v967_v3 }
 0xb2c   :  { %v1140_v32 = vpop.permute.xlu1 %1139 }
 0xb2d   :  { %v973_v39 = vsel %vm51_vm0, %v968_v16, 0  ;;  %v1142_v10 = vsel %vm146_vm14, 0.0, %v1140_v32 }
 0xb2e   :  { %982 = vmatpush.bf16.msra.mxu2 %v973_v39 }
 0xb31   :  { %1389 = vmatmul.msk.bf16.vlgmr.msra.gmra.mxu2 %vm47_vm1, %v38_v7 }
 0xb34   :  { %v1145_v11 = vpop.permute.xlu1 %1144 }
 0xb35   :  { %v1147_v23 = vmul.f32 %v1145_v11, %v1142_v10 }
 0xb37   :  { %v1148_v12 = vadd.f32 %v1147_v23, %v1138_v13 }
 0xb39   :  { %v1154_v25 = vadd.f32 %v1153_v19, %v1148_v12 }
 0xb3b   :  { %v1164_v29 = vadd.f32 %v1163_v22, %v1154_v25 }
 0xb3d   :  { %v1305_v31 = vpop.permute.xlu1 %1304  ;;  %v1174_v24 = vadd.f32 %v1173_v28, %v1164_v29 }
 0xb3f   :  { %v1175_v35 = vmul.f32 %v1174_v24, %v1683_v52 }
 0xb41   :  { %v1176_v36 = vpack.c.bf16 %v1175_v35, %v1175_v35 }
 0xb43   :  { %v1181_v37 = vsel %vm51_vm0, %v1176_v36, 0 }
 0xb44   :  { %1190 = vmatpush.bf16.msrb.mxu0 %v1181_v37 }
 0xb45   :  { %v1300_v9 = vpop.permute.xlu1 %1299 }
 0xb46   :  { %v1302_v38 = vsel %vm146_vm14, 0.0, %v1300_v9 }
 0xb47   :  { %1391 = vmatmul.msk.bf16.vlgmr.msrb.gmra.mxu0 %vm47_vm1, %v40_v51  ;;  %v1307_v40 = vmul.f32 %v1305_v31, %v1302_v38 }
 0xb49   :  { %v1313_v48 = vadd.f32 %v1312_v46, %v1307_v40 }
 0xb4d   :  { %v1315_v20 = vpop.permute.xlu1 %1314 }
 0xb4e   :  { %v1317_v59 = vsel %vm163_vm13, %v1315_v20, 0.0 }
 0xb55   :  { %v1320_v47 = vpop.permute.xlu1 %1319 }
 0xb56   :  { %v1322_v14 = vmul.f32 %v1320_v47, %v1317_v59 }
 0xb58   :  { %v1323_v49 = vadd.f32 %v1322_v14, %v1313_v48 }
 0xb5a   :  { %v1324_v50 = vmul.f32 %v1323_v49, %v1683_v52 }
 0xb5c   :  { %v1325_v58 = vpack.c.bf16 %v1324_v50, %v1324_v50 }
 0xb5d   :  { %v1017_v55 = vpop.permute.xlu1 %1016 }
 0xb5e   :  { %v1330_v54 = vsel %vm51_vm0, %v1325_v58, 0  ;;  %v1019_v56 = vsel %vm146_vm14, 0.0, %v1017_v55 }
 0xb5f   :  { %1339 = vmatpush.bf16.msrb.mxu2 %v1330_v54  ;;  %v1020_v53 = vmax.f32 %v1019_v56, %v2082_v57 }
 0xb62   :  { %1393 = vmatmul.msk.bf16.vlgmr.msrb.gmra.mxu2 %vm47_vm1, %v42_v42 }
 0xb65   :  { %v1022_v61 = vpop.permute.xlu1 %1021 }
 0xb66   :  { %v1024_v34 = vsel %vm163_vm13, %v1022_v61, 0.0 }
 0xb67   :  { %v1025_v44 = vmax.f32 %v1020_v53, %v1024_v34 }
 0xb69   :  { %v2142_v52 = vsel %vm1645_vm12, %v1025_v44, 0.0 }
 0xb6a   :  { %v1027_v60 = vsel %vm68_vm2, %v2142_v52, 0.0  ;;  %v1030_v57 = vmul.f32 %v2142_v52, %v2142_v52 }
 0xb6b   :  { %1028 = vadd.xlane.f32.xlu1 %v1027_v60 }
 0xb6c   :  { %v1031_v63 = vsel %vm68_vm2, %v1030_v57, 0.0 }
 0xbb4   :  { %v984_v43 = vpop.f32.mrf.mxu2 }
 0xbb5   :  { %v988_v6 = vsel %vm68_vm2, %v984_v43, 0.0  ;;  %v991_v62 = vmul.f32 %v984_v43, %v984_v43 }
 0xbb6   :  { %989 = vadd.xlane.f32.xlu0 %v988_v6 }
 0xbb7   :  { %v992_v21 = vsel %vm68_vm2, %v991_v62, 0.0 }
 0xbb8   :  { %993 = vadd.xlane.f32.xlu2 %v992_v21 }
 0xbbc   :  { %v986_v15 = vpop.f32.mrf.mxu2 }
 0xbbe   :  { %1032 = vadd.xlane.f32.xlu0 %v1031_v63 }
 0xbc4   :  { %v2151_v5 = vpop.f32.mrf.mxu0 }
 0xbc5   :  { %v1196_v0 = vsel %vm68_vm2, %v2151_v5, 0.0  ;;  %v1199_v2 = vmul.f32 %v2151_v5, %v2151_v5 }
 0xbc6   :  { %1197 = vadd.xlane.f32.xlu2 %v1196_v0 }
 0xbc7   :  { %v1200_v3 = vsel %vm68_vm2, %v1199_v2, 0.0 }
 0xbc8   :  { %1201 = vadd.xlane.f32.xlu0 %v1200_v3 }
 0xbcc   :  { %v1194_v16 = vpop.f32.mrf.mxu0 }
 0xbde   :  { %v1029_v22 = vpop.xlane.xlu1 %1028 }
 0xbdf   :  { %v1034_v29 = vmul.f32 0.03125, %v1029_v22 }
 0xbe1   :  { %v1036_v9 = vmul.f32 %v1034_v29, %v1034_v29 }
 0xbe5   :  { %v2158_v32 = vpop.f32.mrf.mxu2 }
 0xbe6   :  { %v1345_v39 = vsel %vm68_vm2, %v2158_v32, 0.0  ;;  %v1348_v4 = vmul.f32 %v2158_v32, %v2158_v32 }
 0xbe7   :  { %1346 = vadd.xlane.f32.xlu2 %v1345_v39  ;;  %v1049_v39 = vsub.f32 %v2142_v52, %v1034_v29 }
 0xbe8   :  { %v1349_v7 = vsel %vm68_vm2, %v1348_v4, 0.0 }
 0xbe9   :  { %1350 = vadd.xlane.f32.xlu0 %v1349_v7 }
 0xbed   :  { %v1343_v17 = vpop.f32.mrf.mxu2 }
 0xc29   :  { %v990_v8 = vpop.xlane.xlu0 %989 }
 0xc2a   :  { %v995_v10 = vmul.f32 0.03125, %v990_v8 }
 0xc2b   :  { %v994_v11 = vpop.xlane.xlu2 %993 }
 0xc2c   :  { %v997_v13 = vmul.f32 %v995_v10, %v995_v10  ;;  %v996_v23 = vmul.f32 0.03125, %v994_v11  ;;  %v1010_v46 = vsub.f32 %v984_v43, %v995_v10 }
 0xc2e   :  { %v998_v19 = vsub.f32 %v996_v23, %v997_v13 }
 0xc30   :  { %v999_v12 = vadd.f32 1e-05, %v998_v19 }
 0xc31   :  { %v1033_v33 = vpop.xlane.xlu0 %1032 }
 0xc32   :  { %1536 = vrsqrt.f32 %v999_v12  ;;  %vm1006_vm0 = vweird.f32 %v999_v12  ;;  %v1035_v51 = vmul.f32 0.03125, %v1033_v33 }
 0xc34   :  { %v1037_v40 = vsub.f32 %v1035_v51, %v1036_v9 }
 0xc36   :  { %v1038_v14 = vadd.f32 1e-05, %v1037_v40 }
 0xc38   :  { %v1537_v18 = vpop.eup %1536  ;;  %vm1045_vm3 = vweird.f32 %v1038_v14 }
 0xc39   :  { %v1001_v25 = vmul.f32 %v1537_v18, %v999_v12  ;;  %v1198_v27 = vpop.xlane.xlu2 %1197  ;;  %vm1007_vm1 = vweird.f32 %v1537_v18 }
 0xc3a   :  { %v1203_v28 = vmul.f32 0.03125, %v1198_v27  ;;  %vm1008_vm13 = vmor %vm1006_vm0, %vm1007_vm1 }
 0xc3b   :  { %v1002_v31 = vmul.f32 %v1537_v18, %v1001_v25  ;;  %v1202_v24 = vpop.xlane.xlu0 %1201 }
 0xc3c   :  { %v1205_v35 = vmul.f32 %v1203_v28, %v1203_v28  ;;  %v1204_v36 = vmul.f32 0.03125, %v1202_v24  ;;  %v1218_v3 = vsub.f32 %v2151_v5, %v1203_v28 }
 0xc3d   :  { %v1003_v37 = vmul.f32 0.5, %v1002_v31 }
 0xc3e   :  { %v1206_v38 = vsub.f32 %v1204_v36, %v1205_v35 }
 0xc3f   :  { %v1004_v20 = vsub.f32 1.5, %v1003_v37 }
 0xc40   :  { %v1207_v47 = vadd.f32 1e-05, %v1206_v38 }
 0xc41   :  { %v1005_v26 = vmul.f32 %v1537_v18, %v1004_v20 }
 0xc42   :  { %1538 = vrsqrt.f32 %v1207_v47  ;;  %vm1214_vm14 = vweird.f32 %v1207_v47 }
 0xc43   :  { %v1009_v59 = vsel %vm1008_vm13, %v1537_v18, %v1005_v26  ;;  %1540 = vrsqrt.f32 %v1038_v14 }
 0xc44   :  { %v1011_v48 = vmul.f32 %v1010_v46, %v1009_v59 }
 0xc46   :  { %v1012_v49 = vsel %vm1645_vm12, %v1011_v48, 0.0 }
 0xc47   :  { %v1013_v50 = vadd.f32 %v1012_v49, %v2104_v45 }
 0xc48   :  { %v1539_v58 = vpop.eup %1538 }
 0xc49   :  { %1373 = vst.msk [vmem:[%s2191_s4 + $0x10] sm:$0xff] %vm68_vm2, %v1013_v50  ;;  %v1541_v55 = vpop.eup %1540  ;;  %v1209_v54 = vmul.f32 %v1539_v58, %v1207_v47  ;;  %vm1215_vm8 = vweird.f32 %v1539_v58 }
 0xc4a   :  { %v1040_v42 = vmul.f32 %v1541_v55, %v1038_v14  ;;  %vm1216_vm11 = vmor %vm1214_vm14, %vm1215_vm8  ;;  %vm1046_vm15 = vweird.f32 %v1541_v55 }
 0xc4b   :  { %v1210_v56 = vmul.f32 %v1539_v58, %v1209_v54  ;;  %vm1047_vm4 = vmor %vm1045_vm3, %vm1046_vm15 }
 0xc4c   :  { %v1041_v53 = vmul.f32 %v1541_v55, %v1040_v42 }
 0xc4d   :  { %v1211_v61 = vmul.f32 0.5, %v1210_v56 }
 0xc4e   :  { %v1042_v34 = vmul.f32 0.5, %v1041_v53 }
 0xc4f   :  { %v1212_v43 = vsub.f32 1.5, %v1211_v61 }
 0xc50   :  { %v1043_v21 = vsub.f32 1.5, %v1042_v34 }
 0xc51   :  { %v1213_v15 = vmul.f32 %v1539_v58, %v1212_v43 }
 0xc52   :  { %v1044_v0 = vmul.f32 %v1541_v55, %v1043_v21 }
 0xc53   :  { %v1217_v2 = vsel %vm1216_vm11, %v1539_v58, %v1213_v15 }
 0xc54   :  { %v1048_v16 = vsel %vm1047_vm4, %v1541_v55, %v1044_v0  ;;  %v1219_v4 = vmul.f32 %v1218_v3, %v1217_v2 }
 0xc55   :  { %v1050_v17 = vmul.f32 %v1049_v39, %v1048_v16 }
 0xc56   :  { %v1220_v10 = vsel %vm1645_vm12, %v1219_v4, 0.0 }
 0xc57   :  { %v1051_v13 = vsel %vm1645_vm12, %v1050_v17, 0.0 }
 0xc58   :  { %v1221_v23 = vadd.f32 %v1220_v10, %v1051_v13 }
 0xc5a   :  { %v1347_v44 = vpop.xlane.xlu2 %1346  ;;  %v1222_v5 = vadd.f32 %v1221_v23, %v2094_v41 }
 0xc5b   :  { %v1352_v60 = vmul.f32 0.03125, %v1347_v44 }
 0xc5c   :  { %v1351_v6 = vpop.xlane.xlu0 %1350  ;;  %v1223_v25 = vadd.f32 %v1222_v5, %v1761_v1 }
 0xc5d   :  { %v1354_v45 = vmul.f32 %v1352_v60, %v1352_v60  ;;  %v1353_v62 = vmul.f32 0.03125, %v1351_v6  ;;  %v1367_v52 = vsub.f32 %v2158_v32, %v1352_v60 }
 0xc5f   :  { %v1355_v57 = vsub.f32 %v1353_v62, %v1354_v45 }
 0xc61   :  { %v1356_v63 = vadd.f32 1e-05, %v1355_v57 }
 0xc63   :  { %1542 = vrsqrt.f32 %v1356_v63  ;;  %vm1363_vm9 = vweird.f32 %v1356_v63 }
 0xc69   :  { %v1543_v7 = vpop.eup %1542 }
 0xc6a   :  { %v1358_v8 = vmul.f32 %v1543_v7, %v1356_v63  ;;  %vm1364_vm7 = vweird.f32 %v1543_v7 }
 0xc6b   :  { %vm1365_vm10 = vmor %vm1363_vm9, %vm1364_vm7 }
 0xc6c   :  { %v1359_v11 = vmul.f32 %v1543_v7, %v1358_v8 }
 0xc6e   :  { %v1360_v19 = vmul.f32 0.5, %v1359_v11 }
 0xc70   :  { %v1361_v12 = vsub.f32 1.5, %v1360_v19 }
 0xc72   :  { %v1362_v33 = vmul.f32 %v1543_v7, %v1361_v12 }
 0xc74   :  { %v1366_v18 = vsel %vm1365_vm10, %v1543_v7, %v1362_v33 }
 0xc75   :  { %v1368_v22 = vmul.f32 %v1367_v52, %v1366_v18 }
 0xc77   :  { %v1369_v27 = vsel %vm1645_vm12, %v1368_v22, 0.0 }
 0xc78   :  { %v1370_v28 = vadd.f32 %v1369_v27, %v1223_v25 }
 0xc7a   :  { %1374 = vst.msk [vmem:[%s2191_s4 + $0x18] sm:$0xff] %vm68_vm2, %v1370_v28 }

</bundles_post_ra>
